<compile_context>
chip_gen: v6e
topology: v6e:2x2x1
jax: 0.10.0
libtpu: 0.0.40
codegen_flags: <defaults>
</compile_context>

<pallas_src>
import functools

import jax
import jax.numpy as jnp
from jax.experimental import pallas as pl
from jax.experimental.pallas import tpu as pltpu

_EPS = 1e-5
_F32 = jnp.float32


# --------------------------------------------------------------------------
# small helpers (trace-time Python ints only)
# --------------------------------------------------------------------------

def _pick_tile(n, cap):
    """Largest divisor of n that is <= cap and (a multiple of 8 or == n)."""
    for d in range(min(n, cap), 0, -1):
        if n % d == 0 and (d % 8 == 0 or d == n):
            return d
    return n


def _dense_factor(m, c, target=512):
    """Largest k dividing m with k*c <= target (lane-dense flattening factor)."""
    kmax = max(1, target // max(c, 1))
    for k in range(min(m, kmax), 0, -1):
        if m % k == 0:
            return k
    return 1


def _parallel(n):
    return pltpu.CompilerParams(dimension_semantics=("parallel",) * n)


# --------------------------------------------------------------------------
# Pallas kernels
# --------------------------------------------------------------------------

def _conv3x3_kernel(x_ref, w_ref, o_ref, *, width):
    """One padded input row -> one output row; dy lives on grid axis 2 and is
    accumulated into the (revisited) output block."""
    dy = pl.program_id(2)

    @pl.when(dy == 0)
    def _():
        o_ref[...] = jnp.zeros_like(o_ref)

    x = x_ref[0, 0]                      # (W+2, Cin)
    acc = o_ref[0, 0]                    # (W, Cout)
    cin = x.shape[-1]
    for dx in range(3):
        xs = x[dx:dx + width, :]         # (W, Cin)
        w = w_ref[0, dx]                 # (Cin, Cout)
        if cin == 1:                     # degenerate K=1: broadcast outer product
            acc = acc + xs * w
        else:
            acc = acc + jnp.dot(xs, w, preferred_element_type=jnp.float32)
    o_ref[0, 0] = acc


def _conv3x3_cout1_kernel(x_ref, w_ref, b_ref, o_ref, *, width, sigmoid):
    """3x3 conv with a single output channel; weight layout (3, 3, 1, Cin).
    Bias (+ optional sigmoid) fused into the last-tap epilogue."""
    dy = pl.program_id(2)

    @pl.when(dy == 0)
    def _():
        o_ref[...] = jnp.zeros_like(o_ref)

    x = x_ref[0, 0]                      # (W+2, Cin)
    acc = o_ref[0, 0]                    # (W, 1)
    for dx in range(3):
        xs = x[dx:dx + width, :]         # (W, Cin)
        w = w_ref[0, dx]                 # (1, Cin)
        acc = acc + jnp.sum(xs * w, axis=-1, keepdims=True)
    o_ref[0, 0] = acc

    @pl.when(dy == pl.num_programs(2) - 1)
    def _():
        y = o_ref[0, 0] + b_ref[...]
        if sigmoid:
            y = jax.nn.sigmoid(y)
        o_ref[0, 0] = y


def _matmul_kernel(a_ref, b_ref, o_ref):
    """Single-K-block matmul: no accumulator scratch, no K grid axis."""
    o_ref[...] = jnp.dot(a_ref[...], b_ref[...],
                         preferred_element_type=jnp.float32)


def _colsum_kernel(x_ref, o_ref):
    @pl.when(pl.program_id(0) == 0)
    def _():
        o_ref[...] = jnp.zeros_like(o_ref)
    o_ref[...] += jnp.sum(x_ref[...], axis=0, keepdims=True)


def _colvar_kernel(x_ref, mu_ref, o_ref):
    @pl.when(pl.program_id(0) == 0)
    def _():
        o_ref[...] = jnp.zeros_like(o_ref)
    d = x_ref[...] - mu_ref[...]
    o_ref[...] += jnp.sum(d * d, axis=0, keepdims=True)


def _affine_act_kernel(x_ref, sc_ref, sh_ref, o_ref, *, relu, sigmoid):
    y = x_ref[...] * sc_ref[...] + sh_ref[...]
    if relu:
        y = jnp.maximum(y, 0.0)
    if sigmoid:
        y = jax.nn.sigmoid(y)
    o_ref[...] = y


def _bn_relu_pool_kernel(x_ref, sc_ref, sh_ref, o_ref):
    """Fused BatchNorm-apply + ReLU + 2x2 max pool over a (2, W/2, 2, C) block."""
    x = x_ref[0]                                   # (2, W/2, 2, C)
    y = jnp.maximum(x * sc_ref[...] + sh_ref[...], 0.0)
    y = jnp.maximum(y[0], y[1])                    # vertical max   -> (W/2, 2, C)
    o_ref[0] = jnp.max(y, axis=1)                  # horizontal max -> (W/2, C)


# --------------------------------------------------------------------------
# Pallas wrappers (NHWC)
# --------------------------------------------------------------------------

def conv2d_3x3(x, w_t):
    """x: (N,H,W,Cin) NHWC;  w_t: (3,3,Cin,Cout).  padding=1, no bias."""
    N, H, W, Cin = x.shape
    Cout = w_t.shape[-1]
    xp = jnp.pad(x, ((0, 0), (1, 1), (1, 1), (0, 0)))
    return pl.pallas_call(
        functools.partial(_conv3x3_kernel, width=W),
        out_shape=jax.ShapeDtypeStruct((N, H, W, Cout), _F32),
        grid=(N, H, 3),
        in_specs=[
            pl.BlockSpec((1, 1, W + 2, Cin), lambda n, h, dy: (n, h + dy, 0, 0)),
            pl.BlockSpec((1, 3, Cin, Cout), lambda n, h, dy: (dy, 0, 0, 0)),
        ],
        out_specs=pl.BlockSpec((1, 1, W, Cout), lambda n, h, dy: (n, h, 0, 0)),
        compiler_params=pltpu.CompilerParams(
            dimension_semantics=("parallel", "parallel", "arbitrary")),
    )(xp, w_t)


def conv2d_3x3_out1(x, w_t, bias, sigmoid):
    """Final conv (Cout == 1); w_t layout (3,3,1,Cin), bias (1,1)."""
    N, H, W, Cin = x.shape
    xp = jnp.pad(x, ((0, 0), (1, 1), (1, 1), (0, 0)))
    return pl.pallas_call(
        functools.partial(_conv3x3_cout1_kernel, width=W, sigmoid=sigmoid),
        out_shape=jax.ShapeDtypeStruct((N, H, W, 1), _F32),
        grid=(N, H, 3),
        in_specs=[
            pl.BlockSpec((1, 1, W + 2, Cin), lambda n, h, dy: (n, h + dy, 0, 0)),
            pl.BlockSpec((1, 3, 1, Cin), lambda n, h, dy: (dy, 0, 0, 0)),
            pl.BlockSpec((1, 1), lambda n, h, dy: (0, 0)),
        ],
        out_specs=pl.BlockSpec((1, 1, W, 1), lambda n, h, dy: (n, h, 0, 0)),
        compiler_params=pltpu.CompilerParams(
            dimension_semantics=("parallel", "parallel", "arbitrary")),
    )(xp, w_t, bias)


def pallas_matmul(a, b, tm_cap=256):
    """(M,K)@(K,N) -> f32.  K and N fit in one block here, so there is no K
    grid axis, no scratch, and no padding/slicing."""
    M, K = a.shape
    _, Nc = b.shape
    tm = _pick_tile(M, tm_cap)
    return pl.pallas_call(
        _matmul_kernel,
        out_shape=jax.ShapeDtypeStruct((M, Nc), _F32),
        grid=(M // tm,),
        in_specs=[pl.BlockSpec((tm, K), lambda i: (i, 0)),
                  pl.BlockSpec((K, Nc), lambda i: (0, 0))],
        out_specs=pl.BlockSpec((tm, Nc), lambda i: (i, 0)),
        compiler_params=_parallel(1),
    )(a, b)


def conv_transpose_2x2_s2(x, w2):
    """x: (N,H,W,Cin);  w2: (Cin, Cout*4) pre-reshaped from PyTorch (Cin,Cout,2,2)."""
    N, H, W, Cin = x.shape
    Cout = w2.shape[1] // 4
    y = pallas_matmul(x.reshape(N * H * W, Cin), w2)       # (M, Cout*4)
    y = y.reshape(N, H, W, Cout, 2, 2)
    y = jnp.transpose(y, (0, 1, 4, 2, 5, 3))               # (N,H,2,W,2,Cout)
    return y.reshape(N, 2 * H, 2 * W, Cout)


def batch_stats(y):
    """Per-channel batch mean and biased variance (two row-tiled passes;
    centered second pass keeps the variance non-negative and well conditioned)."""
    N, H, W, C = y.shape
    M = N * H * W
    k = _dense_factor(M, C)
    M2, C2 = M // k, k * C
    x2 = y.reshape(M2, C2)
    tm = _pick_tile(M2, 512)
    grid = (M2 // tm,)
    row_spec = pl.BlockSpec((tm, C2), lambda i: (i, 0))
    vec_spec = pl.BlockSpec((1, C2), lambda i: (0, 0))
    arb = pltpu.CompilerParams(dimension_semantics=("arbitrary",))

    csum = pl.pallas_call(
        _colsum_kernel,
        out_shape=jax.ShapeDtypeStruct((1, C2), _F32),
        grid=grid, in_specs=[row_spec], out_specs=vec_spec,
        compiler_params=arb)(x2)
    mean = csum.reshape(k, C).sum(axis=0, keepdims=True) / M            # (1, C)

    cvar = pl.pallas_call(
        _colvar_kernel,
        out_shape=jax.ShapeDtypeStruct((1, C2), _F32),
        grid=grid, in_specs=[row_spec, vec_spec], out_specs=vec_spec,
        compiler_params=arb)(x2, jnp.tile(mean, (1, k)))
    var = cvar.reshape(k, C).sum(axis=0, keepdims=True) / M             # biased

    return mean, var


def _bn_scale_shift(mean, var):
    scale = jax.lax.rsqrt(var + _EPS)
    return scale, -mean * scale


def _affine_act(y, scale, shift, relu, sigmoid):
    """Row-tiled, lane-dense elementwise y*scale+shift (+relu/+sigmoid)."""
    N, H, W, C = y.shape
    M = N * H * W
    k = _dense_factor(M, C)
    M2, C2 = M // k, k * C
    tm = _pick_tile(M2, 512)
    out = pl.pallas_call(
        functools.partial(_affine_act_kernel, relu=relu, sigmoid=sigmoid),
        out_shape=jax.ShapeDtypeStruct((M2, C2), _F32),
        grid=(M2 // tm,),
        in_specs=[pl.BlockSpec((tm, C2), lambda i: (i, 0)),
                  pl.BlockSpec((1, C2), lambda i: (0, 0)),
                  pl.BlockSpec((1, C2), lambda i: (0, 0))],
        out_specs=pl.BlockSpec((tm, C2), lambda i: (i, 0)),
        compiler_params=_parallel(1),
    )(y.reshape(M2, C2), jnp.tile(scale, (1, k)), jnp.tile(shift, (1, k)))
    return out.reshape(N, H, W, C)


def bn_relu(y, mean, var):
    scale, shift = _bn_scale_shift(mean, var)
    return _affine_act(y, scale, shift, relu=True, sigmoid=False)


def bn_relu_maxpool(y, mean, var):
    """Fused BatchNorm + ReLU + MaxPool2d(2,2): one read of y, one pooled write."""
    N, H, W, C = y.shape
    scale, shift = _bn_scale_shift(mean, var)
    R = N * (H // 2)
    xv = y.reshape(R, 2, W // 2, 2, C)                     # free reshape of NHWC
    pooled = pl.pallas_call(
        _bn_relu_pool_kernel,
        out_shape=jax.ShapeDtypeStruct((R, W // 2, C), _F32),
        grid=(R,),
        in_specs=[
            pl.BlockSpec((1, 2, W // 2, 2, C), lambda i: (i, 0, 0, 0, 0)),
            pl.BlockSpec((1, C), lambda i: (0, 0)),
            pl.BlockSpec((1, C), lambda i: (0, 0)),
        ],
        out_specs=pl.BlockSpec((1, W // 2, C), lambda i: (i, 0, 0)),
        compiler_params=_parallel(1),
    )(xv, scale, shift)
    return pooled.reshape(N, H // 2, W // 2, C)


# --------------------------------------------------------------------------
# FCRNECML model
# --------------------------------------------------------------------------

def init_params(key, in_channels=1, out_channels=32):
    """Synthetic init matching the PyTorch module: conv / conv-transpose
    weights ~ N(0,1), conv8 bias = 0, BN has no affine params."""
    ks = jax.random.split(key, 8)
    oc = out_channels
    return {
        "conv1_w": jax.random.normal(ks[0], (oc, in_channels, 3, 3), _F32),
        "conv2_w": jax.random.normal(ks[1], (2 * oc, oc, 3, 3), _F32),
        "conv3_w": jax.random.normal(ks[2], (4 * oc, 2 * oc, 3, 3), _F32),
        "conv4_w": jax.random.normal(ks[3], (16 * oc, 4 * oc, 3, 3), _F32),
        # ConvTranspose2d weight layout: (in_channels, out_channels, kH, kW)
        "conv5_w": jax.random.normal(ks[4], (16 * oc, 4 * oc, 2, 2), _F32),
        "conv6_w": jax.random.normal(ks[5], (4 * oc, 2 * oc, 2, 2), _F32),
        "conv7_w": jax.random.normal(ks[6], (2 * oc, oc, 2, 2), _F32),
        "conv8_w": jax.random.normal(ks[7], (in_channels, oc, 3, 3), _F32),
        "conv8_b": jnp.zeros((in_channels,), _F32),
    }


def prepare_params(p):
    """Hoist all weight layout transforms out of the forward pass."""
    def conv_w(w):     # (Cout,Cin,3,3) -> (3,3,Cin,Cout)
        return jnp.transpose(w, (2, 3, 1, 0)).astype(_F32)

    def convT_w(w):    # (Cin,Cout,2,2) -> (Cin, Cout*4)
        return w.reshape(w.shape[0], -1).astype(_F32)

    return {
        "conv1_w": conv_w(p["conv1_w"]),
        "conv2_w": conv_w(p["conv2_w"]),
        "conv3_w": conv_w(p["conv3_w"]),
        "conv4_w": conv_w(p["conv4_w"]),
        "conv5_w": convT_w(p["conv5_w"]),
        "conv6_w": convT_w(p["conv6_w"]),
        "conv7_w": convT_w(p["conv7_w"]),
        # conv8 stored as (3, 3, Cout, Cin)
        "conv8_w": jnp.transpose(p["conv8_w"], (2, 3, 0, 1)).astype(_F32),
        "conv8_b": p["conv8_b"].reshape(1, -1).astype(_F32),
    }


def fcrn_ecml_forward(prep, x_nchw, add_sigmoid=False):
    """Returns (out, feature_dist_lc), both NCHW like the PyTorch module."""
    x = jnp.transpose(x_nchw, (0, 2, 3, 1)).astype(_F32)            # -> NHWC

    def conv_block_pool(x, w):
        y = conv2d_3x3(x, w)
        return bn_relu_maxpool(y, *batch_stats(y))

    def conv_block(x, w):
        y = conv2d_3x3(x, w)
        return bn_relu(y, *batch_stats(y))

    def convT_block(x, w2):
        y = conv_transpose_2x2_s2(x, w2)
        return bn_relu(y, *batch_stats(y))

    x = conv_block_pool(x, prep["conv1_w"])
    x = conv_block_pool(x, prep["conv2_w"])
    x = conv_block_pool(x, prep["conv3_w"])
    x = conv_block(x, prep["conv4_w"])
    feature = x
    x = convT_block(x, prep["conv5_w"])
    x = convT_block(x, prep["conv6_w"])
    x = convT_block(x, prep["conv7_w"])

    w8 = prep["conv8_w"]                                            # (3,3,Cout,Cin)
    if w8.shape[2] == 1:
        # Cout == 1 (module default): fused bias(+sigmoid) epilogue, no Cout padding.
        x = conv2d_3x3_out1(x, w8, prep["conv8_b"], add_sigmoid)
    else:
        # General fallback: regular conv, then bias (+sigmoid) in one tiled pass.
        x = conv2d_3x3(x, jnp.swapaxes(w8, 2, 3))
        C = x.shape[-1]
        x = _affine_act(x, jnp.ones((1, C), _F32), prep["conv8_b"],
                        relu=False, sigmoid=add_sigmoid)

    out = jnp.transpose(x, (0, 3, 1, 2))                            # -> NCHW
    feature = jnp.transpose(feature, (0, 3, 1, 2))                  # -> NCHW
    return out, feature


if __name__ == "__main__":
    key = jax.random.PRNGKey(0)
    kp, kx = jax.random.split(key)

    IN_CH, OUT_CH = 1, 8          # small shapes (module default out_channels is 32)
    params = init_params(kp, in_channels=IN_CH, out_channels=OUT_CH)
    prep = prepare_params(params)
    x = jax.random.normal(kx, (2, IN_CH, 16, 16), _F32)

    fwd = jax.jit(functools.partial(fcrn_ecml_forward, add_sigmoid=False))
    out, feat = fwd(prep, x)
    out = jax.block_until_ready(out)
    feat = jax.block_until_ready(feat)

    assert out.shape == (2, IN_CH, 16, 16), out.shape
    assert feat.shape == (2, 16 * OUT_CH, 2, 2), feat.shape
    assert bool(jnp.all(jnp.isfinite(out))) and bool(jnp.all(jnp.isfinite(feat)))
    print("KERNEL_OK")
</pallas_src>

<mosaic_0001>
module attributes {stable_mosaic.version = 11 : i64} {
  func.func @_conv3x3_kernel(%arg0: i32, %arg1: i32, %arg2: i32, %arg3: memref<1x1x18x1xf32, #tpu.memory_space<vmem>>, %arg4: memref<1x3x1x8xf32, #tpu.memory_space<vmem>>, %arg5: memref<1x1x16x8xf32, #tpu.memory_space<vmem>>) attributes {dimension_semantics = [#tpu.dimension_semantics<parallel>, #tpu.dimension_semantics<parallel>, #tpu.dimension_semantics<arbitrary>], iteration_bounds = array<i64: 2, 16, 3>, scalar_prefetch = 0 : i64, scratch_operands = 0 : i64, tpu.core_type = #tpu.core_type<tc>, window_params = [{transform_indices = @transform_0, window_bounds = array<i64: 1, 1, 18, 1>}, {transform_indices = @transform_1, window_bounds = array<i64: 1, 3, 1, 8>}, {transform_indices = @transform_2, window_bounds = array<i64: 1, 1, 16, 8>}]} {
    %c0_i32 = arith.constant 0 : i32
    %0 = arith.cmpi eq, %arg2, %c0_i32 : i32
    %1 = arith.extui %0 : i1 to i32
    %c0_i32_0 = arith.constant 0 : i32
    %2 = arith.cmpi ne, %1, %c0_i32_0 : i32
    scf.if %2 {
      %cst = arith.constant 0.000000e+00 : f32
      %31 = vector.broadcast %cst : f32 to vector<1x1x16x8xf32>
      %c0_22 = arith.constant 0 : index
      %c0_23 = arith.constant 0 : index
      %c0_24 = arith.constant 0 : index
      %c0_25 = arith.constant 0 : index
      %32 = vector.load %arg5[%c0_22, %c0_23, %c0_24, %c0_25] : memref<1x1x16x8xf32, #tpu.memory_space<vmem>>, vector<1x1x16x8xf32>
      tpu.vector_store %arg5[%c0_22, %c0_23, %c0_24, %c0_25], %31 {strides = array<i32>} : memref<1x1x16x8xf32, #tpu.memory_space<vmem>>, vector<1x1x16x8xf32>,
    } else {
    }
    %c0 = arith.constant 0 : index
    %c0_1 = arith.constant 0 : index
    %c0_2 = arith.constant 0 : index
    %c0_3 = arith.constant 0 : index
    %3 = vector.load %arg3[%c0, %c0_1, %c0_2, %c0_3] : memref<1x1x18x1xf32, #tpu.memory_space<vmem>>, vector<1x1x18x1xf32>
    %4 = vector.shape_cast %3 : vector<1x1x18x1xf32> to vector<18x1xf32>
    %c0_4 = arith.constant 0 : index
    %c0_5 = arith.constant 0 : index
    %c0_6 = arith.constant 0 : index
    %c0_7 = arith.constant 0 : index
    %5 = vector.load %arg5[%c0_4, %c0_5, %c0_6, %c0_7] : memref<1x1x16x8xf32, #tpu.memory_space<vmem>>, vector<1x1x16x8xf32>
    %6 = vector.shape_cast %5 : vector<1x1x16x8xf32> to vector<16x8xf32>
    %7 = vector.extract_strided_slice %4 {offsets = [0, 0], sizes = [16, 1], strides = [1, 1]} : vector<18x1xf32> to vector<16x1xf32>
    %c0_8 = arith.constant 0 : index
    %c0_9 = arith.constant 0 : index
    %c0_10 = arith.constant 0 : index
    %c0_11 = arith.constant 0 : index
    %8 = vector.load %arg4[%c0_8, %c0_9, %c0_10, %c0_11] : memref<1x3x1x8xf32, #tpu.memory_space<vmem>>, vector<1x1x1x8xf32>
    %9 = vector.shape_cast %8 : vector<1x1x1x8xf32> to vector<1x8xf32>
    %10 = vector.broadcast %7 : vector<16x1xf32> to vector<16x8xf32>
    %11 = vector.broadcast %9 : vector<1x8xf32> to vector<16x8xf32>
    %12 = arith.mulf %10, %11 : vector<16x8xf32>
    %13 = arith.addf %6, %12 : vector<16x8xf32>
    %14 = vector.extract_strided_slice %4 {offsets = [1, 0], sizes = [16, 1], strides = [1, 1]} : vector<18x1xf32> to vector<16x1xf32>
    %c0_12 = arith.constant 0 : index
    %c1 = arith.constant 1 : index
    %c0_13 = arith.constant 0 : index
    %c0_14 = arith.constant 0 : index
    %15 = vector.load %arg4[%c0_12, %c1, %c0_13, %c0_14] : memref<1x3x1x8xf32, #tpu.memory_space<vmem>>, vector<1x1x1x8xf32>
    %16 = vector.shape_cast %15 : vector<1x1x1x8xf32> to vector<1x8xf32>
    %17 = vector.broadcast %14 : vector<16x1xf32> to vector<16x8xf32>
    %18 = vector.broadcast %16 : vector<1x8xf32> to vector<16x8xf32>
    %19 = arith.mulf %17, %18 : vector<16x8xf32>
    %20 = arith.addf %13, %19 : vector<16x8xf32>
    %21 = vector.extract_strided_slice %4 {offsets = [2, 0], sizes = [16, 1], strides = [1, 1]} : vector<18x1xf32> to vector<16x1xf32>
    %c0_15 = arith.constant 0 : index
    %c2 = arith.constant 2 : index
    %c0_16 = arith.constant 0 : index
    %c0_17 = arith.constant 0 : index
    %22 = vector.load %arg4[%c0_15, %c2, %c0_16, %c0_17] : memref<1x3x1x8xf32, #tpu.memory_space<vmem>>, vector<1x1x1x8xf32>
    %23 = vector.shape_cast %22 : vector<1x1x1x8xf32> to vector<1x8xf32>
    %24 = vector.broadcast %21 : vector<16x1xf32> to vector<16x8xf32>
    %25 = vector.broadcast %23 : vector<1x8xf32> to vector<16x8xf32>
    %26 = arith.mulf %24, %25 : vector<16x8xf32>
    %27 = arith.addf %20, %26 : vector<16x8xf32>
    %c0_18 = arith.constant 0 : index
    %c0_19 = arith.constant 0 : index
    %c0_20 = arith.constant 0 : index
    %c0_21 = arith.constant 0 : index
    %28 = vector.load %arg5[%c0_18, %c0_19, %c0_20, %c0_21] : memref<1x1x16x8xf32, #tpu.memory_space<vmem>>, vector<1x1x16x8xf32>
    %29 = vector.shape_cast %28 : vector<1x1x16x8xf32> to vector<16x8xf32>
    %30 = vector.shape_cast %27 : vector<16x8xf32> to vector<1x1x16x8xf32>
    tpu.vector_store %arg5[%c0_18, %c0_19, %c0_20, %c0_21], %30 {strides = array<i32>} : memref<1x1x16x8xf32, #tpu.memory_space<vmem>>, vector<1x1x16x8xf32>,
    return
  }
  func.func @transform_0(%arg0: i32, %arg1: i32, %arg2: i32) -> (i32, i32, i32, i32) {
    %0 = arith.addi %arg1, %arg2 : i32
    %c0_i32 = arith.constant 0 : i32
    %c0_i32_0 = arith.constant 0 : i32
    %c0_i32_1 = arith.constant 0 : i32
    return %arg0, %0, %c0_i32, %c0_i32_0 : i32, i32, i32, i32
  }
  func.func @transform_1(%arg0: i32, %arg1: i32, %arg2: i32) -> (i32, i32, i32, i32) {
    %c0_i32 = arith.constant 0 : i32
    %c0_i32_0 = arith.constant 0 : i32
    %c0_i32_1 = arith.constant 0 : i32
    %c0_i32_2 = arith.constant 0 : i32
    return %arg2, %c0_i32, %c0_i32_0, %c0_i32_1 : i32, i32, i32, i32
  }
  func.func @transform_2(%arg0: i32, %arg1: i32, %arg2: i32) -> (i32, i32, i32, i32) {
    %c0_i32 = arith.constant 0 : i32
    %c0_i32_0 = arith.constant 0 : i32
    %c0_i32_1 = arith.constant 0 : i32
    return %arg0, %arg1, %c0_i32, %c0_i32_0 : i32, i32, i32, i32
  }
}

module attributes {stable_mosaic.version = 11 : i64} {
  func.func @_colsum_kernel(%arg0: i32, %arg1: memref<8x512xf32, #tpu.memory_space<vmem>>, %arg2: memref<1x512xf32, #tpu.memory_space<vmem>>) attributes {dimension_semantics = [#tpu.dimension_semantics<arbitrary>], iteration_bounds = array<i64: 1>, scalar_prefetch = 0 : i64, scratch_operands = 0 : i64, tpu.core_type = #tpu.core_type<tc>, window_params = [{transform_indices = @transform_0, window_bounds = array<i64: 8, 512>}, {pipeline_mode = #tpu.pipeline_mode<synchronous>, transform_indices = @transform_1, window_bounds = array<i64: 1, 512>}]} {
    %c0_i32 = arith.constant 0 : i32
    %0 = arith.cmpi eq, %arg0, %c0_i32 : i32
    %1 = arith.extui %0 : i1 to i32
    %c0_i32_0 = arith.constant 0 : i32
    %2 = arith.cmpi ne, %1, %c0_i32_0 : i32
    scf.if %2 {
      %cst_6 = arith.constant 0.000000e+00 : f32
      %9 = vector.broadcast %cst_6 : f32 to vector<1x512xf32>
      %c0_7 = arith.constant 0 : index
      %c0_8 = arith.constant 0 : index
      %10 = vector.load %arg2[%c0_7, %c0_8] : memref<1x512xf32, #tpu.memory_space<vmem>>, vector<1x512xf32>
      tpu.vector_store %arg2[%c0_7, %c0_8], %9 {strides = array<i32>} : memref<1x512xf32, #tpu.memory_space<vmem>>, vector<1x512xf32>,
    } else {
    }
    %c0 = arith.constant 0 : index
    %c0_1 = arith.constant 0 : index
    %3 = vector.load %arg2[%c0, %c0_1] : memref<1x512xf32, #tpu.memory_space<vmem>>, vector<1x512xf32>
    %c0_2 = arith.constant 0 : index
    %c0_3 = arith.constant 0 : index
    %4 = vector.load %arg1[%c0_2, %c0_3] : memref<8x512xf32, #tpu.memory_space<vmem>>, vector<8x512xf32>
    %cst = arith.constant dense<0.000000e+00> : vector<512xf32>
    %5 = vector.multi_reduction <add>, %4, %cst [0] : vector<8x512xf32> to vector<512xf32>
    %6 = vector.shape_cast %5 : vector<512xf32> to vector<1x512xf32>
    %7 = arith.addf %3, %6 : vector<1x512xf32>
    %c0_4 = arith.constant 0 : index
    %c0_5 = arith.constant 0 : index
    %8 = vector.load %arg2[%c0_4, %c0_5] : memref<1x512xf32, #tpu.memory_space<vmem>>, vector<1x512xf32>
    tpu.vector_store %arg2[%c0_4, %c0_5], %7 {strides = array<i32>} : memref<1x512xf32, #tpu.memory_space<vmem>>, vector<1x512xf32>,
    return
  }
  func.func @transform_0(%arg0: i32) -> (i32, i32) {
    %c0_i32 = arith.constant 0 : i32
    %c0_i32_0 = arith.constant 0 : i32
    return %arg0, %c0_i32 : i32, i32
  }
  func.func @transform_1(%arg0: i32) -> (i32, i32) {
    %c0_i32 = arith.constant 0 : i32
    %c0_i32_0 = arith.constant 0 : i32
    %c0_i32_1 = arith.constant 0 : i32
    return %c0_i32, %c0_i32_0 : i32, i32
  }
}

module attributes {stable_mosaic.version = 11 : i64} {
  func.func @_colvar_kernel(%arg0: i32, %arg1: memref<8x512xf32, #tpu.memory_space<vmem>>, %arg2: memref<1x512xf32, #tpu.memory_space<vmem>>, %arg3: memref<1x512xf32, #tpu.memory_space<vmem>>) attributes {dimension_semantics = [#tpu.dimension_semantics<arbitrary>], iteration_bounds = array<i64: 1>, scalar_prefetch = 0 : i64, scratch_operands = 0 : i64, tpu.core_type = #tpu.core_type<tc>, window_params = [{transform_indices = @transform_0, window_bounds = array<i64: 8, 512>}, {pipeline_mode = #tpu.pipeline_mode<synchronous>, transform_indices = @transform_1, window_bounds = array<i64: 1, 512>}, {pipeline_mode = #tpu.pipeline_mode<synchronous>, transform_indices = @transform_2, window_bounds = array<i64: 1, 512>}]} {
    %c0_i32 = arith.constant 0 : i32
    %0 = arith.cmpi eq, %arg0, %c0_i32 : i32
    %1 = arith.extui %0 : i1 to i32
    %c0_i32_0 = arith.constant 0 : i32
    %2 = arith.cmpi ne, %1, %c0_i32_0 : i32
    scf.if %2 {
      %cst_8 = arith.constant 0.000000e+00 : f32
      %13 = vector.broadcast %cst_8 : f32 to vector<1x512xf32>
      %c0_9 = arith.constant 0 : index
      %c0_10 = arith.constant 0 : index
      %14 = vector.load %arg3[%c0_9, %c0_10] : memref<1x512xf32, #tpu.memory_space<vmem>>, vector<1x512xf32>
      tpu.vector_store %arg3[%c0_9, %c0_10], %13 {strides = array<i32>} : memref<1x512xf32, #tpu.memory_space<vmem>>, vector<1x512xf32>,
    } else {
    }
    %c0 = arith.constant 0 : index
    %c0_1 = arith.constant 0 : index
    %3 = vector.load %arg1[%c0, %c0_1] : memref<8x512xf32, #tpu.memory_space<vmem>>, vector<8x512xf32>
    %c0_2 = arith.constant 0 : index
    %c0_3 = arith.constant 0 : index
    %4 = vector.load %arg2[%c0_2, %c0_3] : memref<1x512xf32, #tpu.memory_space<vmem>>, vector<1x512xf32>
    %5 = vector.broadcast %4 : vector<1x512xf32> to vector<8x512xf32>
    %6 = arith.subf %3, %5 : vector<8x512xf32>
    %c0_4 = arith.constant 0 : index
    %c0_5 = arith.constant 0 : index
    %7 = vector.load %arg3[%c0_4, %c0_5] : memref<1x512xf32, #tpu.memory_space<vmem>>, vector<1x512xf32>
    %8 = arith.mulf %6, %6 : vector<8x512xf32>
    %cst = arith.constant dense<0.000000e+00> : vector<512xf32>
    %9 = vector.multi_reduction <add>, %8, %cst [0] : vector<8x512xf32> to vector<512xf32>
    %10 = vector.shape_cast %9 : vector<512xf32> to vector<1x512xf32>
    %11 = arith.addf %7, %10 : vector<1x512xf32>
    %c0_6 = arith.constant 0 : index
    %c0_7 = arith.constant 0 : index
    %12 = vector.load %arg3[%c0_6, %c0_7] : memref<1x512xf32, #tpu.memory_space<vmem>>, vector<1x512xf32>
    tpu.vector_store %arg3[%c0_6, %c0_7], %11 {strides = array<i32>} : memref<1x512xf32, #tpu.memory_space<vmem>>, vector<1x512xf32>,
    return
  }
  func.func @transform_0(%arg0: i32) -> (i32, i32) {
    %c0_i32 = arith.constant 0 : i32
    %c0_i32_0 = arith.constant 0 : i32
    return %arg0, %c0_i32 : i32, i32
  }
  func.func @transform_1(%arg0: i32) -> (i32, i32) {
    %c0_i32 = arith.constant 0 : i32
    %c0_i32_0 = arith.constant 0 : i32
    %c0_i32_1 = arith.constant 0 : i32
    return %c0_i32, %c0_i32_0 : i32, i32
  }
  func.func @transform_2(%arg0: i32) -> (i32, i32) {
    %c0_i32 = arith.constant 0 : i32
    %c0_i32_0 = arith.constant 0 : i32
    %c0_i32_1 = arith.constant 0 : i32
    return %c0_i32, %c0_i32_0 : i32, i32
  }
}

module attributes {stable_mosaic.version = 11 : i64} {
  func.func @_bn_relu_pool_kernel(%arg0: i32, %arg1: memref<1x2x8x2x8xf32, #tpu.memory_space<vmem>>, %arg2: memref<1x8xf32, #tpu.memory_space<vmem>>, %arg3: memref<1x8xf32, #tpu.memory_space<vmem>>, %arg4: memref<1x8x8xf32, #tpu.memory_space<vmem>>) attributes {dimension_semantics = [#tpu.dimension_semantics<parallel>], iteration_bounds = array<i64: 16>, scalar_prefetch = 0 : i64, scratch_operands = 0 : i64, tpu.core_type = #tpu.core_type<tc>, window_params = [{transform_indices = @transform_0, window_bounds = array<i64: 1, 2, 8, 2, 8>}, {pipeline_mode = #tpu.pipeline_mode<synchronous>, transform_indices = @transform_1, window_bounds = array<i64: 1, 8>}, {pipeline_mode = #tpu.pipeline_mode<synchronous>, transform_indices = @transform_2, window_bounds = array<i64: 1, 8>}, {transform_indices = @transform_3, window_bounds = array<i64: 1, 8, 8>}]} {
    %c0 = arith.constant 0 : index
    %c0_0 = arith.constant 0 : index
    %c0_1 = arith.constant 0 : index
    %c0_2 = arith.constant 0 : index
    %c0_3 = arith.constant 0 : index
    %0 = vector.load %arg1[%c0, %c0_0, %c0_1, %c0_2, %c0_3] : memref<1x2x8x2x8xf32, #tpu.memory_space<vmem>>, vector<1x2x8x2x8xf32>
    %1 = vector.shape_cast %0 : vector<1x2x8x2x8xf32> to vector<2x8x2x8xf32>
    %c0_4 = arith.constant 0 : index
    %c0_5 = arith.constant 0 : index
    %2 = vector.load %arg2[%c0_4, %c0_5] : memref<1x8xf32, #tpu.memory_space<vmem>>, vector<1x8xf32>
    %3 = vector.shape_cast %2 : vector<1x8xf32> to vector<1x1x1x8xf32>
    %4 = vector.broadcast %3 : vector<1x1x1x8xf32> to vector<2x8x2x8xf32>
    %5 = arith.mulf %1, %4 : vector<2x8x2x8xf32>
    %c0_6 = arith.constant 0 : index
    %c0_7 = arith.constant 0 : index
    %6 = vector.load %arg3[%c0_6, %c0_7] : memref<1x8xf32, #tpu.memory_space<vmem>>, vector<1x8xf32>
    %7 = vector.shape_cast %6 : vector<1x8xf32> to vector<1x1x1x8xf32>
    %8 = vector.broadcast %7 : vector<1x1x1x8xf32> to vector<2x8x2x8xf32>
    %9 = arith.addf %5, %8 : vector<2x8x2x8xf32>
    %cst = arith.constant 0.000000e+00 : f32
    %10 = vector.broadcast %cst : f32 to vector<2x8x2x8xf32>
    %11 = arith.maximumf %9, %10 : vector<2x8x2x8xf32>
    %12 = vector.extract_strided_slice %11 {offsets = [0, 0, 0, 0], sizes = [1, 8, 2, 8], strides = [1, 1, 1, 1]} : vector<2x8x2x8xf32> to vector<1x8x2x8xf32>
    %13 = vector.shape_cast %12 : vector<1x8x2x8xf32> to vector<8x2x8xf32>
    %14 = vector.extract_strided_slice %11 {offsets = [1, 0, 0, 0], sizes = [1, 8, 2, 8], strides = [1, 1, 1, 1]} : vector<2x8x2x8xf32> to vector<1x8x2x8xf32>
    %15 = vector.shape_cast %14 : vector<1x8x2x8xf32> to vector<8x2x8xf32>
    %16 = arith.maximumf %13, %15 : vector<8x2x8xf32>
    %cst_8 = arith.constant dense<0xFF800000> : vector<8x8xf32>
    %17 = vector.multi_reduction <maximumf>, %16, %cst_8 [1] : vector<8x2x8xf32> to vector<8x8xf32>
    %c0_9 = arith.constant 0 : index
    %c0_10 = arith.constant 0 : index
    %c0_11 = arith.constant 0 : index
    %18 = vector.load %arg4[%c0_9, %c0_10, %c0_11] : memref<1x8x8xf32, #tpu.memory_space<vmem>>, vector<1x8x8xf32>
    %19 = vector.shape_cast %18 : vector<1x8x8xf32> to vector<8x8xf32>
    %20 = vector.shape_cast %17 : vector<8x8xf32> to vector<1x8x8xf32>
    tpu.vector_store %arg4[%c0_9, %c0_10, %c0_11], %20 {strides = array<i32>} : memref<1x8x8xf32, #tpu.memory_space<vmem>>, vector<1x8x8xf32>,
    return
  }
  func.func @transform_0(%arg0: i32) -> (i32, i32, i32, i32, i32) {
    %c0_i32 = arith.constant 0 : i32
    %c0_i32_0 = arith.constant 0 : i32
    %c0_i32_1 = arith.constant 0 : i32
    %c0_i32_2 = arith.constant 0 : i32
    %c0_i32_3 = arith.constant 0 : i32
    return %arg0, %c0_i32, %c0_i32_0, %c0_i32_1, %c0_i32_2 : i32, i32, i32, i32, i32
  }
  func.func @transform_1(%arg0: i32) -> (i32, i32) {
    %c0_i32 = arith.constant 0 : i32
    %c0_i32_0 = arith.constant 0 : i32
    %c0_i32_1 = arith.constant 0 : i32
    return %c0_i32, %c0_i32_0 : i32, i32
  }
  func.func @transform_2(%arg0: i32) -> (i32, i32) {
    %c0_i32 = arith.constant 0 : i32
    %c0_i32_0 = arith.constant 0 : i32
    %c0_i32_1 = arith.constant 0 : i32
    return %c0_i32, %c0_i32_0 : i32, i32
  }
  func.func @transform_3(%arg0: i32) -> (i32, i32, i32) {
    %c0_i32 = arith.constant 0 : i32
    %c0_i32_0 = arith.constant 0 : i32
    %c0_i32_1 = arith.constant 0 : i32
    return %arg0, %c0_i32, %c0_i32_0 : i32, i32, i32
  }
}

module attributes {stable_mosaic.version = 11 : i64} {
  func.func @_conv3x3_kernel(%arg0: i32, %arg1: i32, %arg2: i32, %arg3: memref<1x1x10x8xf32, #tpu.memory_space<vmem>>, %arg4: memref<1x3x8x16xf32, #tpu.memory_space<vmem>>, %arg5: memref<1x1x8x16xf32, #tpu.memory_space<vmem>>) attributes {dimension_semantics = [#tpu.dimension_semantics<parallel>, #tpu.dimension_semantics<parallel>, #tpu.dimension_semantics<arbitrary>], iteration_bounds = array<i64: 2, 8, 3>, scalar_prefetch = 0 : i64, scratch_operands = 0 : i64, tpu.core_type = #tpu.core_type<tc>, window_params = [{transform_indices = @transform_0, window_bounds = array<i64: 1, 1, 10, 8>}, {transform_indices = @transform_1, window_bounds = array<i64: 1, 3, 8, 16>}, {transform_indices = @transform_2, window_bounds = array<i64: 1, 1, 8, 16>}]} {
    %c0_i32 = arith.constant 0 : i32
    %0 = arith.cmpi eq, %arg2, %c0_i32 : i32
    %1 = arith.extui %0 : i1 to i32
    %c0_i32_0 = arith.constant 0 : i32
    %2 = arith.cmpi ne, %1, %c0_i32_0 : i32
    scf.if %2 {
      %cst_24 = arith.constant 0.000000e+00 : f32
      %25 = vector.broadcast %cst_24 : f32 to vector<1x1x8x16xf32>
      %c0_25 = arith.constant 0 : index
      %c0_26 = arith.constant 0 : index
      %c0_27 = arith.constant 0 : index
      %c0_28 = arith.constant 0 : index
      %26 = vector.load %arg5[%c0_25, %c0_26, %c0_27, %c0_28] : memref<1x1x8x16xf32, #tpu.memory_space<vmem>>, vector<1x1x8x16xf32>
      tpu.vector_store %arg5[%c0_25, %c0_26, %c0_27, %c0_28], %25 {strides = array<i32>} : memref<1x1x8x16xf32, #tpu.memory_space<vmem>>, vector<1x1x8x16xf32>,
    } else {
    }
    %c0 = arith.constant 0 : index
    %c0_1 = arith.constant 0 : index
    %c0_2 = arith.constant 0 : index
    %c0_3 = arith.constant 0 : index
    %3 = vector.load %arg3[%c0, %c0_1, %c0_2, %c0_3] : memref<1x1x10x8xf32, #tpu.memory_space<vmem>>, vector<1x1x10x8xf32>
    %4 = vector.shape_cast %3 : vector<1x1x10x8xf32> to vector<10x8xf32>
    %c0_4 = arith.constant 0 : index
    %c0_5 = arith.constant 0 : index
    %c0_6 = arith.constant 0 : index
    %c0_7 = arith.constant 0 : index
    %5 = vector.load %arg5[%c0_4, %c0_5, %c0_6, %c0_7] : memref<1x1x8x16xf32, #tpu.memory_space<vmem>>, vector<1x1x8x16xf32>
    %6 = vector.shape_cast %5 : vector<1x1x8x16xf32> to vector<8x16xf32>
    %7 = vector.extract_strided_slice %4 {offsets = [0, 0], sizes = [8, 8], strides = [1, 1]} : vector<10x8xf32> to vector<8x8xf32>
    %c0_8 = arith.constant 0 : index
    %c0_9 = arith.constant 0 : index
    %c0_10 = arith.constant 0 : index
    %c0_11 = arith.constant 0 : index
    %8 = vector.load %arg4[%c0_8, %c0_9, %c0_10, %c0_11] : memref<1x3x8x16xf32, #tpu.memory_space<vmem>>, vector<1x1x8x16xf32>
    %9 = vector.shape_cast %8 : vector<1x1x8x16xf32> to vector<8x16xf32>
    %cst = arith.constant dense<0.000000e+00> : vector<8x16xf32>
    %10 = tpu.matmul %7, %9, %cst {dimension_numbers = #tpu.dot_dimension_numbers<[1], [0], [0], [1], [0, 0, 1, 1], [], []>} : vector<8x8xf32>, vector<8x16xf32>, vector<8x16xf32> -> vector<8x16xf32>
    %11 = arith.addf %6, %10 : vector<8x16xf32>
    %12 = vector.extract_strided_slice %4 {offsets = [1, 0], sizes = [8, 8], strides = [1, 1]} : vector<10x8xf32> to vector<8x8xf32>
    %c0_12 = arith.constant 0 : index
    %c1 = arith.constant 1 : index
    %c0_13 = arith.constant 0 : index
    %c0_14 = arith.constant 0 : index
    %13 = vector.load %arg4[%c0_12, %c1, %c0_13, %c0_14] : memref<1x3x8x16xf32, #tpu.memory_space<vmem>>, vector<1x1x8x16xf32>
    %14 = vector.shape_cast %13 : vector<1x1x8x16xf32> to vector<8x16xf32>
    %cst_15 = arith.constant dense<0.000000e+00> : vector<8x16xf32>
    %15 = tpu.matmul %12, %14, %cst_15 {dimension_numbers = #tpu.dot_dimension_numbers<[1], [0], [0], [1], [0, 0, 1, 1], [], []>} : vector<8x8xf32>, vector<8x16xf32>, vector<8x16xf32> -> vector<8x16xf32>
    %16 = arith.addf %11, %15 : vector<8x16xf32>
    %17 = vector.extract_strided_slice %4 {offsets = [2, 0], sizes = [8, 8], strides = [1, 1]} : vector<10x8xf32> to vector<8x8xf32>
    %c0_16 = arith.constant 0 : index
    %c2 = arith.constant 2 : index
    %c0_17 = arith.constant 0 : index
    %c0_18 = arith.constant 0 : index
    %18 = vector.load %arg4[%c0_16, %c2, %c0_17, %c0_18] : memref<1x3x8x16xf32, #tpu.memory_space<vmem>>, vector<1x1x8x16xf32>
    %19 = vector.shape_cast %18 : vector<1x1x8x16xf32> to vector<8x16xf32>
    %cst_19 = arith.constant dense<0.000000e+00> : vector<8x16xf32>
    %20 = tpu.matmul %17, %19, %cst_19 {dimension_numbers = #tpu.dot_dimension_numbers<[1], [0], [0], [1], [0, 0, 1, 1], [], []>} : vector<8x8xf32>, vector<8x16xf32>, vector<8x16xf32> -> vector<8x16xf32>
    %21 = arith.addf %16, %20 : vector<8x16xf32>
    %c0_20 = arith.constant 0 : index
    %c0_21 = arith.constant 0 : index
    %c0_22 = arith.constant 0 : index
    %c0_23 = arith.constant 0 : index
    %22 = vector.load %arg5[%c0_20, %c0_21, %c0_22, %c0_23] : memref<1x1x8x16xf32, #tpu.memory_space<vmem>>, vector<1x1x8x16xf32>
    %23 = vector.shape_cast %22 : vector<1x1x8x16xf32> to vector<8x16xf32>
    %24 = vector.shape_cast %21 : vector<8x16xf32> to vector<1x1x8x16xf32>
    tpu.vector_store %arg5[%c0_20, %c0_21, %c0_22, %c0_23], %24 {strides = array<i32>} : memref<1x1x8x16xf32, #tpu.memory_space<vmem>>, vector<1x1x8x16xf32>,
    return
  }
  func.func @transform_0(%arg0: i32, %arg1: i32, %arg2: i32) -> (i32, i32, i32, i32) {
    %0 = arith.addi %arg1, %arg2 : i32
    %c0_i32 = arith.constant 0 : i32
    %c0_i32_0 = arith.constant 0 : i32
    %c0_i32_1 = arith.constant 0 : i32
    return %arg0, %0, %c0_i32, %c0_i32_0 : i32, i32, i32, i32
  }
  func.func @transform_1(%arg0: i32, %arg1: i32, %arg2: i32) -> (i32, i32, i32, i32) {
    %c0_i32 = arith.constant 0 : i32
    %c0_i32_0 = arith.constant 0 : i32
    %c0_i32_1 = arith.constant 0 : i32
    %c0_i32_2 = arith.constant 0 : i32
    return %arg2, %c0_i32, %c0_i32_0, %c0_i32_1 : i32, i32, i32, i32
  }
  func.func @transform_2(%arg0: i32, %arg1: i32, %arg2: i32) -> (i32, i32, i32, i32) {
    %c0_i32 = arith.constant 0 : i32
    %c0_i32_0 = arith.constant 0 : i32
    %c0_i32_1 = arith.constant 0 : i32
    return %arg0, %arg1, %c0_i32, %c0_i32_0 : i32, i32, i32, i32
  }
}

module attributes {stable_mosaic.version = 11 : i64} {
  func.func @_colsum_kernel(%arg0: i32, %arg1: memref<4x512xf32, #tpu.memory_space<vmem>>, %arg2: memref<1x512xf32, #tpu.memory_space<vmem>>) attributes {dimension_semantics = [#tpu.dimension_semantics<arbitrary>], iteration_bounds = array<i64: 1>, scalar_prefetch = 0 : i64, scratch_operands = 0 : i64, tpu.core_type = #tpu.core_type<tc>, window_params = [{transform_indices = @transform_0, window_bounds = array<i64: 4, 512>}, {pipeline_mode = #tpu.pipeline_mode<synchronous>, transform_indices = @transform_1, window_bounds = array<i64: 1, 512>}]} {
    %c0_i32 = arith.constant 0 : i32
    %0 = arith.cmpi eq, %arg0, %c0_i32 : i32
    %1 = arith.extui %0 : i1 to i32
    %c0_i32_0 = arith.constant 0 : i32
    %2 = arith.cmpi ne, %1, %c0_i32_0 : i32
    scf.if %2 {
      %cst_6 = arith.constant 0.000000e+00 : f32
      %9 = vector.broadcast %cst_6 : f32 to vector<1x512xf32>
      %c0_7 = arith.constant 0 : index
      %c0_8 = arith.constant 0 : index
      %10 = vector.load %arg2[%c0_7, %c0_8] : memref<1x512xf32, #tpu.memory_space<vmem>>, vector<1x512xf32>
      tpu.vector_store %arg2[%c0_7, %c0_8], %9 {strides = array<i32>} : memref<1x512xf32, #tpu.memory_space<vmem>>, vector<1x512xf32>,
    } else {
    }
    %c0 = arith.constant 0 : index
    %c0_1 = arith.constant 0 : index
    %3 = vector.load %arg2[%c0, %c0_1] : memref<1x512xf32, #tpu.memory_space<vmem>>, vector<1x512xf32>
    %c0_2 = arith.constant 0 : index
    %c0_3 = arith.constant 0 : index
    %4 = vector.load %arg1[%c0_2, %c0_3] : memref<4x512xf32, #tpu.memory_space<vmem>>, vector<4x512xf32>
    %cst = arith.constant dense<0.000000e+00> : vector<512xf32>
    %5 = vector.multi_reduction <add>, %4, %cst [0] : vector<4x512xf32> to vector<512xf32>
    %6 = vector.shape_cast %5 : vector<512xf32> to vector<1x512xf32>
    %7 = arith.addf %3, %6 : vector<1x512xf32>
    %c0_4 = arith.constant 0 : index
    %c0_5 = arith.constant 0 : index
    %8 = vector.load %arg2[%c0_4, %c0_5] : memref<1x512xf32, #tpu.memory_space<vmem>>, vector<1x512xf32>
    tpu.vector_store %arg2[%c0_4, %c0_5], %7 {strides = array<i32>} : memref<1x512xf32, #tpu.memory_space<vmem>>, vector<1x512xf32>,
    return
  }
  func.func @transform_0(%arg0: i32) -> (i32, i32) {
    %c0_i32 = arith.constant 0 : i32
    %c0_i32_0 = arith.constant 0 : i32
    return %arg0, %c0_i32 : i32, i32
  }
  func.func @transform_1(%arg0: i32) -> (i32, i32) {
    %c0_i32 = arith.constant 0 : i32
    %c0_i32_0 = arith.constant 0 : i32
    %c0_i32_1 = arith.constant 0 : i32
    return %c0_i32, %c0_i32_0 : i32, i32
  }
}

module attributes {stable_mosaic.version = 11 : i64} {
  func.func @_colvar_kernel(%arg0: i32, %arg1: memref<4x512xf32, #tpu.memory_space<vmem>>, %arg2: memref<1x512xf32, #tpu.memory_space<vmem>>, %arg3: memref<1x512xf32, #tpu.memory_space<vmem>>) attributes {dimension_semantics = [#tpu.dimension_semantics<arbitrary>], iteration_bounds = array<i64: 1>, scalar_prefetch = 0 : i64, scratch_operands = 0 : i64, tpu.core_type = #tpu.core_type<tc>, window_params = [{transform_indices = @transform_0, window_bounds = array<i64: 4, 512>}, {pipeline_mode = #tpu.pipeline_mode<synchronous>, transform_indices = @transform_1, window_bounds = array<i64: 1, 512>}, {pipeline_mode = #tpu.pipeline_mode<synchronous>, transform_indices = @transform_2, window_bounds = array<i64: 1, 512>}]} {
    %c0_i32 = arith.constant 0 : i32
    %0 = arith.cmpi eq, %arg0, %c0_i32 : i32
    %1 = arith.extui %0 : i1 to i32
    %c0_i32_0 = arith.constant 0 : i32
    %2 = arith.cmpi ne, %1, %c0_i32_0 : i32
    scf.if %2 {
      %cst_8 = arith.constant 0.000000e+00 : f32
      %13 = vector.broadcast %cst_8 : f32 to vector<1x512xf32>
      %c0_9 = arith.constant 0 : index
      %c0_10 = arith.constant 0 : index
      %14 = vector.load %arg3[%c0_9, %c0_10] : memref<1x512xf32, #tpu.memory_space<vmem>>, vector<1x512xf32>
      tpu.vector_store %arg3[%c0_9, %c0_10], %13 {strides = array<i32>} : memref<1x512xf32, #tpu.memory_space<vmem>>, vector<1x512xf32>,
    } else {
    }
    %c0 = arith.constant 0 : index
    %c0_1 = arith.constant 0 : index
    %3 = vector.load %arg1[%c0, %c0_1] : memref<4x512xf32, #tpu.memory_space<vmem>>, vector<4x512xf32>
    %c0_2 = arith.constant 0 : index
    %c0_3 = arith.constant 0 : index
    %4 = vector.load %arg2[%c0_2, %c0_3] : memref<1x512xf32, #tpu.memory_space<vmem>>, vector<1x512xf32>
    %5 = vector.broadcast %4 : vector<1x512xf32> to vector<4x512xf32>
    %6 = arith.subf %3, %5 : vector<4x512xf32>
    %c0_4 = arith.constant 0 : index
    %c0_5 = arith.constant 0 : index
    %7 = vector.load %arg3[%c0_4, %c0_5] : memref<1x512xf32, #tpu.memory_space<vmem>>, vector<1x512xf32>
    %8 = arith.mulf %6, %6 : vector<4x512xf32>
    %cst = arith.constant dense<0.000000e+00> : vector<512xf32>
    %9 = vector.multi_reduction <add>, %8, %cst [0] : vector<4x512xf32> to vector<512xf32>
    %10 = vector.shape_cast %9 : vector<512xf32> to vector<1x512xf32>
    %11 = arith.addf %7, %10 : vector<1x512xf32>
    %c0_6 = arith.constant 0 : index
    %c0_7 = arith.constant 0 : index
    %12 = vector.load %arg3[%c0_6, %c0_7] : memref<1x512xf32, #tpu.memory_space<vmem>>, vector<1x512xf32>
    tpu.vector_store %arg3[%c0_6, %c0_7], %11 {strides = array<i32>} : memref<1x512xf32, #tpu.memory_space<vmem>>, vector<1x512xf32>,
    return
  }
  func.func @transform_0(%arg0: i32) -> (i32, i32) {
    %c0_i32 = arith.constant 0 : i32
    %c0_i32_0 = arith.constant 0 : i32
    return %arg0, %c0_i32 : i32, i32
  }
  func.func @transform_1(%arg0: i32) -> (i32, i32) {
    %c0_i32 = arith.constant 0 : i32
    %c0_i32_0 = arith.constant 0 : i32
    %c0_i32_1 = arith.constant 0 : i32
    return %c0_i32, %c0_i32_0 : i32, i32
  }
  func.func @transform_2(%arg0: i32) -> (i32, i32) {
    %c0_i32 = arith.constant 0 : i32
    %c0_i32_0 = arith.constant 0 : i32
    %c0_i32_1 = arith.constant 0 : i32
    return %c0_i32, %c0_i32_0 : i32, i32
  }
}

module attributes {stable_mosaic.version = 11 : i64} {
  func.func @_bn_relu_pool_kernel(%arg0: i32, %arg1: memref<1x2x4x2x16xf32, #tpu.memory_space<vmem>>, %arg2: memref<1x16xf32, #tpu.memory_space<vmem>>, %arg3: memref<1x16xf32, #tpu.memory_space<vmem>>, %arg4: memref<1x4x16xf32, #tpu.memory_space<vmem>>) attributes {dimension_semantics = [#tpu.dimension_semantics<parallel>], iteration_bounds = array<i64: 8>, scalar_prefetch = 0 : i64, scratch_operands = 0 : i64, tpu.core_type = #tpu.core_type<tc>, window_params = [{transform_indices = @transform_0, window_bounds = array<i64: 1, 2, 4, 2, 16>}, {pipeline_mode = #tpu.pipeline_mode<synchronous>, transform_indices = @transform_1, window_bounds = array<i64: 1, 16>}, {pipeline_mode = #tpu.pipeline_mode<synchronous>, transform_indices = @transform_2, window_bounds = array<i64: 1, 16>}, {transform_indices = @transform_3, window_bounds = array<i64: 1, 4, 16>}]} {
    %c0 = arith.constant 0 : index
    %c0_0 = arith.constant 0 : index
    %c0_1 = arith.constant 0 : index
    %c0_2 = arith.constant 0 : index
    %c0_3 = arith.constant 0 : index
    %0 = vector.load %arg1[%c0, %c0_0, %c0_1, %c0_2, %c0_3] : memref<1x2x4x2x16xf32, #tpu.memory_space<vmem>>, vector<1x2x4x2x16xf32>
    %1 = vector.shape_cast %0 : vector<1x2x4x2x16xf32> to vector<2x4x2x16xf32>
    %c0_4 = arith.constant 0 : index
    %c0_5 = arith.constant 0 : index
    %2 = vector.load %arg2[%c0_4, %c0_5] : memref<1x16xf32, #tpu.memory_space<vmem>>, vector<1x16xf32>
    %3 = vector.shape_cast %2 : vector<1x16xf32> to vector<1x1x1x16xf32>
    %4 = vector.broadcast %3 : vector<1x1x1x16xf32> to vector<2x4x2x16xf32>
    %5 = arith.mulf %1, %4 : vector<2x4x2x16xf32>
    %c0_6 = arith.constant 0 : index
    %c0_7 = arith.constant 0 : index
    %6 = vector.load %arg3[%c0_6, %c0_7] : memref<1x16xf32, #tpu.memory_space<vmem>>, vector<1x16xf32>
    %7 = vector.shape_cast %6 : vector<1x16xf32> to vector<1x1x1x16xf32>
    %8 = vector.broadcast %7 : vector<1x1x1x16xf32> to vector<2x4x2x16xf32>
    %9 = arith.addf %5, %8 : vector<2x4x2x16xf32>
    %cst = arith.constant 0.000000e+00 : f32
    %10 = vector.broadcast %cst : f32 to vector<2x4x2x16xf32>
    %11 = arith.maximumf %9, %10 : vector<2x4x2x16xf32>
    %12 = vector.extract_strided_slice %11 {offsets = [0, 0, 0, 0], sizes = [1, 4, 2, 16], strides = [1, 1, 1, 1]} : vector<2x4x2x16xf32> to vector<1x4x2x16xf32>
    %13 = vector.shape_cast %12 : vector<1x4x2x16xf32> to vector<4x2x16xf32>
    %14 = vector.extract_strided_slice %11 {offsets = [1, 0, 0, 0], sizes = [1, 4, 2, 16], strides = [1, 1, 1, 1]} : vector<2x4x2x16xf32> to vector<1x4x2x16xf32>
    %15 = vector.shape_cast %14 : vector<1x4x2x16xf32> to vector<4x2x16xf32>
    %16 = arith.maximumf %13, %15 : vector<4x2x16xf32>
    %cst_8 = arith.constant dense<0xFF800000> : vector<4x16xf32>
    %17 = vector.multi_reduction <maximumf>, %16, %cst_8 [1] : vector<4x2x16xf32> to vector<4x16xf32>
    %c0_9 = arith.constant 0 : index
    %c0_10 = arith.constant 0 : index
    %c0_11 = arith.constant 0 : index
    %18 = vector.load %arg4[%c0_9, %c0_10, %c0_11] : memref<1x4x16xf32, #tpu.memory_space<vmem>>, vector<1x4x16xf32>
    %19 = vector.shape_cast %18 : vector<1x4x16xf32> to vector<4x16xf32>
    %20 = vector.shape_cast %17 : vector<4x16xf32> to vector<1x4x16xf32>
    tpu.vector_store %arg4[%c0_9, %c0_10, %c0_11], %20 {strides = array<i32>} : memref<1x4x16xf32, #tpu.memory_space<vmem>>, vector<1x4x16xf32>,
    return
  }
  func.func @transform_0(%arg0: i32) -> (i32, i32, i32, i32, i32) {
    %c0_i32 = arith.constant 0 : i32
    %c0_i32_0 = arith.constant 0 : i32
    %c0_i32_1 = arith.constant 0 : i32
    %c0_i32_2 = arith.constant 0 : i32
    %c0_i32_3 = arith.constant 0 : i32
    return %arg0, %c0_i32, %c0_i32_0, %c0_i32_1, %c0_i32_2 : i32, i32, i32, i32, i32
  }
  func.func @transform_1(%arg0: i32) -> (i32, i32) {
    %c0_i32 = arith.constant 0 : i32
    %c0_i32_0 = arith.constant 0 : i32
    %c0_i32_1 = arith.constant 0 : i32
    return %c0_i32, %c0_i32_0 : i32, i32
  }
  func.func @transform_2(%arg0: i32) -> (i32, i32) {
    %c0_i32 = arith.constant 0 : i32
    %c0_i32_0 = arith.constant 0 : i32
    %c0_i32_1 = arith.constant 0 : i32
    return %c0_i32, %c0_i32_0 : i32, i32
  }
  func.func @transform_3(%arg0: i32) -> (i32, i32, i32) {
    %c0_i32 = arith.constant 0 : i32
    %c0_i32_0 = arith.constant 0 : i32
    %c0_i32_1 = arith.constant 0 : i32
    return %arg0, %c0_i32, %c0_i32_0 : i32, i32, i32
  }
}

module attributes {stable_mosaic.version = 11 : i64} {
  func.func @_conv3x3_kernel(%arg0: i32, %arg1: i32, %arg2: i32, %arg3: memref<1x1x6x16xf32, #tpu.memory_space<vmem>>, %arg4: memref<1x3x16x32xf32, #tpu.memory_space<vmem>>, %arg5: memref<1x1x4x32xf32, #tpu.memory_space<vmem>>) attributes {dimension_semantics = [#tpu.dimension_semantics<parallel>, #tpu.dimension_semantics<parallel>, #tpu.dimension_semantics<arbitrary>], iteration_bounds = array<i64: 2, 4, 3>, scalar_prefetch = 0 : i64, scratch_operands = 0 : i64, tpu.core_type = #tpu.core_type<tc>, window_params = [{transform_indices = @transform_0, window_bounds = array<i64: 1, 1, 6, 16>}, {transform_indices = @transform_1, window_bounds = array<i64: 1, 3, 16, 32>}, {transform_indices = @transform_2, window_bounds = array<i64: 1, 1, 4, 32>}]} {
    %c0_i32 = arith.constant 0 : i32
    %0 = arith.cmpi eq, %arg2, %c0_i32 : i32
    %1 = arith.extui %0 : i1 to i32
    %c0_i32_0 = arith.constant 0 : i32
    %2 = arith.cmpi ne, %1, %c0_i32_0 : i32
    scf.if %2 {
      %cst_24 = arith.constant 0.000000e+00 : f32
      %25 = vector.broadcast %cst_24 : f32 to vector<1x1x4x32xf32>
      %c0_25 = arith.constant 0 : index
      %c0_26 = arith.constant 0 : index
      %c0_27 = arith.constant 0 : index
      %c0_28 = arith.constant 0 : index
      %26 = vector.load %arg5[%c0_25, %c0_26, %c0_27, %c0_28] : memref<1x1x4x32xf32, #tpu.memory_space<vmem>>, vector<1x1x4x32xf32>
      tpu.vector_store %arg5[%c0_25, %c0_26, %c0_27, %c0_28], %25 {strides = array<i32>} : memref<1x1x4x32xf32, #tpu.memory_space<vmem>>, vector<1x1x4x32xf32>,
    } else {
    }
    %c0 = arith.constant 0 : index
    %c0_1 = arith.constant 0 : index
    %c0_2 = arith.constant 0 : index
    %c0_3 = arith.constant 0 : index
    %3 = vector.load %arg3[%c0, %c0_1, %c0_2, %c0_3] : memref<1x1x6x16xf32, #tpu.memory_space<vmem>>, vector<1x1x6x16xf32>
    %4 = vector.shape_cast %3 : vector<1x1x6x16xf32> to vector<6x16xf32>
    %c0_4 = arith.constant 0 : index
    %c0_5 = arith.constant 0 : index
    %c0_6 = arith.constant 0 : index
    %c0_7 = arith.constant 0 : index
    %5 = vector.load %arg5[%c0_4, %c0_5, %c0_6, %c0_7] : memref<1x1x4x32xf32, #tpu.memory_space<vmem>>, vector<1x1x4x32xf32>
    %6 = vector.shape_cast %5 : vector<1x1x4x32xf32> to vector<4x32xf32>
    %7 = vector.extract_strided_slice %4 {offsets = [0, 0], sizes = [4, 16], strides = [1, 1]} : vector<6x16xf32> to vector<4x16xf32>
    %c0_8 = arith.constant 0 : index
    %c0_9 = arith.constant 0 : index
    %c0_10 = arith.constant 0 : index
    %c0_11 = arith.constant 0 : index
    %8 = vector.load %arg4[%c0_8, %c0_9, %c0_10, %c0_11] : memref<1x3x16x32xf32, #tpu.memory_space<vmem>>, vector<1x1x16x32xf32>
    %9 = vector.shape_cast %8 : vector<1x1x16x32xf32> to vector<16x32xf32>
    %cst = arith.constant dense<0.000000e+00> : vector<4x32xf32>
    %10 = tpu.matmul %7, %9, %cst {dimension_numbers = #tpu.dot_dimension_numbers<[1], [0], [0], [1], [0, 0, 1, 1], [], []>} : vector<4x16xf32>, vector<16x32xf32>, vector<4x32xf32> -> vector<4x32xf32>
    %11 = arith.addf %6, %10 : vector<4x32xf32>
    %12 = vector.extract_strided_slice %4 {offsets = [1, 0], sizes = [4, 16], strides = [1, 1]} : vector<6x16xf32> to vector<4x16xf32>
    %c0_12 = arith.constant 0 : index
    %c1 = arith.constant 1 : index
    %c0_13 = arith.constant 0 : index
    %c0_14 = arith.constant 0 : index
    %13 = vector.load %arg4[%c0_12, %c1, %c0_13, %c0_14] : memref<1x3x16x32xf32, #tpu.memory_space<vmem>>, vector<1x1x16x32xf32>
    %14 = vector.shape_cast %13 : vector<1x1x16x32xf32> to vector<16x32xf32>
    %cst_15 = arith.constant dense<0.000000e+00> : vector<4x32xf32>
    %15 = tpu.matmul %12, %14, %cst_15 {dimension_numbers = #tpu.dot_dimension_numbers<[1], [0], [0], [1], [0, 0, 1, 1], [], []>} : vector<4x16xf32>, vector<16x32xf32>, vector<4x32xf32> -> vector<4x32xf32>
    %16 = arith.addf %11, %15 : vector<4x32xf32>
    %17 = vector.extract_strided_slice %4 {offsets = [2, 0], sizes = [4, 16], strides = [1, 1]} : vector<6x16xf32> to vector<4x16xf32>
    %c0_16 = arith.constant 0 : index
    %c2 = arith.constant 2 : index
    %c0_17 = arith.constant 0 : index
    %c0_18 = arith.constant 0 : index
    %18 = vector.load %arg4[%c0_16, %c2, %c0_17, %c0_18] : memref<1x3x16x32xf32, #tpu.memory_space<vmem>>, vector<1x1x16x32xf32>
    %19 = vector.shape_cast %18 : vector<1x1x16x32xf32> to vector<16x32xf32>
    %cst_19 = arith.constant dense<0.000000e+00> : vector<4x32xf32>
    %20 = tpu.matmul %17, %19, %cst_19 {dimension_numbers = #tpu.dot_dimension_numbers<[1], [0], [0], [1], [0, 0, 1, 1], [], []>} : vector<4x16xf32>, vector<16x32xf32>, vector<4x32xf32> -> vector<4x32xf32>
    %21 = arith.addf %16, %20 : vector<4x32xf32>
    %c0_20 = arith.constant 0 : index
    %c0_21 = arith.constant 0 : index
    %c0_22 = arith.constant 0 : index
    %c0_23 = arith.constant 0 : index
    %22 = vector.load %arg5[%c0_20, %c0_21, %c0_22, %c0_23] : memref<1x1x4x32xf32, #tpu.memory_space<vmem>>, vector<1x1x4x32xf32>
    %23 = vector.shape_cast %22 : vector<1x1x4x32xf32> to vector<4x32xf32>
    %24 = vector.shape_cast %21 : vector<4x32xf32> to vector<1x1x4x32xf32>
    tpu.vector_store %arg5[%c0_20, %c0_21, %c0_22, %c0_23], %24 {strides = array<i32>} : memref<1x1x4x32xf32, #tpu.memory_space<vmem>>, vector<1x1x4x32xf32>,
    return
  }
  func.func @transform_0(%arg0: i32, %arg1: i32, %arg2: i32) -> (i32, i32, i32, i32) {
    %0 = arith.addi %arg1, %arg2 : i32
    %c0_i32 = arith.constant 0 : i32
    %c0_i32_0 = arith.constant 0 : i32
    %c0_i32_1 = arith.constant 0 : i32
    return %arg0, %0, %c0_i32, %c0_i32_0 : i32, i32, i32, i32
  }
  func.func @transform_1(%arg0: i32, %arg1: i32, %arg2: i32) -> (i32, i32, i32, i32) {
    %c0_i32 = arith.constant 0 : i32
    %c0_i32_0 = arith.constant 0 : i32
    %c0_i32_1 = arith.constant 0 : i32
    %c0_i32_2 = arith.constant 0 : i32
    return %arg2, %c0_i32, %c0_i32_0, %c0_i32_1 : i32, i32, i32, i32
  }
  func.func @transform_2(%arg0: i32, %arg1: i32, %arg2: i32) -> (i32, i32, i32, i32) {
    %c0_i32 = arith.constant 0 : i32
    %c0_i32_0 = arith.constant 0 : i32
    %c0_i32_1 = arith.constant 0 : i32
    return %arg0, %arg1, %c0_i32, %c0_i32_0 : i32, i32, i32, i32
  }
}

module attributes {stable_mosaic.version = 11 : i64} {
  func.func @_colsum_kernel(%arg0: i32, %arg1: memref<2x512xf32, #tpu.memory_space<vmem>>, %arg2: memref<1x512xf32, #tpu.memory_space<vmem>>) attributes {dimension_semantics = [#tpu.dimension_semantics<arbitrary>], iteration_bounds = array<i64: 1>, scalar_prefetch = 0 : i64, scratch_operands = 0 : i64, tpu.core_type = #tpu.core_type<tc>, window_params = [{transform_indices = @transform_0, window_bounds = array<i64: 2, 512>}, {pipeline_mode = #tpu.pipeline_mode<synchronous>, transform_indices = @transform_1, window_bounds = array<i64: 1, 512>}]} {
    %c0_i32 = arith.constant 0 : i32
    %0 = arith.cmpi eq, %arg0, %c0_i32 : i32
    %1 = arith.extui %0 : i1 to i32
    %c0_i32_0 = arith.constant 0 : i32
    %2 = arith.cmpi ne, %1, %c0_i32_0 : i32
    scf.if %2 {
      %cst_6 = arith.constant 0.000000e+00 : f32
      %9 = vector.broadcast %cst_6 : f32 to vector<1x512xf32>
      %c0_7 = arith.constant 0 : index
      %c0_8 = arith.constant 0 : index
      %10 = vector.load %arg2[%c0_7, %c0_8] : memref<1x512xf32, #tpu.memory_space<vmem>>, vector<1x512xf32>
      tpu.vector_store %arg2[%c0_7, %c0_8], %9 {strides = array<i32>} : memref<1x512xf32, #tpu.memory_space<vmem>>, vector<1x512xf32>,
    } else {
    }
    %c0 = arith.constant 0 : index
    %c0_1 = arith.constant 0 : index
    %3 = vector.load %arg2[%c0, %c0_1] : memref<1x512xf32, #tpu.memory_space<vmem>>, vector<1x512xf32>
    %c0_2 = arith.constant 0 : index
    %c0_3 = arith.constant 0 : index
    %4 = vector.load %arg1[%c0_2, %c0_3] : memref<2x512xf32, #tpu.memory_space<vmem>>, vector<2x512xf32>
    %cst = arith.constant dense<0.000000e+00> : vector<512xf32>
    %5 = vector.multi_reduction <add>, %4, %cst [0] : vector<2x512xf32> to vector<512xf32>
    %6 = vector.shape_cast %5 : vector<512xf32> to vector<1x512xf32>
    %7 = arith.addf %3, %6 : vector<1x512xf32>
    %c0_4 = arith.constant 0 : index
    %c0_5 = arith.constant 0 : index
    %8 = vector.load %arg2[%c0_4, %c0_5] : memref<1x512xf32, #tpu.memory_space<vmem>>, vector<1x512xf32>
    tpu.vector_store %arg2[%c0_4, %c0_5], %7 {strides = array<i32>} : memref<1x512xf32, #tpu.memory_space<vmem>>, vector<1x512xf32>,
    return
  }
  func.func @transform_0(%arg0: i32) -> (i32, i32) {
    %c0_i32 = arith.constant 0 : i32
    %c0_i32_0 = arith.constant 0 : i32
    return %arg0, %c0_i32 : i32, i32
  }
  func.func @transform_1(%arg0: i32) -> (i32, i32) {
    %c0_i32 = arith.constant 0 : i32
    %c0_i32_0 = arith.constant 0 : i32
    %c0_i32_1 = arith.constant 0 : i32
    return %c0_i32, %c0_i32_0 : i32, i32
  }
}

module attributes {stable_mosaic.version = 11 : i64} {
  func.func @_colvar_kernel(%arg0: i32, %arg1: memref<2x512xf32, #tpu.memory_space<vmem>>, %arg2: memref<1x512xf32, #tpu.memory_space<vmem>>, %arg3: memref<1x512xf32, #tpu.memory_space<vmem>>) attributes {dimension_semantics = [#tpu.dimension_semantics<arbitrary>], iteration_bounds = array<i64: 1>, scalar_prefetch = 0 : i64, scratch_operands = 0 : i64, tpu.core_type = #tpu.core_type<tc>, window_params = [{transform_indices = @transform_0, window_bounds = array<i64: 2, 512>}, {pipeline_mode = #tpu.pipeline_mode<synchronous>, transform_indices = @transform_1, window_bounds = array<i64: 1, 512>}, {pipeline_mode = #tpu.pipeline_mode<synchronous>, transform_indices = @transform_2, window_bounds = array<i64: 1, 512>}]} {
    %c0_i32 = arith.constant 0 : i32
    %0 = arith.cmpi eq, %arg0, %c0_i32 : i32
    %1 = arith.extui %0 : i1 to i32
    %c0_i32_0 = arith.constant 0 : i32
    %2 = arith.cmpi ne, %1, %c0_i32_0 : i32
    scf.if %2 {
      %cst_8 = arith.constant 0.000000e+00 : f32
      %13 = vector.broadcast %cst_8 : f32 to vector<1x512xf32>
      %c0_9 = arith.constant 0 : index
      %c0_10 = arith.constant 0 : index
      %14 = vector.load %arg3[%c0_9, %c0_10] : memref<1x512xf32, #tpu.memory_space<vmem>>, vector<1x512xf32>
      tpu.vector_store %arg3[%c0_9, %c0_10], %13 {strides = array<i32>} : memref<1x512xf32, #tpu.memory_space<vmem>>, vector<1x512xf32>,
    } else {
    }
    %c0 = arith.constant 0 : index
    %c0_1 = arith.constant 0 : index
    %3 = vector.load %arg1[%c0, %c0_1] : memref<2x512xf32, #tpu.memory_space<vmem>>, vector<2x512xf32>
    %c0_2 = arith.constant 0 : index
    %c0_3 = arith.constant 0 : index
    %4 = vector.load %arg2[%c0_2, %c0_3] : memref<1x512xf32, #tpu.memory_space<vmem>>, vector<1x512xf32>
    %5 = vector.broadcast %4 : vector<1x512xf32> to vector<2x512xf32>
    %6 = arith.subf %3, %5 : vector<2x512xf32>
    %c0_4 = arith.constant 0 : index
    %c0_5 = arith.constant 0 : index
    %7 = vector.load %arg3[%c0_4, %c0_5] : memref<1x512xf32, #tpu.memory_space<vmem>>, vector<1x512xf32>
    %8 = arith.mulf %6, %6 : vector<2x512xf32>
    %cst = arith.constant dense<0.000000e+00> : vector<512xf32>
    %9 = vector.multi_reduction <add>, %8, %cst [0] : vector<2x512xf32> to vector<512xf32>
    %10 = vector.shape_cast %9 : vector<512xf32> to vector<1x512xf32>
    %11 = arith.addf %7, %10 : vector<1x512xf32>
    %c0_6 = arith.constant 0 : index
    %c0_7 = arith.constant 0 : index
    %12 = vector.load %arg3[%c0_6, %c0_7] : memref<1x512xf32, #tpu.memory_space<vmem>>, vector<1x512xf32>
    tpu.vector_store %arg3[%c0_6, %c0_7], %11 {strides = array<i32>} : memref<1x512xf32, #tpu.memory_space<vmem>>, vector<1x512xf32>,
    return
  }
  func.func @transform_0(%arg0: i32) -> (i32, i32) {
    %c0_i32 = arith.constant 0 : i32
    %c0_i32_0 = arith.constant 0 : i32
    return %arg0, %c0_i32 : i32, i32
  }
  func.func @transform_1(%arg0: i32) -> (i32, i32) {
    %c0_i32 = arith.constant 0 : i32
    %c0_i32_0 = arith.constant 0 : i32
    %c0_i32_1 = arith.constant 0 : i32
    return %c0_i32, %c0_i32_0 : i32, i32
  }
  func.func @transform_2(%arg0: i32) -> (i32, i32) {
    %c0_i32 = arith.constant 0 : i32
    %c0_i32_0 = arith.constant 0 : i32
    %c0_i32_1 = arith.constant 0 : i32
    return %c0_i32, %c0_i32_0 : i32, i32
  }
}

module attributes {stable_mosaic.version = 11 : i64} {
  func.func @_bn_relu_pool_kernel(%arg0: i32, %arg1: memref<1x2x2x2x32xf32, #tpu.memory_space<vmem>>, %arg2: memref<1x32xf32, #tpu.memory_space<vmem>>, %arg3: memref<1x32xf32, #tpu.memory_space<vmem>>, %arg4: memref<1x2x32xf32, #tpu.memory_space<vmem>>) attributes {dimension_semantics = [#tpu.dimension_semantics<parallel>], iteration_bounds = array<i64: 4>, scalar_prefetch = 0 : i64, scratch_operands = 0 : i64, tpu.core_type = #tpu.core_type<tc>, window_params = [{transform_indices = @transform_0, window_bounds = array<i64: 1, 2, 2, 2, 32>}, {pipeline_mode = #tpu.pipeline_mode<synchronous>, transform_indices = @transform_1, window_bounds = array<i64: 1, 32>}, {pipeline_mode = #tpu.pipeline_mode<synchronous>, transform_indices = @transform_2, window_bounds = array<i64: 1, 32>}, {transform_indices = @transform_3, window_bounds = array<i64: 1, 2, 32>}]} {
    %c0 = arith.constant 0 : index
    %c0_0 = arith.constant 0 : index
    %c0_1 = arith.constant 0 : index
    %c0_2 = arith.constant 0 : index
    %c0_3 = arith.constant 0 : index
    %0 = vector.load %arg1[%c0, %c0_0, %c0_1, %c0_2, %c0_3] : memref<1x2x2x2x32xf32, #tpu.memory_space<vmem>>, vector<1x2x2x2x32xf32>
    %1 = vector.shape_cast %0 : vector<1x2x2x2x32xf32> to vector<2x2x2x32xf32>
    %c0_4 = arith.constant 0 : index
    %c0_5 = arith.constant 0 : index
    %2 = vector.load %arg2[%c0_4, %c0_5] : memref<1x32xf32, #tpu.memory_space<vmem>>, vector<1x32xf32>
    %3 = vector.shape_cast %2 : vector<1x32xf32> to vector<1x1x1x32xf32>
    %4 = vector.broadcast %3 : vector<1x1x1x32xf32> to vector<2x2x2x32xf32>
    %5 = arith.mulf %1, %4 : vector<2x2x2x32xf32>
    %c0_6 = arith.constant 0 : index
    %c0_7 = arith.constant 0 : index
    %6 = vector.load %arg3[%c0_6, %c0_7] : memref<1x32xf32, #tpu.memory_space<vmem>>, vector<1x32xf32>
    %7 = vector.shape_cast %6 : vector<1x32xf32> to vector<1x1x1x32xf32>
    %8 = vector.broadcast %7 : vector<1x1x1x32xf32> to vector<2x2x2x32xf32>
    %9 = arith.addf %5, %8 : vector<2x2x2x32xf32>
    %cst = arith.constant 0.000000e+00 : f32
    %10 = vector.broadcast %cst : f32 to vector<2x2x2x32xf32>
    %11 = arith.maximumf %9, %10 : vector<2x2x2x32xf32>
    %12 = vector.extract_strided_slice %11 {offsets = [0, 0, 0, 0], sizes = [1, 2, 2, 32], strides = [1, 1, 1, 1]} : vector<2x2x2x32xf32> to vector<1x2x2x32xf32>
    %13 = vector.shape_cast %12 : vector<1x2x2x32xf32> to vector<2x2x32xf32>
    %14 = vector.extract_strided_slice %11 {offsets = [1, 0, 0, 0], sizes = [1, 2, 2, 32], strides = [1, 1, 1, 1]} : vector<2x2x2x32xf32> to vector<1x2x2x32xf32>
    %15 = vector.shape_cast %14 : vector<1x2x2x32xf32> to vector<2x2x32xf32>
    %16 = arith.maximumf %13, %15 : vector<2x2x32xf32>
    %cst_8 = arith.constant dense<0xFF800000> : vector<2x32xf32>
    %17 = vector.multi_reduction <maximumf>, %16, %cst_8 [1] : vector<2x2x32xf32> to vector<2x32xf32>
    %c0_9 = arith.constant 0 : index
    %c0_10 = arith.constant 0 : index
    %c0_11 = arith.constant 0 : index
    %18 = vector.load %arg4[%c0_9, %c0_10, %c0_11] : memref<1x2x32xf32, #tpu.memory_space<vmem>>, vector<1x2x32xf32>
    %19 = vector.shape_cast %18 : vector<1x2x32xf32> to vector<2x32xf32>
    %20 = vector.shape_cast %17 : vector<2x32xf32> to vector<1x2x32xf32>
    tpu.vector_store %arg4[%c0_9, %c0_10, %c0_11], %20 {strides = array<i32>} : memref<1x2x32xf32, #tpu.memory_space<vmem>>, vector<1x2x32xf32>,
    return
  }
  func.func @transform_0(%arg0: i32) -> (i32, i32, i32, i32, i32) {
    %c0_i32 = arith.constant 0 : i32
    %c0_i32_0 = arith.constant 0 : i32
    %c0_i32_1 = arith.constant 0 : i32
    %c0_i32_2 = arith.constant 0 : i32
    %c0_i32_3 = arith.constant 0 : i32
    return %arg0, %c0_i32, %c0_i32_0, %c0_i32_1, %c0_i32_2 : i32, i32, i32, i32, i32
  }
  func.func @transform_1(%arg0: i32) -> (i32, i32) {
    %c0_i32 = arith.constant 0 : i32
    %c0_i32_0 = arith.constant 0 : i32
    %c0_i32_1 = arith.constant 0 : i32
    return %c0_i32, %c0_i32_0 : i32, i32
  }
  func.func @transform_2(%arg0: i32) -> (i32, i32) {
    %c0_i32 = arith.constant 0 : i32
    %c0_i32_0 = arith.constant 0 : i32
    %c0_i32_1 = arith.constant 0 : i32
    return %c0_i32, %c0_i32_0 : i32, i32
  }
  func.func @transform_3(%arg0: i32) -> (i32, i32, i32) {
    %c0_i32 = arith.constant 0 : i32
    %c0_i32_0 = arith.constant 0 : i32
    %c0_i32_1 = arith.constant 0 : i32
    return %arg0, %c0_i32, %c0_i32_0 : i32, i32, i32
  }
}

module attributes {stable_mosaic.version = 11 : i64} {
  func.func @_conv3x3_kernel(%arg0: i32, %arg1: i32, %arg2: i32, %arg3: memref<1x1x4x32xf32, #tpu.memory_space<vmem>>, %arg4: memref<1x3x32x128xf32, #tpu.memory_space<vmem>>, %arg5: memref<1x1x2x128xf32, #tpu.memory_space<vmem>>) attributes {dimension_semantics = [#tpu.dimension_semantics<parallel>, #tpu.dimension_semantics<parallel>, #tpu.dimension_semantics<arbitrary>], iteration_bounds = array<i64: 2, 2, 3>, scalar_prefetch = 0 : i64, scratch_operands = 0 : i64, tpu.core_type = #tpu.core_type<tc>, window_params = [{transform_indices = @transform_0, window_bounds = array<i64: 1, 1, 4, 32>}, {transform_indices = @transform_1, window_bounds = array<i64: 1, 3, 32, 128>}, {transform_indices = @transform_2, window_bounds = array<i64: 1, 1, 2, 128>}]} {
    %c0_i32 = arith.constant 0 : i32
    %0 = arith.cmpi eq, %arg2, %c0_i32 : i32
    %1 = arith.extui %0 : i1 to i32
    %c0_i32_0 = arith.constant 0 : i32
    %2 = arith.cmpi ne, %1, %c0_i32_0 : i32
    scf.if %2 {
      %cst_24 = arith.constant 0.000000e+00 : f32
      %25 = vector.broadcast %cst_24 : f32 to vector<1x1x2x128xf32>
      %c0_25 = arith.constant 0 : index
      %c0_26 = arith.constant 0 : index
      %c0_27 = arith.constant 0 : index
      %c0_28 = arith.constant 0 : index
      %26 = vector.load %arg5[%c0_25, %c0_26, %c0_27, %c0_28] : memref<1x1x2x128xf32, #tpu.memory_space<vmem>>, vector<1x1x2x128xf32>
      tpu.vector_store %arg5[%c0_25, %c0_26, %c0_27, %c0_28], %25 {strides = array<i32>} : memref<1x1x2x128xf32, #tpu.memory_space<vmem>>, vector<1x1x2x128xf32>,
    } else {
    }
    %c0 = arith.constant 0 : index
    %c0_1 = arith.constant 0 : index
    %c0_2 = arith.constant 0 : index
    %c0_3 = arith.constant 0 : index
    %3 = vector.load %arg3[%c0, %c0_1, %c0_2, %c0_3] : memref<1x1x4x32xf32, #tpu.memory_space<vmem>>, vector<1x1x4x32xf32>
    %4 = vector.shape_cast %3 : vector<1x1x4x32xf32> to vector<4x32xf32>
    %c0_4 = arith.constant 0 : index
    %c0_5 = arith.constant 0 : index
    %c0_6 = arith.constant 0 : index
    %c0_7 = arith.constant 0 : index
    %5 = vector.load %arg5[%c0_4, %c0_5, %c0_6, %c0_7] : memref<1x1x2x128xf32, #tpu.memory_space<vmem>>, vector<1x1x2x128xf32>
    %6 = vector.shape_cast %5 : vector<1x1x2x128xf32> to vector<2x128xf32>
    %7 = vector.extract_strided_slice %4 {offsets = [0, 0], sizes = [2, 32], strides = [1, 1]} : vector<4x32xf32> to vector<2x32xf32>
    %c0_8 = arith.constant 0 : index
    %c0_9 = arith.constant 0 : index
    %c0_10 = arith.constant 0 : index
    %c0_11 = arith.constant 0 : index
    %8 = vector.load %arg4[%c0_8, %c0_9, %c0_10, %c0_11] : memref<1x3x32x128xf32, #tpu.memory_space<vmem>>, vector<1x1x32x128xf32>
    %9 = vector.shape_cast %8 : vector<1x1x32x128xf32> to vector<32x128xf32>
    %cst = arith.constant dense<0.000000e+00> : vector<2x128xf32>
    %10 = tpu.matmul %7, %9, %cst {dimension_numbers = #tpu.dot_dimension_numbers<[1], [0], [0], [1], [0, 0, 1, 1], [], []>} : vector<2x32xf32>, vector<32x128xf32>, vector<2x128xf32> -> vector<2x128xf32>
    %11 = arith.addf %6, %10 : vector<2x128xf32>
    %12 = vector.extract_strided_slice %4 {offsets = [1, 0], sizes = [2, 32], strides = [1, 1]} : vector<4x32xf32> to vector<2x32xf32>
    %c0_12 = arith.constant 0 : index
    %c1 = arith.constant 1 : index
    %c0_13 = arith.constant 0 : index
    %c0_14 = arith.constant 0 : index
    %13 = vector.load %arg4[%c0_12, %c1, %c0_13, %c0_14] : memref<1x3x32x128xf32, #tpu.memory_space<vmem>>, vector<1x1x32x128xf32>
    %14 = vector.shape_cast %13 : vector<1x1x32x128xf32> to vector<32x128xf32>
    %cst_15 = arith.constant dense<0.000000e+00> : vector<2x128xf32>
    %15 = tpu.matmul %12, %14, %cst_15 {dimension_numbers = #tpu.dot_dimension_numbers<[1], [0], [0], [1], [0, 0, 1, 1], [], []>} : vector<2x32xf32>, vector<32x128xf32>, vector<2x128xf32> -> vector<2x128xf32>
    %16 = arith.addf %11, %15 : vector<2x128xf32>
    %17 = vector.extract_strided_slice %4 {offsets = [2, 0], sizes = [2, 32], strides = [1, 1]} : vector<4x32xf32> to vector<2x32xf32>
    %c0_16 = arith.constant 0 : index
    %c2 = arith.constant 2 : index
    %c0_17 = arith.constant 0 : index
    %c0_18 = arith.constant 0 : index
    %18 = vector.load %arg4[%c0_16, %c2, %c0_17, %c0_18] : memref<1x3x32x128xf32, #tpu.memory_space<vmem>>, vector<1x1x32x128xf32>
    %19 = vector.shape_cast %18 : vector<1x1x32x128xf32> to vector<32x128xf32>
    %cst_19 = arith.constant dense<0.000000e+00> : vector<2x128xf32>
    %20 = tpu.matmul %17, %19, %cst_19 {dimension_numbers = #tpu.dot_dimension_numbers<[1], [0], [0], [1], [0, 0, 1, 1], [], []>} : vector<2x32xf32>, vector<32x128xf32>, vector<2x128xf32> -> vector<2x128xf32>
    %21 = arith.addf %16, %20 : vector<2x128xf32>
    %c0_20 = arith.constant 0 : index
    %c0_21 = arith.constant 0 : index
    %c0_22 = arith.constant 0 : index
    %c0_23 = arith.constant 0 : index
    %22 = vector.load %arg5[%c0_20, %c0_21, %c0_22, %c0_23] : memref<1x1x2x128xf32, #tpu.memory_space<vmem>>, vector<1x1x2x128xf32>
    %23 = vector.shape_cast %22 : vector<1x1x2x128xf32> to vector<2x128xf32>
    %24 = vector.shape_cast %21 : vector<2x128xf32> to vector<1x1x2x128xf32>
    tpu.vector_store %arg5[%c0_20, %c0_21, %c0_22, %c0_23], %24 {strides = array<i32>} : memref<1x1x2x128xf32, #tpu.memory_space<vmem>>, vector<1x1x2x128xf32>,
    return
  }
  func.func @transform_0(%arg0: i32, %arg1: i32, %arg2: i32) -> (i32, i32, i32, i32) {
    %0 = arith.addi %arg1, %arg2 : i32
    %c0_i32 = arith.constant 0 : i32
    %c0_i32_0 = arith.constant 0 : i32
    %c0_i32_1 = arith.constant 0 : i32
    return %arg0, %0, %c0_i32, %c0_i32_0 : i32, i32, i32, i32
  }
  func.func @transform_1(%arg0: i32, %arg1: i32, %arg2: i32) -> (i32, i32, i32, i32) {
    %c0_i32 = arith.constant 0 : i32
    %c0_i32_0 = arith.constant 0 : i32
    %c0_i32_1 = arith.constant 0 : i32
    %c0_i32_2 = arith.constant 0 : i32
    return %arg2, %c0_i32, %c0_i32_0, %c0_i32_1 : i32, i32, i32, i32
  }
  func.func @transform_2(%arg0: i32, %arg1: i32, %arg2: i32) -> (i32, i32, i32, i32) {
    %c0_i32 = arith.constant 0 : i32
    %c0_i32_0 = arith.constant 0 : i32
    %c0_i32_1 = arith.constant 0 : i32
    return %arg0, %arg1, %c0_i32, %c0_i32_0 : i32, i32, i32, i32
  }
}

module attributes {stable_mosaic.version = 11 : i64} {
  func.func @_affine_act_kernel(%arg0: i32, %arg1: memref<2x512xf32, #tpu.memory_space<vmem>>, %arg2: memref<1x512xf32, #tpu.memory_space<vmem>>, %arg3: memref<1x512xf32, #tpu.memory_space<vmem>>, %arg4: memref<2x512xf32, #tpu.memory_space<vmem>>) attributes {dimension_semantics = [#tpu.dimension_semantics<parallel>], iteration_bounds = array<i64: 1>, scalar_prefetch = 0 : i64, scratch_operands = 0 : i64, tpu.core_type = #tpu.core_type<tc>, window_params = [{transform_indices = @transform_0, window_bounds = array<i64: 2, 512>}, {pipeline_mode = #tpu.pipeline_mode<synchronous>, transform_indices = @transform_1, window_bounds = array<i64: 1, 512>}, {pipeline_mode = #tpu.pipeline_mode<synchronous>, transform_indices = @transform_2, window_bounds = array<i64: 1, 512>}, {transform_indices = @transform_3, window_bounds = array<i64: 2, 512>}]} {
    %c0 = arith.constant 0 : index
    %c0_0 = arith.constant 0 : index
    %0 = vector.load %arg1[%c0, %c0_0] : memref<2x512xf32, #tpu.memory_space<vmem>>, vector<2x512xf32>
    %c0_1 = arith.constant 0 : index
    %c0_2 = arith.constant 0 : index
    %1 = vector.load %arg2[%c0_1, %c0_2] : memref<1x512xf32, #tpu.memory_space<vmem>>, vector<1x512xf32>
    %2 = vector.broadcast %1 : vector<1x512xf32> to vector<2x512xf32>
    %3 = arith.mulf %0, %2 : vector<2x512xf32>
    %c0_3 = arith.constant 0 : index
    %c0_4 = arith.constant 0 : index
    %4 = vector.load %arg3[%c0_3, %c0_4] : memref<1x512xf32, #tpu.memory_space<vmem>>, vector<1x512xf32>
    %5 = vector.broadcast %4 : vector<1x512xf32> to vector<2x512xf32>
    %6 = arith.addf %3, %5 : vector<2x512xf32>
    %cst = arith.constant 0.000000e+00 : f32
    %7 = vector.broadcast %cst : f32 to vector<2x512xf32>
    %8 = arith.maximumf %6, %7 : vector<2x512xf32>
    %c0_5 = arith.constant 0 : index
    %c0_6 = arith.constant 0 : index
    %9 = vector.load %arg4[%c0_5, %c0_6] : memref<2x512xf32, #tpu.memory_space<vmem>>, vector<2x512xf32>
    tpu.vector_store %arg4[%c0_5, %c0_6], %8 {strides = array<i32>} : memref<2x512xf32, #tpu.memory_space<vmem>>, vector<2x512xf32>,
    return
  }
  func.func @transform_0(%arg0: i32) -> (i32, i32) {
    %c0_i32 = arith.constant 0 : i32
    %c0_i32_0 = arith.constant 0 : i32
    return %arg0, %c0_i32 : i32, i32
  }
  func.func @transform_1(%arg0: i32) -> (i32, i32) {
    %c0_i32 = arith.constant 0 : i32
    %c0_i32_0 = arith.constant 0 : i32
    %c0_i32_1 = arith.constant 0 : i32
    return %c0_i32, %c0_i32_0 : i32, i32
  }
  func.func @transform_2(%arg0: i32) -> (i32, i32) {
    %c0_i32 = arith.constant 0 : i32
    %c0_i32_0 = arith.constant 0 : i32
    %c0_i32_1 = arith.constant 0 : i32
    return %c0_i32, %c0_i32_0 : i32, i32
  }
  func.func @transform_3(%arg0: i32) -> (i32, i32) {
    %c0_i32 = arith.constant 0 : i32
    %c0_i32_0 = arith.constant 0 : i32
    return %arg0, %c0_i32 : i32, i32
  }
}

module attributes {stable_mosaic.version = 11 : i64} {
  func.func @_matmul_kernel(%arg0: i32, %arg1: memref<8x128xf32, #tpu.memory_space<vmem>>, %arg2: memref<128x128xf32, #tpu.memory_space<vmem>>, %arg3: memref<8x128xf32, #tpu.memory_space<vmem>>) attributes {dimension_semantics = [#tpu.dimension_semantics<parallel>], iteration_bounds = array<i64: 1>, scalar_prefetch = 0 : i64, scratch_operands = 0 : i64, tpu.core_type = #tpu.core_type<tc>, window_params = [{transform_indices = @transform_0, window_bounds = array<i64: 8, 128>}, {pipeline_mode = #tpu.pipeline_mode<synchronous>, transform_indices = @transform_1, window_bounds = array<i64: 128, 128>}, {transform_indices = @transform_2, window_bounds = array<i64: 8, 128>}]} {
    %c0 = arith.constant 0 : index
    %c0_0 = arith.constant 0 : index
    %0 = vector.load %arg1[%c0, %c0_0] : memref<8x128xf32, #tpu.memory_space<vmem>>, vector<8x128xf32>
    %c0_1 = arith.constant 0 : index
    %c0_2 = arith.constant 0 : index
    %1 = vector.load %arg2[%c0_1, %c0_2] : memref<128x128xf32, #tpu.memory_space<vmem>>, vector<128x128xf32>
    %cst = arith.constant dense<0.000000e+00> : vector<8x128xf32>
    %2 = tpu.matmul %0, %1, %cst {dimension_numbers = #tpu.dot_dimension_numbers<[1], [0], [0], [1], [0, 0, 1, 1], [], []>} : vector<8x128xf32>, vector<128x128xf32>, vector<8x128xf32> -> vector<8x128xf32>
    %c0_3 = arith.constant 0 : index
    %c0_4 = arith.constant 0 : index
    %3 = vector.load %arg3[%c0_3, %c0_4] : memref<8x128xf32, #tpu.memory_space<vmem>>, vector<8x128xf32>
    tpu.vector_store %arg3[%c0_3, %c0_4], %2 {strides = array<i32>} : memref<8x128xf32, #tpu.memory_space<vmem>>, vector<8x128xf32>,
    return
  }
  func.func @transform_0(%arg0: i32) -> (i32, i32) {
    %c0_i32 = arith.constant 0 : i32
    %c0_i32_0 = arith.constant 0 : i32
    return %arg0, %c0_i32 : i32, i32
  }
  func.func @transform_1(%arg0: i32) -> (i32, i32) {
    %c0_i32 = arith.constant 0 : i32
    %c0_i32_0 = arith.constant 0 : i32
    %c0_i32_1 = arith.constant 0 : i32
    return %c0_i32, %c0_i32_0 : i32, i32
  }
  func.func @transform_2(%arg0: i32) -> (i32, i32) {
    %c0_i32 = arith.constant 0 : i32
    %c0_i32_0 = arith.constant 0 : i32
    return %arg0, %c0_i32 : i32, i32
  }
}

module attributes {stable_mosaic.version = 11 : i64} {
  func.func @_matmul_kernel(%arg0: i32, %arg1: memref<32x32xf32, #tpu.memory_space<vmem>>, %arg2: memref<32x64xf32, #tpu.memory_space<vmem>>, %arg3: memref<32x64xf32, #tpu.memory_space<vmem>>) attributes {dimension_semantics = [#tpu.dimension_semantics<parallel>], iteration_bounds = array<i64: 1>, scalar_prefetch = 0 : i64, scratch_operands = 0 : i64, tpu.core_type = #tpu.core_type<tc>, window_params = [{transform_indices = @transform_0, window_bounds = array<i64: 32, 32>}, {pipeline_mode = #tpu.pipeline_mode<synchronous>, transform_indices = @transform_1, window_bounds = array<i64: 32, 64>}, {transform_indices = @transform_2, window_bounds = array<i64: 32, 64>}]} {
    %c0 = arith.constant 0 : index
    %c0_0 = arith.constant 0 : index
    %0 = vector.load %arg1[%c0, %c0_0] : memref<32x32xf32, #tpu.memory_space<vmem>>, vector<32x32xf32>
    %c0_1 = arith.constant 0 : index
    %c0_2 = arith.constant 0 : index
    %1 = vector.load %arg2[%c0_1, %c0_2] : memref<32x64xf32, #tpu.memory_space<vmem>>, vector<32x64xf32>
    %cst = arith.constant dense<0.000000e+00> : vector<32x64xf32>
    %2 = tpu.matmul %0, %1, %cst {dimension_numbers = #tpu.dot_dimension_numbers<[1], [0], [0], [1], [0, 0, 1, 1], [], []>} : vector<32x32xf32>, vector<32x64xf32>, vector<32x64xf32> -> vector<32x64xf32>
    %c0_3 = arith.constant 0 : index
    %c0_4 = arith.constant 0 : index
    %3 = vector.load %arg3[%c0_3, %c0_4] : memref<32x64xf32, #tpu.memory_space<vmem>>, vector<32x64xf32>
    tpu.vector_store %arg3[%c0_3, %c0_4], %2 {strides = array<i32>} : memref<32x64xf32, #tpu.memory_space<vmem>>, vector<32x64xf32>,
    return
  }
  func.func @transform_0(%arg0: i32) -> (i32, i32) {
    %c0_i32 = arith.constant 0 : i32
    %c0_i32_0 = arith.constant 0 : i32
    return %arg0, %c0_i32 : i32, i32
  }
  func.func @transform_1(%arg0: i32) -> (i32, i32) {
    %c0_i32 = arith.constant 0 : i32
    %c0_i32_0 = arith.constant 0 : i32
    %c0_i32_1 = arith.constant 0 : i32
    return %c0_i32, %c0_i32_0 : i32, i32
  }
  func.func @transform_2(%arg0: i32) -> (i32, i32) {
    %c0_i32 = arith.constant 0 : i32
    %c0_i32_0 = arith.constant 0 : i32
    return %arg0, %c0_i32 : i32, i32
  }
}

module attributes {stable_mosaic.version = 11 : i64} {
  func.func @_affine_act_kernel(%arg0: i32, %arg1: memref<4x512xf32, #tpu.memory_space<vmem>>, %arg2: memref<1x512xf32, #tpu.memory_space<vmem>>, %arg3: memref<1x512xf32, #tpu.memory_space<vmem>>, %arg4: memref<4x512xf32, #tpu.memory_space<vmem>>) attributes {dimension_semantics = [#tpu.dimension_semantics<parallel>], iteration_bounds = array<i64: 1>, scalar_prefetch = 0 : i64, scratch_operands = 0 : i64, tpu.core_type = #tpu.core_type<tc>, window_params = [{transform_indices = @transform_0, window_bounds = array<i64: 4, 512>}, {pipeline_mode = #tpu.pipeline_mode<synchronous>, transform_indices = @transform_1, window_bounds = array<i64: 1, 512>}, {pipeline_mode = #tpu.pipeline_mode<synchronous>, transform_indices = @transform_2, window_bounds = array<i64: 1, 512>}, {transform_indices = @transform_3, window_bounds = array<i64: 4, 512>}]} {
    %c0 = arith.constant 0 : index
    %c0_0 = arith.constant 0 : index
    %0 = vector.load %arg1[%c0, %c0_0] : memref<4x512xf32, #tpu.memory_space<vmem>>, vector<4x512xf32>
    %c0_1 = arith.constant 0 : index
    %c0_2 = arith.constant 0 : index
    %1 = vector.load %arg2[%c0_1, %c0_2] : memref<1x512xf32, #tpu.memory_space<vmem>>, vector<1x512xf32>
    %2 = vector.broadcast %1 : vector<1x512xf32> to vector<4x512xf32>
    %3 = arith.mulf %0, %2 : vector<4x512xf32>
    %c0_3 = arith.constant 0 : index
    %c0_4 = arith.constant 0 : index
    %4 = vector.load %arg3[%c0_3, %c0_4] : memref<1x512xf32, #tpu.memory_space<vmem>>, vector<1x512xf32>
    %5 = vector.broadcast %4 : vector<1x512xf32> to vector<4x512xf32>
    %6 = arith.addf %3, %5 : vector<4x512xf32>
    %cst = arith.constant 0.000000e+00 : f32
    %7 = vector.broadcast %cst : f32 to vector<4x512xf32>
    %8 = arith.maximumf %6, %7 : vector<4x512xf32>
    %c0_5 = arith.constant 0 : index
    %c0_6 = arith.constant 0 : index
    %9 = vector.load %arg4[%c0_5, %c0_6] : memref<4x512xf32, #tpu.memory_space<vmem>>, vector<4x512xf32>
    tpu.vector_store %arg4[%c0_5, %c0_6], %8 {strides = array<i32>} : memref<4x512xf32, #tpu.memory_space<vmem>>, vector<4x512xf32>,
    return
  }
  func.func @transform_0(%arg0: i32) -> (i32, i32) {
    %c0_i32 = arith.constant 0 : i32
    %c0_i32_0 = arith.constant 0 : i32
    return %arg0, %c0_i32 : i32, i32
  }
  func.func @transform_1(%arg0: i32) -> (i32, i32) {
    %c0_i32 = arith.constant 0 : i32
    %c0_i32_0 = arith.constant 0 : i32
    %c0_i32_1 = arith.constant 0 : i32
    return %c0_i32, %c0_i32_0 : i32, i32
  }
  func.func @transform_2(%arg0: i32) -> (i32, i32) {
    %c0_i32 = arith.constant 0 : i32
    %c0_i32_0 = arith.constant 0 : i32
    %c0_i32_1 = arith.constant 0 : i32
    return %c0_i32, %c0_i32_0 : i32, i32
  }
  func.func @transform_3(%arg0: i32) -> (i32, i32) {
    %c0_i32 = arith.constant 0 : i32
    %c0_i32_0 = arith.constant 0 : i32
    return %arg0, %c0_i32 : i32, i32
  }
}

module attributes {stable_mosaic.version = 11 : i64} {
  func.func @_matmul_kernel(%arg0: i32, %arg1: memref<128x16xf32, #tpu.memory_space<vmem>>, %arg2: memref<16x32xf32, #tpu.memory_space<vmem>>, %arg3: memref<128x32xf32, #tpu.memory_space<vmem>>) attributes {dimension_semantics = [#tpu.dimension_semantics<parallel>], iteration_bounds = array<i64: 1>, scalar_prefetch = 0 : i64, scratch_operands = 0 : i64, tpu.core_type = #tpu.core_type<tc>, window_params = [{transform_indices = @transform_0, window_bounds = array<i64: 128, 16>}, {pipeline_mode = #tpu.pipeline_mode<synchronous>, transform_indices = @transform_1, window_bounds = array<i64: 16, 32>}, {transform_indices = @transform_2, window_bounds = array<i64: 128, 32>}]} {
    %c0 = arith.constant 0 : index
    %c0_0 = arith.constant 0 : index
    %0 = vector.load %arg1[%c0, %c0_0] : memref<128x16xf32, #tpu.memory_space<vmem>>, vector<128x16xf32>
    %c0_1 = arith.constant 0 : index
    %c0_2 = arith.constant 0 : index
    %1 = vector.load %arg2[%c0_1, %c0_2] : memref<16x32xf32, #tpu.memory_space<vmem>>, vector<16x32xf32>
    %cst = arith.constant dense<0.000000e+00> : vector<128x32xf32>
    %2 = tpu.matmul %0, %1, %cst {dimension_numbers = #tpu.dot_dimension_numbers<[1], [0], [0], [1], [0, 0, 1, 1], [], []>} : vector<128x16xf32>, vector<16x32xf32>, vector<128x32xf32> -> vector<128x32xf32>
    %c0_3 = arith.constant 0 : index
    %c0_4 = arith.constant 0 : index
    %3 = vector.load %arg3[%c0_3, %c0_4] : memref<128x32xf32, #tpu.memory_space<vmem>>, vector<128x32xf32>
    tpu.vector_store %arg3[%c0_3, %c0_4], %2 {strides = array<i32>} : memref<128x32xf32, #tpu.memory_space<vmem>>, vector<128x32xf32>,
    return
  }
  func.func @transform_0(%arg0: i32) -> (i32, i32) {
    %c0_i32 = arith.constant 0 : i32
    %c0_i32_0 = arith.constant 0 : i32
    return %arg0, %c0_i32 : i32, i32
  }
  func.func @transform_1(%arg0: i32) -> (i32, i32) {
    %c0_i32 = arith.constant 0 : i32
    %c0_i32_0 = arith.constant 0 : i32
    %c0_i32_1 = arith.constant 0 : i32
    return %c0_i32, %c0_i32_0 : i32, i32
  }
  func.func @transform_2(%arg0: i32) -> (i32, i32) {
    %c0_i32 = arith.constant 0 : i32
    %c0_i32_0 = arith.constant 0 : i32
    return %arg0, %c0_i32 : i32, i32
  }
}

module attributes {stable_mosaic.version = 11 : i64} {
  func.func @_affine_act_kernel(%arg0: i32, %arg1: memref<8x512xf32, #tpu.memory_space<vmem>>, %arg2: memref<1x512xf32, #tpu.memory_space<vmem>>, %arg3: memref<1x512xf32, #tpu.memory_space<vmem>>, %arg4: memref<8x512xf32, #tpu.memory_space<vmem>>) attributes {dimension_semantics = [#tpu.dimension_semantics<parallel>], iteration_bounds = array<i64: 1>, scalar_prefetch = 0 : i64, scratch_operands = 0 : i64, tpu.core_type = #tpu.core_type<tc>, window_params = [{transform_indices = @transform_0, window_bounds = array<i64: 8, 512>}, {pipeline_mode = #tpu.pipeline_mode<synchronous>, transform_indices = @transform_1, window_bounds = array<i64: 1, 512>}, {pipeline_mode = #tpu.pipeline_mode<synchronous>, transform_indices = @transform_2, window_bounds = array<i64: 1, 512>}, {transform_indices = @transform_3, window_bounds = array<i64: 8, 512>}]} {
    %c0 = arith.constant 0 : index
    %c0_0 = arith.constant 0 : index
    %0 = vector.load %arg1[%c0, %c0_0] : memref<8x512xf32, #tpu.memory_space<vmem>>, vector<8x512xf32>
    %c0_1 = arith.constant 0 : index
    %c0_2 = arith.constant 0 : index
    %1 = vector.load %arg2[%c0_1, %c0_2] : memref<1x512xf32, #tpu.memory_space<vmem>>, vector<1x512xf32>
    %2 = vector.broadcast %1 : vector<1x512xf32> to vector<8x512xf32>
    %3 = arith.mulf %0, %2 : vector<8x512xf32>
    %c0_3 = arith.constant 0 : index
    %c0_4 = arith.constant 0 : index
    %4 = vector.load %arg3[%c0_3, %c0_4] : memref<1x512xf32, #tpu.memory_space<vmem>>, vector<1x512xf32>
    %5 = vector.broadcast %4 : vector<1x512xf32> to vector<8x512xf32>
    %6 = arith.addf %3, %5 : vector<8x512xf32>
    %cst = arith.constant 0.000000e+00 : f32
    %7 = vector.broadcast %cst : f32 to vector<8x512xf32>
    %8 = arith.maximumf %6, %7 : vector<8x512xf32>
    %c0_5 = arith.constant 0 : index
    %c0_6 = arith.constant 0 : index
    %9 = vector.load %arg4[%c0_5, %c0_6] : memref<8x512xf32, #tpu.memory_space<vmem>>, vector<8x512xf32>
    tpu.vector_store %arg4[%c0_5, %c0_6], %8 {strides = array<i32>} : memref<8x512xf32, #tpu.memory_space<vmem>>, vector<8x512xf32>,
    return
  }
  func.func @transform_0(%arg0: i32) -> (i32, i32) {
    %c0_i32 = arith.constant 0 : i32
    %c0_i32_0 = arith.constant 0 : i32
    return %arg0, %c0_i32 : i32, i32
  }
  func.func @transform_1(%arg0: i32) -> (i32, i32) {
    %c0_i32 = arith.constant 0 : i32
    %c0_i32_0 = arith.constant 0 : i32
    %c0_i32_1 = arith.constant 0 : i32
    return %c0_i32, %c0_i32_0 : i32, i32
  }
  func.func @transform_2(%arg0: i32) -> (i32, i32) {
    %c0_i32 = arith.constant 0 : i32
    %c0_i32_0 = arith.constant 0 : i32
    %c0_i32_1 = arith.constant 0 : i32
    return %c0_i32, %c0_i32_0 : i32, i32
  }
  func.func @transform_3(%arg0: i32) -> (i32, i32) {
    %c0_i32 = arith.constant 0 : i32
    %c0_i32_0 = arith.constant 0 : i32
    return %arg0, %c0_i32 : i32, i32
  }
}

module attributes {stable_mosaic.version = 11 : i64} {
  func.func @_conv3x3_cout1_kernel(%arg0: i32, %arg1: i32, %arg2: i32, %arg3: memref<1x1x18x8xf32, #tpu.memory_space<vmem>>, %arg4: memref<1x3x1x8xf32, #tpu.memory_space<vmem>>, %arg5: memref<1x1xf32, #tpu.memory_space<vmem>>, %arg6: memref<1x1x16x1xf32, #tpu.memory_space<vmem>>) attributes {dimension_semantics = [#tpu.dimension_semantics<parallel>, #tpu.dimension_semantics<parallel>, #tpu.dimension_semantics<arbitrary>], iteration_bounds = array<i64: 2, 16, 3>, scalar_prefetch = 0 : i64, scratch_operands = 0 : i64, tpu.core_type = #tpu.core_type<tc>, window_params = [{transform_indices = @transform_0, window_bounds = array<i64: 1, 1, 18, 8>}, {transform_indices = @transform_1, window_bounds = array<i64: 1, 3, 1, 8>}, {pipeline_mode = #tpu.pipeline_mode<synchronous>, transform_indices = @transform_2, window_bounds = array<i64: 1, 1>}, {transform_indices = @transform_3, window_bounds = array<i64: 1, 1, 16, 1>}]} {
    %c0_i32 = arith.constant 0 : i32
    %0 = arith.cmpi eq, %arg2, %c0_i32 : i32
    %1 = arith.extui %0 : i1 to i32
    %c0_i32_0 = arith.constant 0 : i32
    %2 = arith.cmpi ne, %1, %c0_i32_0 : i32
    scf.if %2 {
      %cst_25 = arith.constant 0.000000e+00 : f32
      %37 = vector.broadcast %cst_25 : f32 to vector<1x1x16x1xf32>
      %c0_26 = arith.constant 0 : index
      %c0_27 = arith.constant 0 : index
      %c0_28 = arith.constant 0 : index
      %c0_29 = arith.constant 0 : index
      %38 = vector.load %arg6[%c0_26, %c0_27, %c0_28, %c0_29] : memref<1x1x16x1xf32, #tpu.memory_space<vmem>>, vector<1x1x16x1xf32>
      tpu.vector_store %arg6[%c0_26, %c0_27, %c0_28, %c0_29], %37 {strides = array<i32>} : memref<1x1x16x1xf32, #tpu.memory_space<vmem>>, vector<1x1x16x1xf32>,
    } else {
    }
    %c0 = arith.constant 0 : index
    %c0_1 = arith.constant 0 : index
    %c0_2 = arith.constant 0 : index
    %c0_3 = arith.constant 0 : index
    %3 = vector.load %arg3[%c0, %c0_1, %c0_2, %c0_3] : memref<1x1x18x8xf32, #tpu.memory_space<vmem>>, vector<1x1x18x8xf32>
    %4 = vector.shape_cast %3 : vector<1x1x18x8xf32> to vector<18x8xf32>
    %c0_4 = arith.constant 0 : index
    %c0_5 = arith.constant 0 : index
    %c0_6 = arith.constant 0 : index
    %c0_7 = arith.constant 0 : index
    %5 = vector.load %arg6[%c0_4, %c0_5, %c0_6, %c0_7] : memref<1x1x16x1xf32, #tpu.memory_space<vmem>>, vector<1x1x16x1xf32>
    %6 = vector.shape_cast %5 : vector<1x1x16x1xf32> to vector<16x1xf32>
    %7 = vector.extract_strided_slice %4 {offsets = [0, 0], sizes = [16, 8], strides = [1, 1]} : vector<18x8xf32> to vector<16x8xf32>
    %c0_8 = arith.constant 0 : index
    %c0_9 = arith.constant 0 : index
    %c0_10 = arith.constant 0 : index
    %c0_11 = arith.constant 0 : index
    %8 = vector.load %arg4[%c0_8, %c0_9, %c0_10, %c0_11] : memref<1x3x1x8xf32, #tpu.memory_space<vmem>>, vector<1x1x1x8xf32>
    %9 = vector.shape_cast %8 : vector<1x1x1x8xf32> to vector<1x8xf32>
    %10 = vector.broadcast %9 : vector<1x8xf32> to vector<16x8xf32>
    %11 = arith.mulf %7, %10 : vector<16x8xf32>
    %cst = arith.constant dense<0.000000e+00> : vector<16xf32>
    %12 = vector.multi_reduction <add>, %11, %cst [1] : vector<16x8xf32> to vector<16xf32>
    %13 = vector.shape_cast %12 : vector<16xf32> to vector<16x1xf32>
    %14 = arith.addf %6, %13 : vector<16x1xf32>
    %15 = vector.extract_strided_slice %4 {offsets = [1, 0], sizes = [16, 8], strides = [1, 1]} : vector<18x8xf32> to vector<16x8xf32>
    %c0_12 = arith.constant 0 : index
    %c1 = arith.constant 1 : index
    %c0_13 = arith.constant 0 : index
    %c0_14 = arith.constant 0 : index
    %16 = vector.load %arg4[%c0_12, %c1, %c0_13, %c0_14] : memref<1x3x1x8xf32, #tpu.memory_space<vmem>>, vector<1x1x1x8xf32>
    %17 = vector.shape_cast %16 : vector<1x1x1x8xf32> to vector<1x8xf32>
    %18 = vector.broadcast %17 : vector<1x8xf32> to vector<16x8xf32>
    %19 = arith.mulf %15, %18 : vector<16x8xf32>
    %cst_15 = arith.constant dense<0.000000e+00> : vector<16xf32>
    %20 = vector.multi_reduction <add>, %19, %cst_15 [1] : vector<16x8xf32> to vector<16xf32>
    %21 = vector.shape_cast %20 : vector<16xf32> to vector<16x1xf32>
    %22 = arith.addf %14, %21 : vector<16x1xf32>
    %23 = vector.extract_strided_slice %4 {offsets = [2, 0], sizes = [16, 8], strides = [1, 1]} : vector<18x8xf32> to vector<16x8xf32>
    %c0_16 = arith.constant 0 : index
    %c2 = arith.constant 2 : index
    %c0_17 = arith.constant 0 : index
    %c0_18 = arith.constant 0 : index
    %24 = vector.load %arg4[%c0_16, %c2, %c0_17, %c0_18] : memref<1x3x1x8xf32, #tpu.memory_space<vmem>>, vector<1x1x1x8xf32>
    %25 = vector.shape_cast %24 : vector<1x1x1x8xf32> to vector<1x8xf32>
    %26 = vector.broadcast %25 : vector<1x8xf32> to vector<16x8xf32>
    %27 = arith.mulf %23, %26 : vector<16x8xf32>
    %cst_19 = arith.constant dense<0.000000e+00> : vector<16xf32>
    %28 = vector.multi_reduction <add>, %27, %cst_19 [1] : vector<16x8xf32> to vector<16xf32>
    %29 = vector.shape_cast %28 : vector<16xf32> to vector<16x1xf32>
    %30 = arith.addf %22, %29 : vector<16x1xf32>
    %c0_20 = arith.constant 0 : index
    %c0_21 = arith.constant 0 : index
    %c0_22 = arith.constant 0 : index
    %c0_23 = arith.constant 0 : index
    %31 = vector.load %arg6[%c0_20, %c0_21, %c0_22, %c0_23] : memref<1x1x16x1xf32, #tpu.memory_space<vmem>>, vector<1x1x16x1xf32>
    %32 = vector.shape_cast %31 : vector<1x1x16x1xf32> to vector<16x1xf32>
    %33 = vector.shape_cast %30 : vector<16x1xf32> to vector<1x1x16x1xf32>
    tpu.vector_store %arg6[%c0_20, %c0_21, %c0_22, %c0_23], %33 {strides = array<i32>} : memref<1x1x16x1xf32, #tpu.memory_space<vmem>>, vector<1x1x16x1xf32>,
    %c2_i32 = arith.constant 2 : i32
    %34 = arith.cmpi eq, %arg2, %c2_i32 : i32
    %35 = arith.extui %34 : i1 to i32
    %c0_i32_24 = arith.constant 0 : i32
    %36 = arith.cmpi ne, %35, %c0_i32_24 : i32
    scf.if %36 {
      %c0_25 = arith.constant 0 : index
      %c0_26 = arith.constant 0 : index
      %c0_27 = arith.constant 0 : index
      %c0_28 = arith.constant 0 : index
      %37 = vector.load %arg6[%c0_25, %c0_26, %c0_27, %c0_28] : memref<1x1x16x1xf32, #tpu.memory_space<vmem>>, vector<1x1x16x1xf32>
      %38 = vector.shape_cast %37 : vector<1x1x16x1xf32> to vector<16x1xf32>
      %c0_29 = arith.constant 0 : index
      %c0_30 = arith.constant 0 : index
      %39 = vector.load %arg5[%c0_29, %c0_30] : memref<1x1xf32, #tpu.memory_space<vmem>>, vector<1x1xf32>
      %40 = vector.broadcast %39 : vector<1x1xf32> to vector<16x1xf32>
      %41 = arith.addf %38, %40 : vector<16x1xf32>
      %c0_31 = arith.constant 0 : index
      %c0_32 = arith.constant 0 : index
      %c0_33 = arith.constant 0 : index
      %c0_34 = arith.constant 0 : index
      %42 = vector.load %arg6[%c0_31, %c0_32, %c0_33, %c0_34] : memref<1x1x16x1xf32, #tpu.memory_space<vmem>>, vector<1x1x16x1xf32>
      %43 = vector.shape_cast %42 : vector<1x1x16x1xf32> to vector<16x1xf32>
      %44 = vector.shape_cast %41 : vector<16x1xf32> to vector<1x1x16x1xf32>
      tpu.vector_store %arg6[%c0_31, %c0_32, %c0_33, %c0_34], %44 {strides = array<i32>} : memref<1x1x16x1xf32, #tpu.memory_space<vmem>>, vector<1x1x16x1xf32>,
    } else {
    }
    return
  }
  func.func @transform_0(%arg0: i32, %arg1: i32, %arg2: i32) -> (i32, i32, i32, i32) {
    %0 = arith.addi %arg1, %arg2 : i32
    %c0_i32 = arith.constant 0 : i32
    %c0_i32_0 = arith.constant 0 : i32
    %c0_i32_1 = arith.constant 0 : i32
    return %arg0, %0, %c0_i32, %c0_i32_0 : i32, i32, i32, i32
  }
  func.func @transform_1(%arg0: i32, %arg1: i32, %arg2: i32) -> (i32, i32, i32, i32) {
    %c0_i32 = arith.constant 0 : i32
    %c0_i32_0 = arith.constant 0 : i32
    %c0_i32_1 = arith.constant 0 : i32
    %c0_i32_2 = arith.constant 0 : i32
    return %arg2, %c0_i32, %c0_i32_0, %c0_i32_1 : i32, i32, i32, i32
  }
  func.func @transform_2(%arg0: i32, %arg1: i32, %arg2: i32) -> (i32, i32) {
    %c0_i32 = arith.constant 0 : i32
    %c0_i32_0 = arith.constant 0 : i32
    %c0_i32_1 = arith.constant 0 : i32
    return %c0_i32, %c0_i32_0 : i32, i32
  }
  func.func @transform_3(%arg0: i32, %arg1: i32, %arg2: i32) -> (i32, i32, i32, i32) {
    %c0_i32 = arith.constant 0 : i32
    %c0_i32_0 = arith.constant 0 : i32
    %c0_i32_1 = arith.constant 0 : i32
    return %arg0, %arg1, %c0_i32, %c0_i32_0 : i32, i32, i32, i32
  }
}

</mosaic_0001>

<bundles_post_ra>
// kernel: fcrn_ecml_forward.29
= control target key start
LH: loop header
LB: loop body
LE: loop exit
PB: predicated region body
PF: predicated region fallthrough
CT: control target
= control target key end

     0   :  { %s566_s9 = smov 0   ;;  %s568_s10 = smov 0   ;;  %s657_s0 = inlined_call_operand.vmem [shape: f32[2,18,18,1], index: 0, kind: input, shape index: {}]   ;;  %s658_s1 = inlined_call_operand.vmem [shape: f32[3,3,1,8], index: 1, kind: input, shape index: {}]   ;;  %s659_s2 = inlined_call_operand.vmem [shape: f32[2,16,16,8], index: 2, kind: output, shape index: {}]  }
   0x1   :  { %s570_s11 = smov 0   ;;  %s572_s12 = smov 0  }
   0x2   :  { %s574_s13 = smov 0   ;;  %s576_s14 = smov 0  }
   0x3   :  { %s578_s15 = smov 0  }
   0x4 LB: > { %s24_s16 = sadd.s32 1, %s535_s12  ;;  %s27_s17 = sadd.s32 1, %s539_s13  ;;  %s547_s15 = sphi %s578_s15, %s12_s15   ;;  %s543_s14 = sphi %s576_s14, %s665_s14   ;;  %s539_s13 = sphi %s574_s13, %s664_s13   ;;  %s535_s12 = sphi %s572_s12, %s663_s12   ;;  %s531_s11 = sphi %s570_s11, %s662_s11   ;;  %s527_s10 = sphi %s568_s10, %s661_s10   ;;  %s523_s9 = sphi %s566_s9, %s660_s9  }
   0x5   : > { %p25_p0 = scmp.ge.s32.totalorder %s24_s16, 3  ;;  %p417_p1 = scmp.ge.s32.totalorder %s547_s15, 1 }
   0x6   : > { %p152_p2 = scmp.lt.s32.totalorder %s547_s15, 97  ;;  %s31_s18 = sadd.s32 1, %s543_s14 }
   0x7   : > { %s667_s16 = smov (%p25_p0, %s24_s16), 0  ;;  %s669_s17 = smov (!%p25_p0, %s27_s17), %s539_s13 }
   0x8   : > { %p153_p3 = pnand %p417_p1, %p152_p2  ;;  %p29_p4 = scmp.ge.s32.totalorder %s669_s17, 16 }
   0x9   : > { %s187_s19 = sadd.s32 (!%p153_p3), %s523_s9, %s527_s10  ;;  %p188_p6 = scmp.lt.s32.totalorder (!%p153_p3), %s531_s11, 1 }
   0xa   : > { %s671_s17 = smov (%p29_p4, %s669_s17), 0  ;;  %s673_s18 = smov (!%p29_p4, %s31_s18), %s543_s14 }
   0xb   : > { %p33_p5 = scmp.ge.s32.totalorder %s673_s18, 2  ;;  %156 = sbr.rel (%p153_p3) target bundleno = 171 (0xab), region = 28 }
   0xc   : > { %p190_p7 = scmp.lt.s32.totalorder (!%p153_p3), %s187_s19, 17  ;;  %p198_p8 = scmp.lt.s32.totalorder (!%p153_p3), %s523_s9, 2 }
   0xd   : > { %s675_s18 = smov (%p33_p5, %s673_s18), 0  ;;  %p204_p9 = scmp.lt.s32.totalorder (!%p153_p3), %s527_s10, 15 }
   0xe   : > { %p422_p10 = scmp.ne.s32.totalorder (!%p153_p3), %s523_s9, 0 }
  0x10   : > { %s677_s11 = smov (!%p188_p6, %s531_s11), 1  ;;  %s679_s19 = smov (!%p190_p7, %s187_s19), 17 }
  0x11   : > { %s431_s20 = smul.u32 54, %s677_s11  ;;  %s420_s4 = sshll.u32 %s677_s11, 5 }
  0x12   : > { %s430_s21 = smul.u32 3, %s679_s19  ;;  %s681_s10 = smov (!%p204_p9, %s527_s10), 15 }
  0x13   : > { %s199_s22 = scalar_select %p198_p8, %s523_s9, 2 }
  0x14   : > { %s194_s23 = sadd.s32 %s431_s20, %s430_s21  ;;  %s419_s5 = sshll.u32 %s681_s10, 1 }
  0x15   : > { %s418_s24 = sshll.u32 %s194_s23, 3  ;;  %s432_s25 = smul.u32 3, %s199_s22 }
  0x16   : > { %s196_s28 = scalar_lea.vmem %s657_s0, %s418_s24  ;;  %s208_s6 = sadd.s32 %s420_s4, %s419_s5 }
  0x17   : > { %s201_s3 = scalar_lea.vmem %s658_s1, %s432_s25  ;;  %s421_s7 = sshll.u32 %s208_s6, 3 }
  0x18   : > { %s627_s20 = scalar_lea.vmem %s659_s2, %s421_s7  ;;  %214 = sbr.rel (%p422_p10) target bundleno = 31 (0x1f), region = 32 }
  0x1d   : > { %vm215_vm0 = vcmask 64512   ;;  %v549_v0 = vmov 0.0  }
  0x1e   : > { %216 = vst.msk [vmem:[%s627_s20] sm:$0xff] %vm215_vm0, %v549_v0  ;;  %217 = vst.msk [vmem:[%s627_s20 + $0x8] sm:$0xff] %vm215_vm0, %v549_v0 }
  0x1f PF: > { %v218_v1 = vld [vmem:[%s196_s28] sm:$0xff]  ;;  %v220_v2 = vld [vmem:[%s196_s28 + $0x10] sm:$0x3]  ;;  %v550_v3 = vmov 0   ;;  %v219_v4 = vld [vmem:[%s196_s28 + $0x8] sm:$0xff]  ;;  %vm263_vm1 = vcmask 1046528  }
  0x20   : > { %491 = vset.pattern.permute.xlu0 %v550_v3  ;;  %492 = vset.pattern.permute.xlu1 %v550_v3  ;;  %v425_v5 = vld [vmem:[%s201_s3 + $0x1] ss:$0 sm:$0xff]  ;;  %v427_v8 = vld [vmem:[%s201_s3 + $0x2] ss:$0 sm:$0xff]  ;;  %v423_v10 = vld [vmem:[%s201_s3] ss:$0 sm:$0xff] }
  0x21   : > { %226 = vperm.xlu0 %491, %v218_v1   ;;  %248 = vperm.xlu1 %492, %v220_v2   ;;  %vm287_vm2 = vcmask 1045504   ;;  %vm297_vm3 = vcmask 64512  }
  0x25   : > { %231 = vperm.xlu0 %491, %v219_v4   ;;  %v222_v14 = vld [vmem:[%s627_s20 + $0x8] sm:$0xff]  ;;  %v221_v18 = vld [vmem:[%s627_s20] sm:$0xff] }
  0x9c   : > { %v227_v6 = vpop.permute.xlu0 %226  ;;  %v249_v7 = vpop.permute.xlu1 %248 }
  0x9d   : > { %v259_v9 = vmul.f32 %v425_v5, %v249_v7  ;;  %v257_v11 = vmul.f32 %v425_v5, %v227_v6  ;;  %v283_v12 = vmul.f32 %v427_v8, %v249_v7  ;;  %v281_v13 = vmul.f32 %v427_v8, %v227_v6 }
  0x9e   : > { %v240_v15 = vmul.f32 %v423_v10, %v227_v6 }
  0x9f   : > { %v267_v17 = vrot.slane %v259_v9, 1  ;;  %v264_v22 = vrot.slane %v257_v11, 1  ;;  %v291_v23 = vrot.slane %v283_v12, 2  ;;  %v288_v28 = vrot.slane %v281_v13, 2 }
  0xa0   : > { %v232_v16 = vpop.permute.xlu0 %231  ;;  %v242_v27 = vadd.f32 %v240_v15, %v221_v18 }
  0xa1   : > { %v241_v19 = vmul.f32 %v423_v10, %v232_v16  ;;  %v258_v20 = vmul.f32 %v425_v5, %v232_v16  ;;  %v282_v21 = vmul.f32 %v427_v8, %v232_v16 }
  0xa3   : > { %v243_v24 = vadd.f32 %v241_v19, %v222_v14  ;;  %v265_v25 = vrot.slane %v258_v20, 1  ;;  %v289_v26 = vrot.slane %v282_v21, 2 }
  0xa5   : > { %v266_v29 = vsel %vm263_vm1, %v264_v22, %v265_v25  ;;  %v268_v30 = vsel %vm263_vm1, %v265_v25, %v267_v17  ;;  %v290_v33 = vsel %vm287_vm2, %v288_v28, %v289_v26  ;;  %v292_v34 = vsel %vm287_vm2, %v289_v26, %v291_v23 }
  0xa6   : > { %v271_v31 = vadd.f32 %v266_v29, %v242_v27  ;;  %v272_v32 = vadd.f32 %v268_v30, %v243_v24 }
  0xa8   : > { %v295_v35 = vadd.f32 %v290_v33, %v271_v31  ;;  %v296_v36 = vadd.f32 %v292_v34, %v272_v32 }
  0xaa   : > { %298 = vst.msk [vmem:[%s627_s20] sm:$0xff] %vm297_vm3, %v295_v35  ;;  %299 = vst.msk [vmem:[%s627_s20 + $0x8] sm:$0xff] %vm297_vm3, %v296_v36 }
  0xab PF: > { %s12_s15 = sadd.s32 1, %s547_s15   ;;  %s660_s9 = smov %s535_s12 }
  0xac   : > { %p9_p11 = scmp.ge.s32.totalorder %s12_s15, 98   ;;  %s661_s10 = smov %s539_s13 }
  0xad   : > { %s662_s11 = smov %s543_s14  ;;  %s663_s12 = smov %s667_s16 }
  0xae   : > { %s664_s13 = smov %s671_s17  ;;  %s665_s14 = smov %s675_s18 }
  0xaf   :  { %11 = sbr.rel (!%p9_p11) target bundleno = 4 (0x4), region = 67 }

// kernel: fcrn_ecml_forward.30
= control target key start
LH: loop header
LB: loop body
LE: loop exit
PB: predicated region body
PF: predicated region fallthrough
CT: control target
= control target key end

     0   :  { %v12_v0 = vlaneseq  ;;  %v87_v9 = vmov 0.0   ;;  %v88_v11 = vmov 1966171168   ;;  %s128_s0 = inlined_call_operand.vmem [shape: f32[8,512], index: 0, kind: input, shape index: {}]   ;;  %s129_s1 = inlined_call_operand.vmem [shape: f32[1,512], index: 1, kind: output, shape index: {}]  }
   0x1   :  { %v18_v1 = vld [vmem:[%s128_s0] sm:$0xff]  ;;  %v19_v2 = vld [vmem:[%s128_s0 + $0x8] sm:$0xff]  ;;  %v20_v3 = vld [vmem:[%s128_s0 + $0x10] sm:$0xff]  ;;  %v53_v12 = vunpack.c.l.s4 %v88_v11 }
   0x2   :  { %vm108_vm0 = vcmp.lt.s32.totalorder %v12_v0, 512  ;;  %v21_v5 = vld [vmem:[%s128_s0 + $0x18] sm:$0xff]  ;;  %v22_v6 = vrot.slane %v18_v1, 4  ;;  %v28_v7 = vrot.slane %v19_v2, 4  ;;  %v34_v8 = vrot.slane %v20_v3, 4 }
   0x3   :  { %16 = vst.msk [vmem:[%s129_s1] sm:$0xf] %vm108_vm0, %v87_v9  ;;  %v40_v10 = vrot.slane %v21_v5, 4  ;;  %v54_v21 = vunpack.c.0.s8 %v53_v12  ;;  %v56_v25 = vshrl.u32 %v12_v0, 7 }
   0x4   :  { %v23_v13 = vadd.f32 %v22_v6, %v18_v1  ;;  %v29_v14 = vadd.f32 %v28_v7, %v19_v2  ;;  %v35_v15 = vadd.f32 %v34_v8, %v20_v3 }
   0x5   :  { %v41_v16 = vadd.f32 %v40_v10, %v21_v5  ;;  %v57_v34 = vsub.s32 %v54_v21, %v56_v25 }
   0x6   :  { %v24_v17 = vrot.slane %v23_v13, 2  ;;  %v30_v18 = vrot.slane %v29_v14, 2  ;;  %v36_v19 = vrot.slane %v35_v15, 2 }
   0x7   :  { %v42_v20 = vrot.slane %v41_v16, 2 }
   0x8   :  { %v25_v22 = vadd.f32 %v24_v17, %v23_v13  ;;  %v31_v23 = vadd.f32 %v30_v18, %v29_v14  ;;  %v37_v24 = vadd.f32 %v36_v19, %v35_v15 }
   0x9   :  { %v43_v26 = vadd.f32 %v42_v20, %v41_v16 }
   0xa   :  { %v26_v27 = vrot.slane %v25_v22, 1  ;;  %v32_v28 = vrot.slane %v31_v23, 1  ;;  %v38_v29 = vrot.slane %v37_v24, 1  ;;  %v17_v41 = vld [vmem:[%s129_s1] sm:$0xf] }
   0xb   :  { %v44_v30 = vrot.slane %v43_v26, 1 }
   0xc   :  { %v27_v31 = vadd.f32 %v26_v27, %v25_v22  ;;  %v33_v32 = vadd.f32 %v32_v28, %v31_v23  ;;  %v39_v33 = vadd.f32 %v38_v29, %v37_v24 }
   0xd   :  { %v45_v35 = vadd.f32 %v44_v30, %v43_v26 }
   0xe   :  { %v50_v36 = vcombine.low %v27_v31, %v33_v32 }
   0xf   :  { %v51_v37 = vcombine.low %v39_v33, %v45_v35 }
  0x10   :  { %v58_v38 = vrot.slane %v50_v36, %v57_v34 }
  0x11   :  { %v65_v39 = vrot.slane %v51_v37, %v57_v34 }
  0x13   :  { %v66_v40 = vcombine.low %v58_v38, %v65_v39 }
  0x15   :  { %v73_v42 = vrot.slane %v66_v40, %v57_v34 }
  0x17   :  { %v75_v43 = vadd.f32 %v73_v42, %v17_v41 }
  0x19   :  { %80 = vst.msk [vmem:[%s129_s1] sm:$0xf] %vm108_vm0, %v75_v43 }

// kernel: fcrn_ecml_forward.31
= control target key start
LH: loop header
LB: loop body
LE: loop exit
PB: predicated region body
PF: predicated region fallthrough
CT: control target
= control target key end

     0   :  { %v15_v0 = vlaneseq  ;;  %v120_v3 = vmov 0.0   ;;  %v121_v29 = vmov 1966171168   ;;  %s169_s1 = inlined_call_operand.vmem [shape: f32[1,512], index: 1, kind: input, shape index: {}]   ;;  %s170_s2 = inlined_call_operand.vmem [shape: f32[1,512], index: 2, kind: output, shape index: {}]   ;;  %s171_s0 = inlined_call_operand.vmem [shape: f32[8,512], index: 0, kind: input, shape index: {}]  }
   0x1   :  { %v24_v4 = vld [vmem:[%s169_s1] sm:$0xf]  ;;  %v21_v10 = vld [vmem:[%s171_s0 + $0x8] sm:$0xff]  ;;  %v22_v11 = vld [vmem:[%s171_s0 + $0x10] sm:$0xff]  ;;  %v86_v30 = vunpack.c.l.s4 %v121_v29 }
   0x2   :  { %vm137_vm0 = vcmp.lt.s32.totalorder %v15_v0, 512  ;;  %v27_v2 = vshrl.u32 %v15_v0, 7  ;;  %v20_v5 = vld [vmem:[%s171_s0] sm:$0xff]  ;;  %v23_v12 = vld [vmem:[%s171_s0 + $0x18] sm:$0xff] }
   0x3   :  { %19 = vst.msk [vmem:[%s170_s2] sm:$0xf] %vm137_vm0, %v120_v3  ;;  %v87_v39 = vunpack.c.0.s8 %v86_v30 }
   0x4   :  { %v28_v6 = vsub.s32 0, %v27_v2  ;;  %v32_v7 = vsub.s32 1, %v27_v2  ;;  %v36_v8 = vsub.s32 2, %v27_v2  ;;  %v40_v9 = vsub.s32 3, %v27_v2 }
   0x5   :  { %v90_v48 = vsub.s32 %v87_v39, %v27_v2 }
   0x6   :  { %v29_v13 = vrot.slane %v24_v4, %v28_v6  ;;  %v33_v14 = vrot.slane %v24_v4, %v32_v7  ;;  %v37_v15 = vrot.slane %v24_v4, %v36_v8  ;;  %v41_v16 = vrot.slane %v24_v4, %v40_v9 }
   0x8   :  { %v46_v17 = vsub.f32 %v20_v5, %v29_v13  ;;  %v47_v18 = vsub.f32 %v21_v10, %v33_v14  ;;  %v48_v19 = vsub.f32 %v22_v11, %v37_v15  ;;  %v49_v20 = vsub.f32 %v23_v12, %v41_v16 }
   0xa   :  { %v51_v21 = vmul.f32 %v46_v17, %v46_v17  ;;  %v52_v22 = vmul.f32 %v47_v18, %v47_v18  ;;  %v53_v23 = vmul.f32 %v48_v19, %v48_v19  ;;  %v54_v24 = vmul.f32 %v49_v20, %v49_v20  ;;  %v50_v58 = vld [vmem:[%s170_s2] sm:$0xf] }
   0xc   :  { %v55_v25 = vrot.slane %v51_v21, 4  ;;  %v61_v26 = vrot.slane %v52_v22, 4  ;;  %v67_v27 = vrot.slane %v53_v23, 4  ;;  %v73_v28 = vrot.slane %v54_v24, 4 }
   0xe   :  { %v56_v31 = vadd.f32 %v55_v25, %v51_v21  ;;  %v62_v32 = vadd.f32 %v61_v26, %v52_v22  ;;  %v68_v33 = vadd.f32 %v67_v27, %v53_v23  ;;  %v74_v34 = vadd.f32 %v73_v28, %v54_v24 }
  0x10   :  { %v57_v35 = vrot.slane %v56_v31, 2  ;;  %v63_v36 = vrot.slane %v62_v32, 2  ;;  %v69_v37 = vrot.slane %v68_v33, 2  ;;  %v75_v38 = vrot.slane %v74_v34, 2 }
  0x12   :  { %v58_v40 = vadd.f32 %v57_v35, %v56_v31  ;;  %v64_v41 = vadd.f32 %v63_v36, %v62_v32  ;;  %v70_v42 = vadd.f32 %v69_v37, %v68_v33  ;;  %v76_v43 = vadd.f32 %v75_v38, %v74_v34 }
  0x14   :  { %v59_v44 = vrot.slane %v58_v40, 1  ;;  %v65_v45 = vrot.slane %v64_v41, 1  ;;  %v71_v46 = vrot.slane %v70_v42, 1  ;;  %v77_v47 = vrot.slane %v76_v43, 1 }
  0x16   :  { %v60_v49 = vadd.f32 %v59_v44, %v58_v40  ;;  %v66_v50 = vadd.f32 %v65_v45, %v64_v41  ;;  %v72_v51 = vadd.f32 %v71_v46, %v70_v42  ;;  %v78_v52 = vadd.f32 %v77_v47, %v76_v43 }
  0x18   :  { %v83_v53 = vcombine.low %v60_v49, %v66_v50  ;;  %v84_v54 = vcombine.low %v72_v51, %v78_v52 }
  0x1a   :  { %v91_v55 = vrot.slane %v83_v53, %v90_v48  ;;  %v98_v56 = vrot.slane %v84_v54, %v90_v48 }
  0x1c   :  { %v99_v57 = vcombine.low %v91_v55, %v98_v56 }
  0x1e   :  { %v106_v59 = vrot.slane %v99_v57, %v90_v48 }
  0x20   :  { %v108_v60 = vadd.f32 %v106_v59, %v50_v58 }
  0x22   :  { %113 = vst.msk [vmem:[%s170_s2] sm:$0xf] %vm137_vm0, %v108_v60 }

// kernel: fcrn_ecml_forward.32
= control target key start
LH: loop header
LB: loop body
LE: loop exit
PB: predicated region body
PF: predicated region fallthrough
CT: control target
= control target key end

     0   :  { %s439_s12 = smov 0   ;;  %s495_s0 = inlined_call_operand.vmem [shape: f32[16,2,8,2,8], index: 0, kind: input, shape index: {}]   ;;  %s496_s1 = inlined_call_operand.vmem [shape: f32[1,8], index: 1, kind: input, shape index: {}]   ;;  %s497_s2 = inlined_call_operand.vmem [shape: f32[1,8], index: 2, kind: input, shape index: {}]   ;;  %s498_s3 = inlined_call_operand.vmem [shape: f32[16,8,8], index: 3, kind: output, shape index: {}]  }
   0x1 LB: > { %s390_s13 = sadd.s32 4294967295, %s417_s12   ;;  %p394_p0 = scmp.ge.s32.totalorder %s417_s12, 1  ;;  %s417_s12 = sphi %s439_s12, %s13_s12  }
   0x2   : > { %p137_p1 = scmp.lt.s32.totalorder %s417_s12, 17 }
   0x4   : > { %p138_p2 = pnand %p394_p0, %p137_p1 }
   0x5   : > { %p160_p3 = scmp.lt.s32.totalorder (!%p138_p2), %s390_s13, 15 }
   0x6   : > { %141 = sbr.rel (%p138_p2) target bundleno = 50 (0x32), region = 32 }
   0xb   : > { %s500_s13 = smov (!%p160_p3, %s390_s13), 15  ;;  %v398_v0 = vld [vmem:[%s496_s1] ss:$0 sm:$0xff]  ;;  %vm255_vm0 = vcmask 58368   ;;  %vm320_vm1 = vcmask 1041409   ;;  %vm322_vm2 = vcmask 1042434  }
   0xc   : > { %s402_s14 = sshll.u32 %s500_s13, 5  ;;  %v399_v1 = vld [vmem:[%s497_s2] ss:$0 sm:$0xff]  ;;  %vm324_vm3 = vcmask 1043459   ;;  %vm326_vm4 = vcmask 1044484   ;;  %s397_s22 = sshll.u32 %s500_s13, 3 }
   0xd   : > { %s456_s19 = scalar_lea.vmem %s495_s0, %s402_s14  ;;  %vm328_vm5 = vcmask 1045509   ;;  %vm330_vm6 = vcmask 1046534   ;;  %vm332_vm7 = vcmask 1047559   ;;  %s168_s25 = scalar_lea.vmem %s498_s3, %s397_s22  ;;  %vm335_vm8 = vcmask 64512  }
   0xe   : > { %v169_v2 = vld [vmem:[%s456_s19] sm:$0x3]  ;;  %v170_v3 = vld [vmem:[%s456_s19 + $0x2] sm:$0x3]  ;;  %v171_v4 = vld [vmem:[%s456_s19 + $0x4] sm:$0x3] }
   0xf   : > { %v172_v5 = vld [vmem:[%s456_s19 + $0x6] sm:$0x3]  ;;  %v173_v6 = vld [vmem:[%s456_s19 + $0x8] sm:$0x3]  ;;  %v174_v7 = vld [vmem:[%s456_s19 + $0xa] sm:$0x3]  ;;  %v192_v8 = vmul.f32 %v398_v0, %v169_v2  ;;  %v193_v9 = vmul.f32 %v398_v0, %v170_v3  ;;  %v194_v10 = vmul.f32 %v398_v0, %v171_v4 }
  0x10   : > { %v175_v11 = vld [vmem:[%s456_s19 + $0xc] sm:$0x3]  ;;  %v176_v12 = vld [vmem:[%s456_s19 + $0xe] sm:$0x3]  ;;  %v177_v13 = vld [vmem:[%s456_s19 + $0x10] sm:$0x3]  ;;  %v195_v14 = vmul.f32 %v398_v0, %v172_v5  ;;  %v196_v15 = vmul.f32 %v398_v0, %v173_v6  ;;  %v197_v16 = vmul.f32 %v398_v0, %v174_v7 }
  0x11   : > { %v178_v17 = vld [vmem:[%s456_s19 + $0x12] sm:$0x3]  ;;  %v179_v18 = vld [vmem:[%s456_s19 + $0x14] sm:$0x3]  ;;  %v180_v19 = vld [vmem:[%s456_s19 + $0x16] sm:$0x3]  ;;  %v198_v20 = vmul.f32 %v398_v0, %v175_v11  ;;  %v199_v21 = vmul.f32 %v398_v0, %v176_v12  ;;  %v200_v22 = vmul.f32 %v398_v0, %v177_v13  ;;  %v215_v23 = vadd.f32 %v399_v1, %v192_v8 }
  0x12   : > { %v181_v24 = vld [vmem:[%s456_s19 + $0x18] sm:$0x3]  ;;  %v182_v25 = vld [vmem:[%s456_s19 + $0x1a] sm:$0x3]  ;;  %v183_v26 = vld [vmem:[%s456_s19 + $0x1c] sm:$0x3]  ;;  %v201_v27 = vmul.f32 %v398_v0, %v178_v17  ;;  %v202_v28 = vmul.f32 %v398_v0, %v179_v18  ;;  %v203_v29 = vmul.f32 %v398_v0, %v180_v19  ;;  %v216_v30 = vadd.f32 %v399_v1, %v193_v9 }
  0x13   : > { %v184_v31 = vld [vmem:[%s456_s19 + $0x1e] sm:$0x3]  ;;  %v204_v32 = vmul.f32 %v398_v0, %v181_v24  ;;  %v205_v33 = vmul.f32 %v398_v0, %v182_v25  ;;  %v206_v34 = vmul.f32 %v398_v0, %v183_v26  ;;  %v217_v35 = vadd.f32 %v399_v1, %v194_v10 }
  0x14   : > { %v207_v36 = vmul.f32 %v398_v0, %v184_v31  ;;  %v218_v37 = vadd.f32 %v399_v1, %v195_v14  ;;  %v219_v38 = vadd.f32 %v399_v1, %v196_v15  ;;  %v220_v39 = vadd.f32 %v399_v1, %v197_v16 }
  0x15   : > { %v221_v40 = vadd.f32 %v399_v1, %v198_v20  ;;  %v222_v41 = vadd.f32 %v399_v1, %v199_v21  ;;  %v223_v42 = vadd.f32 %v399_v1, %v200_v22  ;;  %v224_v43 = vadd.f32 %v399_v1, %v201_v27 }
  0x16   : > { %v225_v44 = vadd.f32 %v399_v1, %v202_v28  ;;  %v226_v45 = vadd.f32 %v399_v1, %v203_v29  ;;  %v227_v46 = vadd.f32 %v399_v1, %v204_v32  ;;  %v228_v47 = vadd.f32 %v399_v1, %v205_v33 }
  0x17   : > { %v229_v48 = vadd.f32 %v399_v1, %v206_v34  ;;  %v230_v49 = vadd.f32 %v399_v1, %v207_v36  ;;  %v231_v50 = vmax.f32 %v215_v23, 0.0  ;;  %v232_v51 = vmax.f32 %v216_v30, 0.0 }
  0x18   : > { %v233_v52 = vmax.f32 %v217_v35, 0.0  ;;  %v234_v53 = vmax.f32 %v218_v37, 0.0  ;;  %v235_v54 = vmax.f32 %v219_v38, 0.0  ;;  %v236_v55 = vmax.f32 %v220_v39, 0.0 }
  0x19   : > { %v237_v56 = vmax.f32 %v221_v40, 0.0  ;;  %v238_v57 = vmax.f32 %v222_v41, 0.0  ;;  %v239_v58 = vmax.f32 %v223_v42, 0.0  ;;  %v240_v59 = vmax.f32 %v224_v43, 0.0 }
  0x1a   : > { %v241_v60 = vmax.f32 %v225_v44, 0.0  ;;  %v242_v61 = vmax.f32 %v226_v45, 0.0  ;;  %v243_v62 = vmax.f32 %v227_v46, 0.0  ;;  %v244_v63 = vmax.f32 %v228_v47, 0.0 }
  0x1b   : > { %v245_v0 = vmax.f32 %v229_v48, 0.0  ;;  %v246_v2 = vmax.f32 %v230_v49, 0.0  ;;  %v247_v3 = vmax.f32 %v231_v50, %v239_v58  ;;  %v248_v4 = vmax.f32 %v232_v51, %v240_v59 }
  0x1c   : > { %v249_v5 = vmax.f32 %v233_v52, %v241_v60  ;;  %v250_v1 = vmax.f32 %v234_v53, %v242_v61  ;;  %v251_v6 = vmax.f32 %v235_v54, %v243_v62  ;;  %v252_v7 = vmax.f32 %v236_v55, %v244_v63 }
  0x1d   : > { %v253_v8 = vmax.f32 %v237_v56, %v245_v0  ;;  %v254_v9 = vmax.f32 %v238_v57, %v246_v2  ;;  %v256_v10 = vsel %vm255_vm0, %v247_v3, -inf  ;;  %v263_v11 = vsel %vm255_vm0, %v248_v4, -inf }
  0x1e   : > { %v257_v12 = vrot.slane %v256_v10, 4  ;;  %v264_v13 = vrot.slane %v263_v11, 4  ;;  %v270_v14 = vsel %vm255_vm0, %v249_v5, -inf  ;;  %v277_v15 = vsel %vm255_vm0, %v250_v1, -inf }
  0x1f   : > { %v271_v16 = vrot.slane %v270_v14, 4  ;;  %v278_v17 = vrot.slane %v277_v15, 4  ;;  %v284_v18 = vsel %vm255_vm0, %v251_v6, -inf  ;;  %v291_v19 = vsel %vm255_vm0, %v252_v7, -inf }
  0x20   : > { %v258_v20 = vmax.f32 %v256_v10, %v257_v12  ;;  %v265_v21 = vmax.f32 %v263_v11, %v264_v13  ;;  %v285_v22 = vrot.slane %v284_v18, 4  ;;  %v292_v23 = vrot.slane %v291_v19, 4 }
  0x21   : > { %v272_v24 = vmax.f32 %v270_v14, %v271_v16  ;;  %v279_v25 = vmax.f32 %v277_v15, %v278_v17  ;;  %v298_v26 = vsel %vm255_vm0, %v253_v8, -inf  ;;  %v305_v27 = vsel %vm255_vm0, %v254_v9, -inf }
  0x22   : > { %v259_v28 = vrot.slane %v258_v20, 2  ;;  %v266_v29 = vrot.slane %v265_v21, 2  ;;  %v286_v30 = vmax.f32 %v284_v18, %v285_v22  ;;  %v293_v31 = vmax.f32 %v291_v19, %v292_v23 }
  0x23   : > { %v273_v32 = vrot.slane %v272_v24, 2  ;;  %v280_v33 = vrot.slane %v279_v25, 2  ;;  %v299_v34 = vrot.slane %v298_v26, 4  ;;  %v306_v35 = vrot.slane %v305_v27, 4 }
  0x24   : > { %v260_v36 = vmax.f32 %v258_v20, %v259_v28  ;;  %v267_v37 = vmax.f32 %v265_v21, %v266_v29  ;;  %v287_v38 = vrot.slane %v286_v30, 2  ;;  %v294_v39 = vrot.slane %v293_v31, 2 }
  0x25   : > { %v274_v40 = vmax.f32 %v272_v24, %v273_v32  ;;  %v281_v41 = vmax.f32 %v279_v25, %v280_v33  ;;  %v300_v42 = vmax.f32 %v298_v26, %v299_v34  ;;  %v307_v43 = vmax.f32 %v305_v27, %v306_v35 }
  0x26   : > { %v261_v44 = vrot.slane %v260_v36, 1  ;;  %v268_v45 = vrot.slane %v267_v37, 1  ;;  %v288_v46 = vmax.f32 %v286_v30, %v287_v38  ;;  %v295_v47 = vmax.f32 %v293_v31, %v294_v39 }
  0x27   : > { %v275_v48 = vrot.slane %v274_v40, 1  ;;  %v282_v49 = vrot.slane %v281_v41, 1  ;;  %v301_v50 = vrot.slane %v300_v42, 2  ;;  %v308_v51 = vrot.slane %v307_v43, 2 }
  0x28   : > { %v262_v52 = vmax.f32 %v260_v36, %v261_v44  ;;  %v269_v53 = vmax.f32 %v267_v37, %v268_v45  ;;  %v289_v54 = vrot.slane %v288_v46, 1  ;;  %v296_v55 = vrot.slane %v295_v47, 1 }
  0x29   : > { %v276_v56 = vmax.f32 %v274_v40, %v275_v48  ;;  %v283_v57 = vmax.f32 %v281_v41, %v282_v49  ;;  %v302_v58 = vmax.f32 %v300_v42, %v301_v50  ;;  %v309_v59 = vmax.f32 %v307_v43, %v308_v51 }
  0x2a   : > { %v290_v60 = vmax.f32 %v288_v46, %v289_v54  ;;  %v297_v61 = vmax.f32 %v295_v47, %v296_v55  ;;  %v321_v62 = vsel %vm320_vm1, %v269_v53, %v262_v52 }
  0x2b   : > { %v303_v63 = vrot.slane %v302_v58, 1  ;;  %v310_v0 = vrot.slane %v309_v59, 1  ;;  %v323_v2 = vsel %vm322_vm2, %v276_v56, %v321_v62 }
  0x2c   : > { %v325_v3 = vsel %vm324_vm3, %v283_v57, %v323_v2 }
  0x2d   : > { %v304_v4 = vmax.f32 %v302_v58, %v303_v63  ;;  %v311_v5 = vmax.f32 %v309_v59, %v310_v0  ;;  %v327_v1 = vsel %vm326_vm4, %v290_v60, %v325_v3 }
  0x2e   : > { %v329_v6 = vsel %vm328_vm5, %v297_v61, %v327_v1 }
  0x2f   : > { %v331_v7 = vsel %vm330_vm6, %v304_v4, %v329_v6 }
  0x30   : > { %v333_v8 = vsel %vm332_vm7, %v311_v5, %v331_v7 }
  0x31   : > { %336 = vst.msk [vmem:[%s168_s25] sm:$0xff] %vm335_vm8, %v333_v8 }
  0x32 PF: > { %s13_s12 = sadd.s32 1, %s417_s12  }
  0x33   : > { %p10_p4 = scmp.ge.s32.totalorder %s13_s12, 18  }
  0x35   :  { %12 = sbr.rel (!%p10_p4) target bundleno = 1 (0x1), region = 62 }

// kernel: fcrn_ecml_forward.33
= control target key start
LH: loop header
LB: loop body
LE: loop exit
PB: predicated region body
PF: predicated region fallthrough
CT: control target
= control target key end

     0   :  { %s739_s9 = smov 0   ;;  %s741_s10 = smov 0   ;;  %s833_s0 = inlined_call_operand.vmem [shape: f32[2,10,10,8], index: 0, kind: input, shape index: {}]   ;;  %s834_s1 = inlined_call_operand.vmem [shape: f32[3,3,8,16], index: 1, kind: input, shape index: {}]   ;;  %s835_s2 = inlined_call_operand.vmem [shape: f32[2,8,8,16], index: 2, kind: output, shape index: {}]  }
   0x1   :  { %s743_s11 = smov 0   ;;  %s745_s12 = smov 0  }
   0x2   :  { %s747_s13 = smov 0   ;;  %s749_s14 = smov 0  }
   0x3   :  { %s751_s15 = smov 0  }
   0x4 LB: > { %s24_s16 = sadd.s32 1, %s707_s12  ;;  %s27_s17 = sadd.s32 1, %s711_s13  ;;  %s719_s15 = sphi %s751_s15, %s12_s15   ;;  %s715_s14 = sphi %s749_s14, %s841_s14   ;;  %s711_s13 = sphi %s747_s13, %s840_s13   ;;  %s707_s12 = sphi %s745_s12, %s839_s12   ;;  %s703_s11 = sphi %s743_s11, %s838_s11   ;;  %s699_s10 = sphi %s741_s10, %s837_s10   ;;  %s695_s9 = sphi %s739_s9, %s836_s9  }
   0x5   : > { %p25_p0 = scmp.ge.s32.totalorder %s24_s16, 3  ;;  %p569_p1 = scmp.ge.s32.totalorder %s719_s15, 1 }
   0x6   : > { %p153_p2 = scmp.lt.s32.totalorder %s719_s15, 49  ;;  %s31_s18 = sadd.s32 1, %s715_s14 }
   0x7   : > { %s843_s16 = smov (%p25_p0, %s24_s16), 0  ;;  %s845_s17 = smov (!%p25_p0, %s27_s17), %s711_s13 }
   0x8   : > { %p154_p3 = pnand %p569_p1, %p153_p2  ;;  %p29_p4 = scmp.ge.s32.totalorder %s845_s17, 8 }
   0x9   : > { %s188_s19 = sadd.s32 (!%p154_p3), %s695_s9, %s699_s10  ;;  %p189_p6 = scmp.lt.s32.totalorder (!%p154_p3), %s703_s11, 1 }
   0xa   : > { %s847_s17 = smov (%p29_p4, %s845_s17), 0  ;;  %s849_s18 = smov (!%p29_p4, %s31_s18), %s715_s14 }
   0xb   : > { %p33_p5 = scmp.ge.s32.totalorder %s849_s18, 2  ;;  %157 = sbr.rel (%p154_p3) target bundleno = 233 (0xe9), region = 28 }
   0xc   : > { %p191_p7 = scmp.lt.s32.totalorder (!%p154_p3), %s188_s19, 9  ;;  %p199_p8 = scmp.lt.s32.totalorder (!%p154_p3), %s695_s9, 2 }
   0xd   : > { %s851_s18 = smov (%p33_p5, %s849_s18), 0  ;;  %p206_p9 = scmp.lt.s32.totalorder (!%p154_p3), %s699_s10, 7 }
   0xe   : > { %p575_p10 = scmp.ne.s32.totalorder (!%p154_p3), %s695_s9, 0 }
  0x10   : > { %s853_s11 = smov (!%p189_p6, %s703_s11), 1  ;;  %s855_s19 = smov (!%p191_p7, %s188_s19), 9 }
  0x11   : > { %s604_s20 = smul.u32 20, %s853_s11  ;;  %s570_s21 = sshll.u32 %s855_s19, 1 }
  0x12   : > { %s573_s27 = sshll.u32 %s853_s11, 3  ;;  %s857_s10 = smov (!%p206_p9, %s699_s10), 7 }
  0x13   : > { %s195_s22 = sadd.s32 %s604_s20, %s570_s21  ;;  %s209_s30 = sadd.s32 %s573_s27, %s857_s10 }
  0x14   : > { %s571_s23 = sshll.u32 %s195_s22, 3  ;;  %s574_s6 = sshll.u32 %s209_s30, 3 }
  0x15   : > { %s197_s26 = scalar_lea.vmem %s833_s0, %s571_s23  ;;  %s800_s19 = scalar_lea.vmem %s835_s2, %s574_s6 }
  0x16   : > { %s200_s28 = scalar_select %p199_p8, %s695_s9, 2 }
  0x17   : > { %215 = sbr.rel (%p575_p10) target bundleno = 30 (0x1e), region = 32 }
  0x18   : > { %s605_s29 = smul.u32 24, %s200_s28 }
  0x1a   : > { %s203_s5 = scalar_lea.vmem %s834_s1, %s605_s29 }
  0x1c   : > { %vm216_vm0 = vcmask 130048   ;;  %v721_v0 = vmov 0.0  }
  0x1d   : > { %217 = vst.msk [vmem:[%s800_s19] sm:$0xff] %vm216_vm0, %v721_v0 }
  0x1e PF: > { %v221_v1 = vld [vmem:[%s203_s5] sm:$0xff]  ;;  %vm222_vm1 = vcmask 64512   ;;  %v577_v3 = vld [vmem:[%s203_s5 + $0x8] sm:$0xff]  ;;  %v722_v4 = vmov 0.0   ;;  %vm723_vm2 = vmmov 0   ;;  %vm300_vm3 = vcmask 1046528  }
  0x1f   : > { %v218_v2 = vld [vmem:[%s197_s26] sm:$0xff]  ;;  %589 = vmatprep.subr.mxu0 %v722_v4  ;;  %591 = vmatprep.mubr.msk.f32.mxu0 %vm723_vm2, %v722_v4  ;;  %v219_v7 = vld [vmem:[%s197_s26 + $0x8] sm:$0x3]  ;;  %v579_v10 = vld [vmem:[%s203_s5 + $0x10] sm:$0xff]  ;;  %vm379_vm4 = vcmask 1045504   ;;  %vm456_vm5 = vcmask 130048  }
  0x20   : > { %v301_v5 = vrot.slane %v218_v2, 1  ;;  %v380_v6 = vrot.slane %v218_v2, 2  ;;  %590 = vmatpush3.msra.mxu0 %v221_v1  ;;  %594 = vmatprep.subr.mxu1 %v722_v4  ;;  %v302_v8 = vrot.slane %v219_v7, 1  ;;  %v381_v9 = vrot.slane %v219_v7, 2 }
  0x21   : > { %592 = vmatmul.mubr.msk.f32.vlgmr.msra.gmra.mxu0 %vm222_vm1, %v218_v2  ;;  %595 = vmatpush3.msra.mxu1 %v577_v3 }
  0x22   : > { %596 = vmatprep.mubr.msk.f32.mxu1 %vm723_vm2, %v722_v4  ;;  %599 = vmatprep.subr.mxu0 %v722_v4  ;;  %v303_v11 = vsel %vm300_vm3, %v301_v5, %v302_v8  ;;  %v382_v12 = vsel %vm379_vm4, %v380_v6, %v381_v9 }
  0x23   : > { %597 = vmatmul.mubr.msk.f32.vlgmr.msra.gmra.mxu1 %vm222_vm1, %v303_v11  ;;  %600 = vmatpush3.msra.mxu0 %v579_v10 }
  0x24   : > { %601 = vmatprep.mubr.msk.f32.mxu0 %vm723_vm2, %v722_v4  ;;  %v220_v13 = vld [vmem:[%s800_s19] sm:$0xff] }
  0x25   : > { %602 = vmatmul.mubr.msk.f32.vlgmr.msra.gmra.mxu0 %vm222_vm1, %v382_v12 }
  0xe1   : > { %v292_v14 = vpop.f32.mrf.mxu0 }
  0xe2   : > { %v296_v15 = vadd.f32 %v292_v14, %v220_v13 }
  0xe3   : > { %v372_v16 = vpop.f32.mrf.mxu1  ;;  %v593_v17 = vpop.f32.mrf.mxu0 }
  0xe4   : > { %v376_v18 = vadd.f32 %v372_v16, %v296_v15 }
  0xe5   : > { %v598_v19 = vpop.f32.mrf.mxu1  ;;  %v451_v20 = vpop.f32.mrf.mxu0 }
  0xe6   : > { %v455_v21 = vadd.f32 %v451_v20, %v376_v18 }
  0xe7   : > { %v603_v22 = vpop.f32.mrf.mxu0 }
  0xe8   : > { %457 = vst.msk [vmem:[%s800_s19] sm:$0xff] %vm456_vm5, %v455_v21 }
  0xe9 PF: > { %s12_s15 = sadd.s32 1, %s719_s15   ;;  %s836_s9 = smov %s707_s12 }
  0xea   : > { %p9_p11 = scmp.ge.s32.totalorder %s12_s15, 50   ;;  %s837_s10 = smov %s711_s13 }
  0xeb   : > { %s838_s11 = smov %s715_s14  ;;  %s839_s12 = smov %s843_s16 }
  0xec   : > { %s840_s13 = smov %s847_s17  ;;  %s841_s14 = smov %s851_s18 }
  0xed   :  { %11 = sbr.rel (!%p9_p11) target bundleno = 4 (0x4), region = 67 }

// kernel: fcrn_ecml_forward.34
= control target key start
LH: loop header
LB: loop body
LE: loop exit
PB: predicated region body
PF: predicated region fallthrough
CT: control target
= control target key end

     0   :  { %v12_v0 = vlaneseq  ;;  %vm26_vm0 = vcmask 1043456   ;;  %v98_v7 = vmov 0.0   ;;  %v99_v17 = vmov 1966171168   ;;  %s133_s0 = inlined_call_operand.vmem [shape: f32[4,512], index: 0, kind: input, shape index: {}]   ;;  %s134_s1 = inlined_call_operand.vmem [shape: f32[1,512], index: 1, kind: output, shape index: {}]  }
   0x1   :  { %v18_v1 = vld [vmem:[%s133_s0] sm:$0xff]  ;;  %v19_v2 = vld [vmem:[%s133_s0 + $0x8] sm:$0xff]  ;;  %v62_v18 = vunpack.c.l.s4 %v99_v17 }
   0x2   :  { %vm116_vm1 = vcmp.lt.s32.totalorder %v12_v0, 512  ;;  %v22_v4 = vcombine.high %v18_v1, %v18_v1  ;;  %v23_v5 = vcombine.high %v19_v2, %v19_v2  ;;  %v27_v6 = vsel %vm26_vm0, %v18_v1, 0.0 }
   0x3   :  { %16 = vst.msk [vmem:[%s134_s1] sm:$0xf] %vm116_vm1, %v98_v7  ;;  %v28_v8 = vrot.slane %v27_v6, 4  ;;  %v41_v9 = vsel %vm26_vm0, %v19_v2, 0.0  ;;  %v63_v27 = vunpack.c.0.s8 %v62_v18  ;;  %v65_v31 = vshrl.u32 %v12_v0, 7 }
   0x4   :  { %v34_v10 = vsel %vm26_vm0, %v22_v4, 0.0  ;;  %v42_v11 = vrot.slane %v41_v9, 4  ;;  %v48_v12 = vsel %vm26_vm0, %v23_v5, 0.0 }
   0x5   :  { %v29_v13 = vadd.f32 %v28_v8, %v27_v6  ;;  %v35_v14 = vrot.slane %v34_v10, 4  ;;  %v49_v15 = vrot.slane %v48_v12, 4  ;;  %v66_v39 = vsub.s32 %v63_v27, %v65_v31 }
   0x6   :  { %v43_v16 = vadd.f32 %v42_v11, %v41_v9 }
   0x7   :  { %v30_v19 = vrot.slane %v29_v13, 2  ;;  %v36_v20 = vadd.f32 %v35_v14, %v34_v10  ;;  %v50_v21 = vadd.f32 %v49_v15, %v48_v12 }
   0x8   :  { %v44_v22 = vrot.slane %v43_v16, 2 }
   0x9   :  { %v31_v23 = vadd.f32 %v30_v19, %v29_v13  ;;  %v37_v24 = vrot.slane %v36_v20, 2  ;;  %v51_v25 = vrot.slane %v50_v21, 2 }
   0xa   :  { %v45_v26 = vadd.f32 %v44_v22, %v43_v16  ;;  %v17_v45 = vld [vmem:[%s134_s1] sm:$0xf] }
   0xb   :  { %v32_v28 = vrot.slane %v31_v23, 1  ;;  %v38_v29 = vadd.f32 %v37_v24, %v36_v20  ;;  %v52_v30 = vadd.f32 %v51_v25, %v50_v21 }
   0xc   :  { %v46_v32 = vrot.slane %v45_v26, 1 }
   0xd   :  { %v33_v33 = vadd.f32 %v32_v28, %v31_v23  ;;  %v39_v34 = vrot.slane %v38_v29, 1  ;;  %v53_v35 = vrot.slane %v52_v30, 1 }
   0xe   :  { %v47_v36 = vadd.f32 %v46_v32, %v45_v26 }
   0xf   :  { %v40_v37 = vadd.f32 %v39_v34, %v38_v29  ;;  %v54_v38 = vadd.f32 %v53_v35, %v52_v30 }
  0x11   :  { %v59_v40 = vcombine.low %v33_v33, %v40_v37  ;;  %v60_v41 = vcombine.low %v47_v36, %v54_v38 }
  0x13   :  { %v67_v42 = vrot.slane %v59_v40, %v66_v39  ;;  %v74_v43 = vrot.slane %v60_v41, %v66_v39 }
  0x15   :  { %v75_v44 = vcombine.low %v67_v42, %v74_v43 }
  0x17   :  { %v82_v46 = vrot.slane %v75_v44, %v66_v39 }
  0x19   :  { %v84_v47 = vadd.f32 %v82_v46, %v17_v45 }
  0x1b   :  { %89 = vst.msk [vmem:[%s134_s1] sm:$0xf] %vm116_vm1, %v84_v47 }

// kernel: fcrn_ecml_forward.35
= control target key start
LH: loop header
LB: loop body
LE: loop exit
PB: predicated region body
PF: predicated region fallthrough
CT: control target
= control target key end

     0   :  { %v15_v0 = vlaneseq  ;;  %v125_v3 = vmov 0.0   ;;  %vm55_vm1 = vcmask 1043456   ;;  %v126_v33 = vmov 1966171168   ;;  %s168_s1 = inlined_call_operand.vmem [shape: f32[1,512], index: 1, kind: input, shape index: {}]   ;;  %s169_s2 = inlined_call_operand.vmem [shape: f32[1,512], index: 2, kind: output, shape index: {}]   ;;  %s170_s0 = inlined_call_operand.vmem [shape: f32[4,512], index: 0, kind: input, shape index: {}]  }
   0x1   :  { %v22_v4 = vld [vmem:[%s168_s1] sm:$0xf]  ;;  %v21_v14 = vld [vmem:[%s170_s0 + $0x8] sm:$0xff]  ;;  %v91_v34 = vunpack.c.l.s4 %v126_v33 }
   0x2   :  { %vm142_vm0 = vcmp.lt.s32.totalorder %v15_v0, 512  ;;  %v25_v2 = vshrl.u32 %v15_v0, 7  ;;  %v20_v13 = vld [vmem:[%s170_s0] sm:$0xff] }
   0x3   :  { %19 = vst.msk [vmem:[%s169_s2] sm:$0xf] %vm142_vm0, %v125_v3  ;;  %v92_v43 = vunpack.c.0.s8 %v91_v34 }
   0x4   :  { %v26_v5 = vsub.s32 0, %v25_v2  ;;  %v30_v6 = vsub.s32 1, %v25_v2  ;;  %v34_v7 = vsub.s32 2, %v25_v2  ;;  %v38_v8 = vsub.s32 3, %v25_v2 }
   0x5   :  { %v95_v54 = vsub.s32 %v92_v43, %v25_v2 }
   0x6   :  { %v27_v9 = vrot.slane %v22_v4, %v26_v5  ;;  %v31_v10 = vrot.slane %v22_v4, %v30_v6  ;;  %v35_v11 = vrot.slane %v22_v4, %v34_v7  ;;  %v39_v12 = vrot.slane %v22_v4, %v38_v8 }
   0x8   :  { %v40_v15 = vcombine.low %v27_v9, %v31_v10  ;;  %v41_v16 = vcombine.low %v35_v11, %v39_v12 }
   0xa   :  { %v44_v17 = vsub.f32 %v20_v13, %v40_v15  ;;  %v45_v18 = vsub.f32 %v21_v14, %v41_v16  ;;  %v46_v60 = vld [vmem:[%s169_s2] sm:$0xf] }
   0xc   :  { %v47_v19 = vmul.f32 %v44_v17, %v44_v17  ;;  %v48_v20 = vmul.f32 %v45_v18, %v45_v18 }
   0xe   :  { %v51_v21 = vcombine.high %v47_v19, %v47_v19  ;;  %v52_v22 = vcombine.high %v48_v20, %v48_v20  ;;  %v56_v23 = vsel %vm55_vm1, %v47_v19, 0.0  ;;  %v70_v24 = vsel %vm55_vm1, %v48_v20, 0.0 }
   0xf   :  { %v57_v25 = vrot.slane %v56_v23, 4  ;;  %v71_v26 = vrot.slane %v70_v24, 4 }
  0x10   :  { %v63_v27 = vsel %vm55_vm1, %v51_v21, 0.0  ;;  %v77_v28 = vsel %vm55_vm1, %v52_v22, 0.0 }
  0x11   :  { %v58_v29 = vadd.f32 %v57_v25, %v56_v23  ;;  %v64_v30 = vrot.slane %v63_v27, 4  ;;  %v72_v31 = vadd.f32 %v71_v26, %v70_v24  ;;  %v78_v32 = vrot.slane %v77_v28, 4 }
  0x13   :  { %v59_v35 = vrot.slane %v58_v29, 2  ;;  %v65_v36 = vadd.f32 %v64_v30, %v63_v27  ;;  %v73_v37 = vrot.slane %v72_v31, 2  ;;  %v79_v38 = vadd.f32 %v78_v32, %v77_v28 }
  0x15   :  { %v60_v39 = vadd.f32 %v59_v35, %v58_v29  ;;  %v66_v40 = vrot.slane %v65_v36, 2  ;;  %v74_v41 = vadd.f32 %v73_v37, %v72_v31  ;;  %v80_v42 = vrot.slane %v79_v38, 2 }
  0x17   :  { %v61_v44 = vrot.slane %v60_v39, 1  ;;  %v67_v45 = vadd.f32 %v66_v40, %v65_v36  ;;  %v75_v46 = vrot.slane %v74_v41, 1  ;;  %v81_v47 = vadd.f32 %v80_v42, %v79_v38 }
  0x19   :  { %v62_v48 = vadd.f32 %v61_v44, %v60_v39  ;;  %v68_v49 = vrot.slane %v67_v45, 1  ;;  %v76_v50 = vadd.f32 %v75_v46, %v74_v41  ;;  %v82_v51 = vrot.slane %v81_v47, 1 }
  0x1b   :  { %v69_v52 = vadd.f32 %v68_v49, %v67_v45  ;;  %v83_v53 = vadd.f32 %v82_v51, %v81_v47 }
  0x1d   :  { %v88_v55 = vcombine.low %v62_v48, %v69_v52  ;;  %v89_v56 = vcombine.low %v76_v50, %v83_v53 }
  0x1f   :  { %v96_v57 = vrot.slane %v88_v55, %v95_v54  ;;  %v103_v58 = vrot.slane %v89_v56, %v95_v54 }
  0x21   :  { %v104_v59 = vcombine.low %v96_v57, %v103_v58 }
  0x23   :  { %v111_v61 = vrot.slane %v104_v59, %v95_v54 }
  0x25   :  { %v113_v62 = vadd.f32 %v111_v61, %v46_v60 }
  0x27   :  { %118 = vst.msk [vmem:[%s169_s2] sm:$0xf] %vm142_vm0, %v113_v62 }

// kernel: fcrn_ecml_forward.36
= control target key start
LH: loop header
LB: loop body
LE: loop exit
PB: predicated region body
PF: predicated region fallthrough
CT: control target
= control target key end

     0   :  { %s363_s12 = smov 0   ;;  %s390_s0 = inlined_call_operand.vmem [shape: f32[8,2,4,2,16], index: 0, kind: input, shape index: {}]   ;;  %s391_s1 = inlined_call_operand.vmem [shape: f32[1,16], index: 1, kind: input, shape index: {}]   ;;  %s392_s2 = inlined_call_operand.vmem [shape: f32[1,16], index: 2, kind: input, shape index: {}]   ;;  %s393_s3 = inlined_call_operand.vmem [shape: f32[8,4,16], index: 3, kind: output, shape index: {}]  }
   0x1 LB: > { %s314_s13 = sadd.s32 4294967295, %s341_s12   ;;  %p318_p0 = scmp.ge.s32.totalorder %s341_s12, 1  ;;  %s341_s12 = sphi %s363_s12, %s13_s12  }
   0x2   : > { %p137_p1 = scmp.lt.s32.totalorder %s341_s12, 9 }
   0x4   : > { %p138_p2 = pnand %p318_p0, %p137_p1 }
   0x5   : > { %p160_p3 = scmp.lt.s32.totalorder (!%p138_p2), %s314_s13, 7 }
   0x6   : > { %141 = sbr.rel (%p138_p2) target bundleno = 41 (0x29), region = 32 }
   0xb   : > { %s395_s13 = smov (!%p160_p3, %s314_s13), 7  ;;  %v322_v0 = vld [vmem:[%s391_s1] ss:$0 sm:$0xff]  ;;  %vm219_vm0 = vcmask 123904   ;;  %vm252_vm1 = vcmask 1041409   ;;  %vm254_vm2 = vcmask 1042434  }
   0xc   : > { %s326_s14 = sshll.u32 %s395_s13, 4  ;;  %v323_v1 = vld [vmem:[%s392_s2] ss:$0 sm:$0xff]  ;;  %s321_s22 = sshll.u32 %s395_s13, 2  ;;  %vm256_vm3 = vcmask 1043459   ;;  %vm259_vm4 = vcmask 125952  }
   0xd   : > { %s164_s19 = scalar_lea.vmem %s390_s0, %s326_s14  ;;  %s168_s25 = scalar_lea.vmem %s393_s3, %s321_s22 }
   0xe   : > { %v169_v2 = vld [vmem:[%s164_s19] sm:$0x3]  ;;  %v170_v3 = vld [vmem:[%s164_s19 + $0x2] sm:$0x3]  ;;  %v171_v4 = vld [vmem:[%s164_s19 + $0x4] sm:$0x3] }
   0xf   : > { %v172_v5 = vld [vmem:[%s164_s19 + $0x6] sm:$0x3]  ;;  %v173_v6 = vld [vmem:[%s164_s19 + $0x8] sm:$0x3]  ;;  %v174_v7 = vld [vmem:[%s164_s19 + $0xa] sm:$0x3]  ;;  %v184_v8 = vmul.f32 %v322_v0, %v169_v2  ;;  %v185_v9 = vmul.f32 %v322_v0, %v170_v3  ;;  %v186_v10 = vmul.f32 %v322_v0, %v171_v4 }
  0x10   : > { %v175_v11 = vld [vmem:[%s164_s19 + $0xc] sm:$0x3]  ;;  %v176_v12 = vld [vmem:[%s164_s19 + $0xe] sm:$0x3]  ;;  %v187_v13 = vmul.f32 %v322_v0, %v172_v5  ;;  %v188_v14 = vmul.f32 %v322_v0, %v173_v6  ;;  %v189_v15 = vmul.f32 %v322_v0, %v174_v7 }
  0x11   : > { %v190_v16 = vmul.f32 %v322_v0, %v175_v11  ;;  %v191_v17 = vmul.f32 %v322_v0, %v176_v12  ;;  %v199_v18 = vadd.f32 %v323_v1, %v184_v8  ;;  %v200_v19 = vadd.f32 %v323_v1, %v185_v9 }
  0x12   : > { %v201_v20 = vadd.f32 %v323_v1, %v186_v10  ;;  %v202_v21 = vadd.f32 %v323_v1, %v187_v13  ;;  %v203_v22 = vadd.f32 %v323_v1, %v188_v14  ;;  %v204_v23 = vadd.f32 %v323_v1, %v189_v15 }
  0x13   : > { %v205_v24 = vadd.f32 %v323_v1, %v190_v16  ;;  %v206_v25 = vadd.f32 %v323_v1, %v191_v17  ;;  %v207_v26 = vmax.f32 %v199_v18, 0.0  ;;  %v208_v27 = vmax.f32 %v200_v19, 0.0 }
  0x14   : > { %v209_v28 = vmax.f32 %v201_v20, 0.0  ;;  %v210_v29 = vmax.f32 %v202_v21, 0.0  ;;  %v211_v30 = vmax.f32 %v203_v22, 0.0  ;;  %v212_v31 = vmax.f32 %v204_v23, 0.0 }
  0x15   : > { %v213_v32 = vmax.f32 %v205_v24, 0.0  ;;  %v214_v33 = vmax.f32 %v206_v25, 0.0 }
  0x16   : > { %v215_v34 = vmax.f32 %v207_v26, %v211_v30  ;;  %v216_v35 = vmax.f32 %v208_v27, %v212_v31 }
  0x17   : > { %v217_v36 = vmax.f32 %v209_v28, %v213_v32  ;;  %v218_v37 = vmax.f32 %v210_v29, %v214_v33 }
  0x18   : > { %v220_v38 = vsel %vm219_vm0, %v215_v34, -inf  ;;  %v227_v39 = vsel %vm219_vm0, %v216_v35, -inf }
  0x19   : > { %v221_v40 = vrot.slane %v220_v38, 4  ;;  %v228_v41 = vrot.slane %v227_v39, 4  ;;  %v234_v42 = vsel %vm219_vm0, %v217_v36, -inf  ;;  %v241_v43 = vsel %vm219_vm0, %v218_v37, -inf }
  0x1a   : > { %v235_v44 = vrot.slane %v234_v42, 4  ;;  %v242_v45 = vrot.slane %v241_v43, 4 }
  0x1b   : > { %v222_v46 = vmax.f32 %v220_v38, %v221_v40  ;;  %v229_v47 = vmax.f32 %v227_v39, %v228_v41 }
  0x1c   : > { %v236_v48 = vmax.f32 %v234_v42, %v235_v44  ;;  %v243_v49 = vmax.f32 %v241_v43, %v242_v45 }
  0x1d   : > { %v223_v50 = vrot.slane %v222_v46, 2  ;;  %v230_v51 = vrot.slane %v229_v47, 2 }
  0x1e   : > { %v237_v52 = vrot.slane %v236_v48, 2  ;;  %v244_v53 = vrot.slane %v243_v49, 2 }
  0x1f   : > { %v224_v54 = vmax.f32 %v222_v46, %v223_v50  ;;  %v231_v55 = vmax.f32 %v229_v47, %v230_v51 }
  0x20   : > { %v238_v56 = vmax.f32 %v236_v48, %v237_v52  ;;  %v245_v57 = vmax.f32 %v243_v49, %v244_v53 }
  0x21   : > { %v225_v58 = vrot.slane %v224_v54, 1  ;;  %v232_v59 = vrot.slane %v231_v55, 1 }
  0x22   : > { %v239_v60 = vrot.slane %v238_v56, 1  ;;  %v246_v61 = vrot.slane %v245_v57, 1 }
  0x23   : > { %v226_v62 = vmax.f32 %v224_v54, %v225_v58  ;;  %v233_v63 = vmax.f32 %v231_v55, %v232_v59 }
  0x24   : > { %v240_v0 = vmax.f32 %v238_v56, %v239_v60  ;;  %v247_v1 = vmax.f32 %v245_v57, %v246_v61 }
  0x25   : > { %v253_v2 = vsel %vm252_vm1, %v233_v63, %v226_v62 }
  0x26   : > { %v255_v3 = vsel %vm254_vm2, %v240_v0, %v253_v2 }
  0x27   : > { %v257_v4 = vsel %vm256_vm3, %v247_v1, %v255_v3 }
  0x28   : > { %260 = vst.msk [vmem:[%s168_s25] sm:$0xf] %vm259_vm4, %v257_v4 }
  0x29 PF: > { %s13_s12 = sadd.s32 1, %s341_s12  }
  0x2a   : > { %p10_p4 = scmp.ge.s32.totalorder %s13_s12, 10  }
  0x2c   :  { %12 = sbr.rel (!%p10_p4) target bundleno = 1 (0x1), region = 62 }

// kernel: fcrn_ecml_forward.37
= control target key start
LH: loop header
LB: loop body
LE: loop exit
PB: predicated region body
PF: predicated region fallthrough
CT: control target
= control target key end

     0   :  { %s738_s9 = smov 0   ;;  %s740_s10 = smov 0   ;;  %s837_s0 = inlined_call_operand.vmem [shape: f32[2,6,6,16], index: 0, kind: input, shape index: {}]   ;;  %s838_s1 = inlined_call_operand.vmem [shape: f32[3,3,16,32], index: 1, kind: input, shape index: {}]   ;;  %s839_s2 = inlined_call_operand.vmem [shape: f32[2,4,4,32], index: 2, kind: output, shape index: {}]  }
   0x1   :  { %s742_s11 = smov 0   ;;  %s744_s12 = smov 0  }
   0x2   :  { %s746_s13 = smov 0   ;;  %s748_s14 = smov 0  }
   0x3   :  { %s750_s15 = smov 0  }
   0x4 LB: > { %s24_s16 = sadd.s32 1, %s706_s12  ;;  %s27_s17 = sadd.s32 1, %s710_s13  ;;  %s718_s15 = sphi %s750_s15, %s12_s15   ;;  %s714_s14 = sphi %s748_s14, %s845_s14   ;;  %s710_s13 = sphi %s746_s13, %s844_s13   ;;  %s706_s12 = sphi %s744_s12, %s843_s12   ;;  %s702_s11 = sphi %s742_s11, %s842_s11   ;;  %s698_s10 = sphi %s740_s10, %s841_s10   ;;  %s694_s9 = sphi %s738_s9, %s840_s9  }
   0x5   : > { %p25_p0 = scmp.ge.s32.totalorder %s24_s16, 3  ;;  %p558_p1 = scmp.ge.s32.totalorder %s718_s15, 1 }
   0x6   : > { %p152_p2 = scmp.lt.s32.totalorder %s718_s15, 25  ;;  %s31_s18 = sadd.s32 1, %s714_s14 }
   0x7   : > { %s847_s16 = smov (%p25_p0, %s24_s16), 0  ;;  %s849_s17 = smov (!%p25_p0, %s27_s17), %s710_s13 }
   0x8   : > { %p153_p3 = pnand %p558_p1, %p152_p2  ;;  %p29_p4 = scmp.ge.s32.totalorder %s849_s17, 4 }
   0x9   : > { %s186_s19 = sadd.s32 (!%p153_p3), %s694_s9, %s698_s10  ;;  %p187_p6 = scmp.lt.s32.totalorder (!%p153_p3), %s702_s11, 1 }
   0xa   : > { %s851_s17 = smov (%p29_p4, %s849_s17), 0  ;;  %s853_s18 = smov (!%p29_p4, %s31_s18), %s714_s14 }
   0xb   : > { %p33_p5 = scmp.ge.s32.totalorder %s853_s18, 2  ;;  %156 = sbr.rel (%p153_p3) target bundleno = 236 (0xec), region = 28 }
   0xc   : > { %p189_p7 = scmp.lt.s32.totalorder (!%p153_p3), %s186_s19, 5  ;;  %p196_p8 = scmp.lt.s32.totalorder (!%p153_p3), %s694_s9, 2 }
   0xd   : > { %s855_s18 = smov (%p33_p5, %s853_s18), 0  ;;  %p203_p9 = scmp.lt.s32.totalorder (!%p153_p3), %s698_s10, 3 }
   0xe   : > { %p563_p10 = scmp.ne.s32.totalorder (!%p153_p3), %s694_s9, 0 }
  0x10   : > { %s857_s11 = smov (!%p187_p6, %s702_s11), 1  ;;  %s859_s19 = smov (!%p189_p7, %s186_s19), 5 }
  0x11   : > { %s603_s20 = smul.u32 6, %s857_s11  ;;  %s561_s3 = sshll.u32 %s857_s11, 2 }
  0x12   : > { %s197_s21 = scalar_select %p196_p8, %s694_s9, 2 }
  0x13   : > { %s192_s22 = sadd.s32 %s603_s20, %s859_s19  ;;  %s861_s10 = smov (!%p203_p9, %s698_s10), 3 }
  0x14   : > { %s559_s23 = sshll.u32 %s192_s22, 3  ;;  %s604_s24 = smul.u32 48, %s197_s21 }
  0x15   : > { %s194_s27 = scalar_lea.vmem %s837_s0, %s559_s23  ;;  %s206_s4 = sadd.s32 %s561_s3, %s861_s10 }
  0x16   : > { %s795_s30 = scalar_lea.vmem %s838_s1, %s604_s24  ;;  %s562_s5 = sshll.u32 %s206_s4, 2 }
  0x17   : > { %s801_s8 = scalar_lea.vmem %s839_s2, %s562_s5  ;;  %212 = sbr.rel (%p563_p10) target bundleno = 30 (0x1e), region = 32 }
  0x1c   : > { %vm213_vm0 = vcmask 257024   ;;  %v720_v0 = vmov 0.0  }
  0x1d   : > { %214 = vst.msk [vmem:[%s801_s8] sm:$0xf] %vm213_vm0, %v720_v0 }
  0x1e PF: > { %v218_v1 = vld [vmem:[%s795_s30 + $0x8] sm:$0xff]  ;;  %v566_v2 = vld [vmem:[%s795_s30 + $0x18] sm:$0xff]  ;;  %v721_v3 = vmov 0.0   ;;  %v217_v4 = vld [vmem:[%s795_s30] sm:$0xff]  ;;  %vm219_vm1 = vcmask 130048   ;;  %vm722_vm2 = vmmov 0  }
  0x1f   : > { %582 = vmatprep.subr.mxu0 %v721_v3  ;;  %589 = vmatprep.subr.mxu1 %v721_v3  ;;  %v215_v5 = vld [vmem:[%s194_s27] sm:$0x3f]  ;;  %v565_v6 = vld [vmem:[%s795_s30 + $0x10] sm:$0xff]  ;;  %v569_v8 = vld [vmem:[%s795_s30 + $0x28] sm:$0xff]  ;;  %vm448_vm3 = vcmask 257024  }
  0x20   : > { %583 = vmatpush3.msra.mxu0 %v218_v1  ;;  %590 = vmatpush3.msra.mxu1 %v566_v2  ;;  %v297_v7 = vrot.slane %v215_v5, 1  ;;  %v374_v9 = vrot.slane %v215_v5, 2  ;;  %v568_v10 = vld [vmem:[%s795_s30 + $0x20] sm:$0xff] }
  0x21   : > { %584 = vmatprep.subr.mxu0 %v721_v3  ;;  %586 = vmatprep.mubr.msk.f32.mxu0 %vm722_vm2, %v721_v3 }
  0x22   : > { %585 = vmatpush3.msra.mxu0 %v217_v4  ;;  %591 = vmatprep.subr.mxu1 %v721_v3 }
  0x23   : > { %587 = vmatmul.mubr.msk.f32.vlgmr.msra.gmra.mxu0 %vm219_vm1, %v215_v5  ;;  %592 = vmatpush3.msra.mxu1 %v565_v6 }
  0x24   : > { %593 = vmatprep.mubr.msk.f32.mxu1 %vm722_vm2, %v721_v3  ;;  %596 = vmatprep.subr.mxu0 %v721_v3  ;;  %v216_v11 = vld [vmem:[%s801_s8] sm:$0xf] }
  0x25   : > { %594 = vmatmul.mubr.msk.f32.vlgmr.msra.gmra.mxu1 %vm219_vm1, %v297_v7  ;;  %597 = vmatpush3.msra.mxu0 %v569_v8 }
  0x26   : > { %598 = vmatprep.subr.mxu0 %v721_v3  ;;  %600 = vmatprep.mubr.msk.f32.mxu0 %vm722_vm2, %v721_v3 }
  0x27   : > { %599 = vmatpush3.msra.mxu0 %v568_v10 }
  0x28   : > { %601 = vmatmul.mubr.msk.f32.vlgmr.msra.gmra.mxu0 %vm219_vm1, %v374_v9 }
  0xe3   : > { %v289_v12 = vpop.f32.mrf.mxu0 }
  0xe4   : > { %v293_v13 = vadd.f32 %v289_v12, %v216_v11 }
  0xe5   : > { %v366_v14 = vpop.f32.mrf.mxu1  ;;  %v588_v15 = vpop.f32.mrf.mxu0 }
  0xe6   : > { %v370_v16 = vadd.f32 %v366_v14, %v293_v13 }
  0xe7   : > { %v595_v17 = vpop.f32.mrf.mxu1 }
  0xe8   : > { %v443_v18 = vpop.f32.mrf.mxu0 }
  0xe9   : > { %v447_v19 = vadd.f32 %v443_v18, %v370_v16 }
  0xea   : > { %v602_v20 = vpop.f32.mrf.mxu0 }
  0xeb   : > { %449 = vst.msk [vmem:[%s801_s8] sm:$0xf] %vm448_vm3, %v447_v19 }
  0xec PF: > { %s12_s15 = sadd.s32 1, %s718_s15   ;;  %s840_s9 = smov %s706_s12 }
  0xed   : > { %p9_p11 = scmp.ge.s32.totalorder %s12_s15, 26   ;;  %s841_s10 = smov %s710_s13 }
  0xee   : > { %s842_s11 = smov %s714_s14  ;;  %s843_s12 = smov %s847_s16 }
  0xef   : > { %s844_s13 = smov %s851_s17  ;;  %s845_s14 = smov %s855_s18 }
  0xf0   :  { %11 = sbr.rel (!%p9_p11) target bundleno = 4 (0x4), region = 67 }

// kernel: fcrn_ecml_forward.38
= control target key start
LH: loop header
LB: loop body
LE: loop exit
PB: predicated region body
PF: predicated region fallthrough
CT: control target
= control target key end

     0   :  { %v12_v0 = vlaneseq  ;;  %v113_v2 = vmov 1983009808   ;;  %v114_v6 = vmov 0.0   ;;  %vm41_vm1 = vcmask 1041408   ;;  %s146_s0 = inlined_call_operand.vmem [shape: f32[2,512], index: 0, kind: input, shape index: {}]   ;;  %s147_s1 = inlined_call_operand.vmem [shape: f32[1,512], index: 1, kind: output, shape index: {}]  }
   0x1   :  { %v18_v1 = vld [vmem:[%s146_s0] sm:$0xff]  ;;  %v22_v3 = vunpack.c.l.s4 %v113_v2  ;;  %v115_v24 = vmov 1966171168  }
   0x2   :  { %vm129_vm0 = vcmp.lt.s32.totalorder %v12_v0, 512  ;;  %v25_v5 = vshrl.u32 %v12_v0, 7  ;;  %v20_v7 = vcombine.high %v18_v1, %v18_v1  ;;  %v77_v25 = vunpack.c.l.s4 %v115_v24 }
   0x3   :  { %16 = vst.msk [vmem:[%s147_s1] sm:$0xf] %vm129_vm0, %v114_v6  ;;  %v23_v8 = vunpack.c.0.s8 %v22_v3 }
   0x4   :  { %v78_v34 = vunpack.c.0.s8 %v77_v25 }
   0x5   :  { %v26_v9 = vsub.s32 %v23_v8, %v25_v5 }
   0x6   :  { %v81_v45 = vsub.s32 %v78_v34, %v25_v5 }
   0x7   :  { %v27_v10 = vrot.slane %v18_v1, %v26_v9  ;;  %v34_v11 = vrot.slane %v20_v7, %v26_v9 }
   0x9   :  { %v35_v12 = vcombine.high %v27_v10, %v27_v10  ;;  %v36_v13 = vcombine.high %v34_v11, %v34_v11  ;;  %v42_v14 = vsel %vm41_vm1, %v27_v10, 0.0  ;;  %v56_v15 = vsel %vm41_vm1, %v34_v11, 0.0 }
   0xa   :  { %v43_v16 = vrot.slane %v42_v14, 4  ;;  %v57_v17 = vrot.slane %v56_v15, 4  ;;  %v17_v51 = vld [vmem:[%s147_s1] sm:$0xf] }
   0xb   :  { %v49_v18 = vsel %vm41_vm1, %v35_v12, 0.0  ;;  %v63_v19 = vsel %vm41_vm1, %v36_v13, 0.0 }
   0xc   :  { %v44_v20 = vadd.f32 %v43_v16, %v42_v14  ;;  %v50_v21 = vrot.slane %v49_v18, 4  ;;  %v58_v22 = vadd.f32 %v57_v17, %v56_v15  ;;  %v64_v23 = vrot.slane %v63_v19, 4 }
   0xe   :  { %v45_v26 = vrot.slane %v44_v20, 2  ;;  %v51_v27 = vadd.f32 %v50_v21, %v49_v18  ;;  %v59_v28 = vrot.slane %v58_v22, 2  ;;  %v65_v29 = vadd.f32 %v64_v23, %v63_v19 }
  0x10   :  { %v46_v30 = vadd.f32 %v45_v26, %v44_v20  ;;  %v52_v31 = vrot.slane %v51_v27, 2  ;;  %v60_v32 = vadd.f32 %v59_v28, %v58_v22  ;;  %v66_v33 = vrot.slane %v65_v29, 2 }
  0x12   :  { %v47_v35 = vrot.slane %v46_v30, 1  ;;  %v53_v36 = vadd.f32 %v52_v31, %v51_v27  ;;  %v61_v37 = vrot.slane %v60_v32, 1  ;;  %v67_v38 = vadd.f32 %v66_v33, %v65_v29 }
  0x14   :  { %v48_v39 = vadd.f32 %v47_v35, %v46_v30  ;;  %v54_v40 = vrot.slane %v53_v36, 1  ;;  %v62_v41 = vadd.f32 %v61_v37, %v60_v32  ;;  %v68_v42 = vrot.slane %v67_v38, 1 }
  0x16   :  { %v55_v43 = vadd.f32 %v54_v40, %v53_v36  ;;  %v69_v44 = vadd.f32 %v68_v42, %v67_v38 }
  0x18   :  { %v74_v46 = vcombine.low %v48_v39, %v55_v43  ;;  %v75_v47 = vcombine.low %v62_v41, %v69_v44 }
  0x1a   :  { %v82_v48 = vrot.slane %v74_v46, %v81_v45  ;;  %v89_v49 = vrot.slane %v75_v47, %v81_v45 }
  0x1c   :  { %v90_v50 = vcombine.low %v82_v48, %v89_v49 }
  0x1e   :  { %v97_v52 = vrot.slane %v90_v50, %v81_v45 }
  0x20   :  { %v99_v53 = vadd.f32 %v97_v52, %v17_v51 }
  0x22   :  { %104 = vst.msk [vmem:[%s147_s1] sm:$0xf] %vm129_vm0, %v99_v53 }

// kernel: fcrn_ecml_forward.39
= control target key start
LH: loop header
LB: loop body
LE: loop exit
PB: predicated region body
PF: predicated region fallthrough
CT: control target
= control target key end

     0   :  { %v15_v0 = vlaneseq  ;;  %v153_v1 = vmov 1983009808   ;;  %v154_v5 = vmov 0.0   ;;  %vm82_vm1 = vcmask 1041408   ;;  %s194_s1 = inlined_call_operand.vmem [shape: f32[1,512], index: 1, kind: input, shape index: {}]   ;;  %s195_s2 = inlined_call_operand.vmem [shape: f32[1,512], index: 2, kind: output, shape index: {}]   ;;  %s196_s0 = inlined_call_operand.vmem [shape: f32[2,512], index: 0, kind: input, shape index: {}]  }
   0x1   :  { %v42_v2 = vunpack.c.l.s4 %v153_v1  ;;  %v21_v6 = vld [vmem:[%s194_s1] sm:$0xf]  ;;  %v155_v38 = vmov 1966171168  }
   0x2   :  { %vm171_vm0 = vcmp.lt.s32.totalorder %v15_v0, 512  ;;  %v24_v4 = vshrl.u32 %v15_v0, 7  ;;  %v20_v21 = vld [vmem:[%s196_s0] sm:$0xff]  ;;  %v118_v39 = vunpack.c.l.s4 %v155_v38 }
   0x3   :  { %19 = vst.msk [vmem:[%s195_s2] sm:$0xf] %vm171_vm0, %v154_v5  ;;  %v43_v7 = vunpack.c.0.s8 %v42_v2 }
   0x4   :  { %v25_v8 = vsub.s32 0, %v24_v4  ;;  %v29_v9 = vsub.s32 1, %v24_v4  ;;  %v33_v10 = vsub.s32 2, %v24_v4  ;;  %v37_v11 = vsub.s32 3, %v24_v4 }
   0x5   :  { %v46_v12 = vsub.s32 %v43_v7, %v24_v4  ;;  %v119_v48 = vunpack.c.0.s8 %v118_v39 }
   0x6   :  { %v26_v13 = vrot.slane %v21_v6, %v25_v8  ;;  %v30_v14 = vrot.slane %v21_v6, %v29_v9  ;;  %v34_v15 = vrot.slane %v21_v6, %v33_v10  ;;  %v38_v16 = vrot.slane %v21_v6, %v37_v11 }
   0x7   :  { %v122_v60 = vsub.s32 %v119_v48, %v24_v4 }
   0x8   :  { %v39_v17 = vcombine.low %v26_v13, %v30_v14  ;;  %v40_v18 = vcombine.low %v34_v15, %v38_v16 }
   0xa   :  { %v47_v19 = vrot.slane %v39_v17, %v46_v12  ;;  %v54_v20 = vrot.slane %v40_v18, %v46_v12  ;;  %v58_v5 = vld [vmem:[%s195_s2] sm:$0xf] }
   0xc   :  { %v55_v22 = vcombine.low %v47_v19, %v54_v20 }
   0xe   :  { %v57_v23 = vsub.f32 %v20_v21, %v55_v22 }
  0x10   :  { %v59_v24 = vmul.f32 %v57_v23, %v57_v23 }
  0x12   :  { %v61_v25 = vcombine.high %v59_v24, %v59_v24  ;;  %v68_v26 = vrot.slane %v59_v24, %v46_v12 }
  0x14   :  { %v75_v27 = vrot.slane %v61_v25, %v46_v12  ;;  %v76_v28 = vcombine.high %v68_v26, %v68_v26  ;;  %v83_v29 = vsel %vm82_vm1, %v68_v26, 0.0 }
  0x15   :  { %v84_v30 = vrot.slane %v83_v29, 4 }
  0x16   :  { %v77_v31 = vcombine.high %v75_v27, %v75_v27  ;;  %v90_v32 = vsel %vm82_vm1, %v76_v28, 0.0  ;;  %v97_v33 = vsel %vm82_vm1, %v75_v27, 0.0 }
  0x17   :  { %v85_v34 = vadd.f32 %v84_v30, %v83_v29  ;;  %v91_v35 = vrot.slane %v90_v32, 4  ;;  %v98_v36 = vrot.slane %v97_v33, 4 }
  0x18   :  { %v104_v37 = vsel %vm82_vm1, %v77_v31, 0.0 }
  0x19   :  { %v86_v40 = vrot.slane %v85_v34, 2  ;;  %v92_v41 = vadd.f32 %v91_v35, %v90_v32  ;;  %v99_v42 = vadd.f32 %v98_v36, %v97_v33  ;;  %v105_v43 = vrot.slane %v104_v37, 4 }
  0x1b   :  { %v87_v44 = vadd.f32 %v86_v40, %v85_v34  ;;  %v93_v45 = vrot.slane %v92_v41, 2  ;;  %v100_v46 = vrot.slane %v99_v42, 2  ;;  %v106_v47 = vadd.f32 %v105_v43, %v104_v37 }
  0x1d   :  { %v88_v49 = vrot.slane %v87_v44, 1  ;;  %v94_v50 = vadd.f32 %v93_v45, %v92_v41  ;;  %v101_v51 = vadd.f32 %v100_v46, %v99_v42  ;;  %v107_v52 = vrot.slane %v106_v47, 2 }
  0x1f   :  { %v89_v53 = vadd.f32 %v88_v49, %v87_v44  ;;  %v95_v54 = vrot.slane %v94_v50, 1  ;;  %v102_v55 = vrot.slane %v101_v51, 1  ;;  %v108_v56 = vadd.f32 %v107_v52, %v106_v47 }
  0x21   :  { %v96_v57 = vadd.f32 %v95_v54, %v94_v50  ;;  %v103_v58 = vadd.f32 %v102_v55, %v101_v51  ;;  %v109_v59 = vrot.slane %v108_v56, 1 }
  0x23   :  { %v110_v61 = vadd.f32 %v109_v59, %v108_v56  ;;  %v115_v62 = vcombine.low %v89_v53, %v96_v57 }
  0x25   :  { %v116_v63 = vcombine.low %v103_v58, %v110_v61  ;;  %v123_v0 = vrot.slane %v115_v62, %v122_v60 }
  0x27   :  { %v130_v1 = vrot.slane %v116_v63, %v122_v60 }
  0x29   :  { %v131_v2 = vcombine.low %v123_v0, %v130_v1 }
  0x2b   :  { %v138_v6 = vrot.slane %v131_v2, %v122_v60 }
  0x2d   :  { %v140_v7 = vadd.f32 %v138_v6, %v58_v5 }
  0x2f   :  { %145 = vst.msk [vmem:[%s195_s2] sm:$0xf] %vm171_vm0, %v140_v7 }

// kernel: fcrn_ecml_forward.40
= control target key start
LH: loop header
LB: loop body
LE: loop exit
PB: predicated region body
PF: predicated region fallthrough
CT: control target
= control target key end

     0   :  { %s324_s12 = smov 0   ;;  %s354_s0 = inlined_call_operand.vmem [shape: f32[4,2,2,2,32], index: 0, kind: input, shape index: {}]   ;;  %s355_s1 = inlined_call_operand.vmem [shape: f32[1,32], index: 1, kind: input, shape index: {}]   ;;  %s356_s2 = inlined_call_operand.vmem [shape: f32[1,32], index: 2, kind: input, shape index: {}]   ;;  %s357_s3 = inlined_call_operand.vmem [shape: f32[4,2,32], index: 3, kind: output, shape index: {}]  }
   0x1 LB: > { %s275_s13 = sadd.s32 4294967295, %s302_s12   ;;  %p279_p0 = scmp.ge.s32.totalorder %s302_s12, 1  ;;  %s302_s12 = sphi %s324_s12, %s13_s12  }
   0x2   : > { %p137_p1 = scmp.lt.s32.totalorder %s302_s12, 5 }
   0x4   : > { %p138_p2 = pnand %p279_p0, %p137_p1 }
   0x5   : > { %p160_p3 = scmp.lt.s32.totalorder (!%p138_p2), %s275_s13, 3 }
   0x6   : > { %141 = sbr.rel (%p138_p2) target bundleno = 39 (0x27), region = 32 }
   0xb   : > { %s359_s13 = smov (!%p160_p3, %s275_s13), 3  ;;  %v283_v0 = vld [vmem:[%s355_s1] ss:$0 sm:$0xff]  ;;  %vm201_vm0 = vcmask 254976   ;;  %vm218_vm1 = vcmask 1041409  }
   0xc   : > { %s287_s14 = sshll.u32 %s359_s13, 3  ;;  %v284_v1 = vld [vmem:[%s356_s2] ss:$0 sm:$0xff]  ;;  %s282_s22 = sshll.u32 %s359_s13, 1 }
   0xd   : > { %s164_s19 = scalar_lea.vmem %s354_s0, %s287_s14  ;;  %s168_s25 = scalar_lea.vmem %s357_s3, %s282_s22 }
   0xe   : > { %v169_v2 = vld [vmem:[%s164_s19] sm:$0x3]  ;;  %v170_v3 = vld [vmem:[%s164_s19 + $0x2] sm:$0x3]  ;;  %v171_v4 = vld [vmem:[%s164_s19 + $0x4] sm:$0x3] }
   0xf   : > { %v172_v5 = vld [vmem:[%s164_s19 + $0x6] sm:$0x3]  ;;  %v180_v6 = vmul.f32 %v283_v0, %v169_v2  ;;  %v181_v7 = vmul.f32 %v283_v0, %v170_v3  ;;  %v182_v8 = vmul.f32 %v283_v0, %v171_v4 }
  0x10   : > { %v183_v9 = vmul.f32 %v283_v0, %v172_v5 }
  0x11   : > { %v191_v10 = vadd.f32 %v284_v1, %v180_v6  ;;  %v192_v11 = vadd.f32 %v284_v1, %v181_v7  ;;  %v193_v12 = vadd.f32 %v284_v1, %v182_v8 }
  0x12   : > { %v194_v13 = vadd.f32 %v284_v1, %v183_v9 }
  0x13   : > { %v195_v14 = vmax.f32 %v191_v10, 0.0  ;;  %v196_v15 = vmax.f32 %v192_v11, 0.0  ;;  %v197_v16 = vmax.f32 %v193_v12, 0.0 }
  0x14   : > { %v198_v17 = vmax.f32 %v194_v13, 0.0 }
  0x15   : > { %v199_v18 = vmax.f32 %v195_v14, %v197_v16 }
  0x16   : > { %v200_v19 = vmax.f32 %v196_v15, %v198_v17 }
  0x17   : > { %v202_v20 = vsel %vm201_vm0, %v199_v18, -inf }
  0x18   : > { %v203_v21 = vrot.slane %v202_v20, 4  ;;  %v209_v22 = vsel %vm201_vm0, %v200_v19, -inf }
  0x19   : > { %v210_v23 = vrot.slane %v209_v22, 4 }
  0x1a   : > { %v204_v24 = vmax.f32 %v202_v20, %v203_v21 }
  0x1b   : > { %v211_v25 = vmax.f32 %v209_v22, %v210_v23 }
  0x1c   : > { %v205_v26 = vrot.slane %v204_v24, 2 }
  0x1d   : > { %v212_v27 = vrot.slane %v211_v25, 2 }
  0x1e   : > { %v206_v28 = vmax.f32 %v204_v24, %v205_v26 }
  0x1f   : > { %v213_v29 = vmax.f32 %v211_v25, %v212_v27 }
  0x20   : > { %v207_v30 = vrot.slane %v206_v28, 1 }
  0x21   : > { %v214_v31 = vrot.slane %v213_v29, 1 }
  0x22   : > { %v208_v32 = vmax.f32 %v206_v28, %v207_v30 }
  0x23   : > { %v215_v33 = vmax.f32 %v213_v29, %v214_v31 }
  0x25   : > { %v219_v34 = vsel %vm218_vm1, %v215_v33, %v208_v32 }
  0x26   : > { %221 = vst.msk [vmem:[%s168_s25] sm:$0x3] %vm201_vm0, %v219_v34 }
  0x27 PF: > { %s13_s12 = sadd.s32 1, %s302_s12  }
  0x28   : > { %p10_p4 = scmp.ge.s32.totalorder %s13_s12, 6  }
  0x2a   :  { %12 = sbr.rel (!%p10_p4) target bundleno = 1 (0x1), region = 62 }

// kernel: fcrn_ecml_forward.41
= control target key start
LH: loop header
LB: loop body
LE: loop exit
PB: predicated region body
PF: predicated region fallthrough
CT: control target
= control target key end

     0   :  { %s764_s9 = smov 0   ;;  %s766_s10 = smov 0   ;;  %s875_s0 = inlined_call_operand.vmem [shape: f32[2,4,4,32], index: 0, kind: input, shape index: {}]   ;;  %s876_s1 = inlined_call_operand.vmem [shape: f32[3,3,32,128], index: 1, kind: input, shape index: {}]   ;;  %s877_s2 = inlined_call_operand.vmem [shape: f32[2,2,2,128], index: 2, kind: output, shape index: {}]  }
   0x1   :  { %s768_s11 = smov 0   ;;  %s770_s12 = smov 0  }
   0x2   :  { %s772_s13 = smov 0   ;;  %s774_s14 = smov 0  }
   0x3   :  { %s776_s15 = smov 0  }
   0x4 LB: > { %s24_s16 = sadd.s32 1, %s732_s12  ;;  %s27_s17 = sadd.s32 1, %s736_s13  ;;  %s744_s15 = sphi %s776_s15, %s12_s15   ;;  %s740_s14 = sphi %s774_s14, %s883_s14   ;;  %s736_s13 = sphi %s772_s13, %s882_s13   ;;  %s732_s12 = sphi %s770_s12, %s881_s12   ;;  %s728_s11 = sphi %s768_s11, %s880_s11   ;;  %s724_s10 = sphi %s766_s10, %s879_s10   ;;  %s720_s9 = sphi %s764_s9, %s878_s9  }
   0x5   : > { %p25_p0 = scmp.ge.s32.totalorder %s24_s16, 3  ;;  %p562_p1 = scmp.ge.s32.totalorder %s744_s15, 1 }
   0x6   : > { %p152_p2 = scmp.lt.s32.totalorder %s744_s15, 13  ;;  %s31_s18 = sadd.s32 1, %s740_s14 }
   0x7   : > { %s885_s16 = smov (%p25_p0, %s24_s16), 0  ;;  %s887_s17 = smov (!%p25_p0, %s27_s17), %s736_s13 }
   0x8   : > { %p153_p3 = pnand %p562_p1, %p152_p2  ;;  %p29_p4 = scmp.ge.s32.totalorder %s887_s17, 2 }
   0x9   : > { %s186_s19 = sadd.s32 (!%p153_p3), %s720_s9, %s724_s10  ;;  %p187_p6 = scmp.lt.s32.totalorder (!%p153_p3), %s728_s11, 1 }
   0xa   : > { %s889_s17 = smov (%p29_p4, %s887_s17), 0  ;;  %s891_s18 = smov (!%p29_p4, %s31_s18), %s740_s14 }
   0xb   : > { %p33_p5 = scmp.ge.s32.totalorder %s891_s18, 2  ;;  %156 = sbr.rel (%p153_p3) target bundleno = 242 (0xf2), region = 28 }
   0xc   : > { %p189_p7 = scmp.lt.s32.totalorder (!%p153_p3), %s186_s19, 3  ;;  %p196_p8 = scmp.lt.s32.totalorder (!%p153_p3), %s720_s9, 2 }
   0xd   : > { %s893_s18 = smov (%p33_p5, %s891_s18), 0  ;;  %p203_p9 = scmp.lt.s32.totalorder (!%p153_p3), %s724_s10, 1 }
   0xe   : > { %p568_p10 = scmp.ne.s32.totalorder (!%p153_p3), %s720_s9, 0 }
  0x10   : > { %s895_s11 = smov (!%p187_p6, %s728_s11), 1  ;;  %s897_s19 = smov (!%p189_p7, %s186_s19), 3 }
  0x11   : > { %s563_s20 = sshll.u32 %s895_s11, 2  ;;  %s566_s26 = sshll.u32 %s895_s11, 1 }
  0x12   : > { %s192_s21 = sadd.s32 %s563_s20, %s897_s19  ;;  %s899_s10 = smov (!%p203_p9, %s724_s10), 1 }
  0x13   : > { %s564_s22 = sshll.u32 %s192_s21, 2  ;;  %s206_s29 = sadd.s32 %s566_s26, %s899_s10 }
  0x14   : > { %s817_s25 = scalar_lea.vmem %s875_s0, %s564_s22  ;;  %s567_s5 = sshll.u32 %s206_s29, 1 }
  0x15   : > { %s197_s27 = scalar_select %p196_p8, %s720_s9, 2 }
  0x16   : > { %s829_s8 = scalar_lea.vmem %s877_s2, %s567_s5  ;;  %212 = sbr.rel (%p568_p10) target bundleno = 29 (0x1d), region = 32 }
  0x17   : > { %s630_s28 = smul.u32 96, %s197_s27 }
  0x19   : > { %s824_s4 = scalar_lea.vmem %s876_s1, %s630_s28 }
  0x1b   : > { %v746_v0 = vmov 0.0  }
  0x1c   : > { %213 = vst [vmem:[%s829_s8] sm:$0x3] %v746_v0 }
  0x1d PF: > { %v219_v1 = vld [vmem:[%s824_s4 + $0x18] sm:$0xff]  ;;  %v747_v3 = vmov 0.0   ;;  %v218_v4 = vld [vmem:[%s824_s4 + $0x10] sm:$0xff]  ;;  %v217_v6 = vld [vmem:[%s824_s4 + $0x8] sm:$0xff]  ;;  %vm748_vm0 = vmmov 0   ;;  %vm220_vm1 = vcmask 261120  }
  0x1e   : > { %v573_v2 = vld [vmem:[%s824_s4 + $0x38] sm:$0xff]  ;;  %597 = vmatprep.subr.mxu0 %v747_v3  ;;  %608 = vmatprep.subr.mxu1 %v747_v3  ;;  %v572_v5 = vld [vmem:[%s824_s4 + $0x30] sm:$0xff]  ;;  %v571_v7 = vld [vmem:[%s824_s4 + $0x28] sm:$0xff] }
  0x1f   : > { %598 = vmatpush3.msra.mxu0 %v219_v1  ;;  %609 = vmatpush3.msra.mxu1 %v573_v2  ;;  %v216_v8 = vld [vmem:[%s824_s4] sm:$0xff]  ;;  %v578_v10 = vld [vmem:[%s824_s4 + $0x58] sm:$0xff]  ;;  %v577_v13 = vld [vmem:[%s824_s4 + $0x50] sm:$0xff] }
  0x20   : > { %599 = vmatprep.subr.mxu0 %v747_v3  ;;  %610 = vmatprep.subr.mxu1 %v747_v3  ;;  %v214_v9 = vld [vmem:[%s817_s25] sm:$0xf]  ;;  %v576_v14 = vld [vmem:[%s824_s4 + $0x48] sm:$0xff] }
  0x21   : > { %600 = vmatpush3.msra.mxu0 %v218_v4  ;;  %611 = vmatpush3.msra.mxu1 %v572_v5  ;;  %v570_v11 = vld [vmem:[%s824_s4 + $0x20] sm:$0xff]  ;;  %v300_v12 = vrot.slane %v214_v9, 1  ;;  %v379_v15 = vrot.slane %v214_v9, 2 }
  0x22   : > { %601 = vmatprep.subr.mxu0 %v747_v3  ;;  %605 = vmatprep.mubr.msk.f32.mxu0 %vm748_vm0, %v747_v3  ;;  %v575_v16 = vld [vmem:[%s824_s4 + $0x40] sm:$0xff] }
  0x23   : > { %602 = vmatpush3.msra.mxu0 %v217_v6  ;;  %612 = vmatprep.subr.mxu1 %v747_v3  ;;  %v215_v17 = vld [vmem:[%s829_s8] sm:$0x3] }
  0x24   : > { %603 = vmatprep.subr.mxu0 %v747_v3  ;;  %613 = vmatpush3.msra.mxu1 %v571_v7 }
  0x25   : > { %604 = vmatpush3.msra.mxu0 %v216_v8  ;;  %614 = vmatprep.subr.mxu1 %v747_v3 }
  0x26   : > { %606 = vmatmul.mubr.msk.f32.vlgmr.msra.gmra.mxu0 %vm220_vm1, %v214_v9  ;;  %619 = vmatprep.subr.mxu0 %v747_v3 }
  0x27   : > { %620 = vmatpush3.msra.mxu0 %v578_v10  ;;  %615 = vmatpush3.msra.mxu1 %v570_v11 }
  0x28   : > { %616 = vmatprep.mubr.msk.f32.mxu1 %vm748_vm0, %v747_v3  ;;  %621 = vmatprep.subr.mxu0 %v747_v3 }
  0x29   : > { %617 = vmatmul.mubr.msk.f32.vlgmr.msra.gmra.mxu1 %vm220_vm1, %v300_v12  ;;  %622 = vmatpush3.msra.mxu0 %v577_v13 }
  0x2a   : > { %623 = vmatprep.subr.mxu0 %v747_v3  ;;  %627 = vmatprep.mubr.msk.f32.mxu0 %vm748_vm0, %v747_v3 }
  0x2b   : > { %624 = vmatpush3.msra.mxu0 %v576_v14 }
  0x2c   : > { %625 = vmatprep.subr.mxu0 %v747_v3 }
  0x2d   : > { %626 = vmatpush3.msra.mxu0 %v575_v16 }
  0x2e   : > { %628 = vmatmul.mubr.msk.f32.vlgmr.msra.gmra.mxu0 %vm220_vm1, %v379_v15 }
  0xe6   : > { %v290_v18 = vpop.f32.mrf.mxu0 }
  0xe7   : > { %v294_v20 = vadd.f32 %v290_v18, %v215_v17 }
  0xe8   : > { %v607_v19 = vpop.f32.mrf.mxu0 }
  0xe9   : > { %v369_v21 = vpop.f32.mrf.mxu1 }
  0xea   : > { %v373_v23 = vadd.f32 %v369_v21, %v294_v20 }
  0xeb   : > { %v618_v22 = vpop.f32.mrf.mxu1 }
  0xee   : > { %v448_v24 = vpop.f32.mrf.mxu0 }
  0xef   : > { %v452_v25 = vadd.f32 %v448_v24, %v373_v23 }
  0xf0   : > { %v629_v26 = vpop.f32.mrf.mxu0 }
  0xf1   : > { %453 = vst [vmem:[%s829_s8] sm:$0x3] %v452_v25 }
  0xf2 PF: > { %s12_s15 = sadd.s32 1, %s744_s15   ;;  %s878_s9 = smov %s732_s12 }
  0xf3   : > { %p9_p11 = scmp.ge.s32.totalorder %s12_s15, 14   ;;  %s879_s10 = smov %s736_s13 }
  0xf4   : > { %s880_s11 = smov %s740_s14  ;;  %s881_s12 = smov %s885_s16 }
  0xf5   : > { %s882_s13 = smov %s889_s17  ;;  %s883_s14 = smov %s893_s18 }
  0xf6   :  { %11 = sbr.rel (!%p9_p11) target bundleno = 4 (0x4), region = 67 }

// kernel: fcrn_ecml_forward.44
= control target key start
LH: loop header
LB: loop body
LE: loop exit
PB: predicated region body
PF: predicated region fallthrough
CT: control target
= control target key end

     0   :  { %v17_v0 = vlaneseq  ;;  %v96_v1 = vmov 1983009808   ;;  %s129_s1 = inlined_call_operand.vmem [shape: f32[1,512], index: 1, kind: input, shape index: {}]   ;;  %s130_s2 = inlined_call_operand.vmem [shape: f32[1,512], index: 2, kind: input, shape index: {}]   ;;  %s131_s0 = inlined_call_operand.vmem [shape: f32[2,512], index: 0, kind: input, shape index: {}]   ;;  %s132_s3 = inlined_call_operand.vmem [shape: f32[2,512], index: 3, kind: output, shape index: {}]  }
   0x1   :  { %v36_v2 = vunpack.c.l.s4 %v96_v1  ;;  %v15_v4 = vld [vmem:[%s129_s1] sm:$0xf] }
   0x2   :  { %v18_v3 = vshrl.u32 %v17_v0, 7  ;;  %v52_v10 = vld [vmem:[%s130_s2] sm:$0xf] }
   0x3   :  { %v37_v5 = vunpack.c.0.s8 %v36_v2  ;;  %v14_v26 = vld [vmem:[%s131_s0] sm:$0xff] }
   0x4   :  { %v19_v6 = vsub.s32 0, %v18_v3  ;;  %v23_v7 = vsub.s32 1, %v18_v3  ;;  %v27_v8 = vsub.s32 2, %v18_v3  ;;  %v31_v9 = vsub.s32 3, %v18_v3 }
   0x5   :  { %v40_v11 = vsub.s32 %v37_v5, %v18_v3 }
   0x6   :  { %v20_v12 = vrot.slane %v15_v4, %v19_v6  ;;  %v24_v13 = vrot.slane %v15_v4, %v23_v7  ;;  %v28_v14 = vrot.slane %v15_v4, %v27_v8  ;;  %v32_v15 = vrot.slane %v15_v4, %v31_v9 }
   0x7   :  { %v57_v16 = vrot.slane %v52_v10, %v19_v6  ;;  %v61_v17 = vrot.slane %v52_v10, %v23_v7  ;;  %v65_v18 = vrot.slane %v52_v10, %v27_v8  ;;  %v69_v19 = vrot.slane %v52_v10, %v31_v9 }
   0x8   :  { %v33_v20 = vcombine.low %v20_v12, %v24_v13  ;;  %v34_v21 = vcombine.low %v28_v14, %v32_v15 }
   0x9   :  { %v70_v22 = vcombine.low %v57_v16, %v61_v17  ;;  %v71_v23 = vcombine.low %v65_v18, %v69_v19 }
   0xa   :  { %v41_v24 = vrot.slane %v33_v20, %v40_v11  ;;  %v48_v25 = vrot.slane %v34_v21, %v40_v11 }
   0xb   :  { %v78_v27 = vrot.slane %v70_v22, %v40_v11  ;;  %v85_v28 = vrot.slane %v71_v23, %v40_v11 }
   0xc   :  { %v49_v29 = vcombine.low %v41_v24, %v48_v25 }
   0xd   :  { %v86_v30 = vcombine.low %v78_v27, %v85_v28 }
   0xe   :  { %v51_v31 = vmul.f32 %v49_v29, %v14_v26 }
  0x10   :  { %v88_v32 = vadd.f32 %v86_v30, %v51_v31 }
  0x12   :  { %v89_v33 = vmax.f32 %v88_v32, 0.0 }
  0x14   :  { %90 = vst [vmem:[%s132_s3] sm:$0xff] %v89_v33 }

// kernel: fcrn_ecml_forward.45
= control target key start
LH: loop header
LB: loop body
LE: loop exit
PB: predicated region body
PF: predicated region fallthrough
CT: control target
= control target key end

     0   :  { %v157_v0 = vmov 0.0   ;;  %vm158_vm0 = vmmov 0   ;;  %s228_s1 = inlined_call_operand.vmem [shape: f32[128,128], index: 1, kind: input, shape index: {}]   ;;  %s229_s0 = inlined_call_operand.vmem [shape: f32[8,128], index: 0, kind: input, shape index: {}]   ;;  %s230_s2 = inlined_call_operand.vmem [shape: f32[8,128], index: 2, kind: output, shape index: {}]  }
   0x1   :  { %120 = vmatprep.subr.mxu0 %v157_v0  ;;  %v27_v1 = vld [vmem:[%s228_s1 + $0x78] sm:$0xff]  ;;  %v26_v2 = vld [vmem:[%s228_s1 + $0x70] sm:$0xff]  ;;  %152 = vmatprep.mubr.msk.f32.mxu0 %vm158_vm0, %v157_v0  ;;  %v25_v3 = vld [vmem:[%s228_s1 + $0x68] sm:$0xff] }
   0x2   :  { %121 = vmatpush3.msra.mxu0 %v27_v1  ;;  %v24_v4 = vld [vmem:[%s228_s1 + $0x60] sm:$0xff]  ;;  %v23_v5 = vld [vmem:[%s228_s1 + $0x58] sm:$0xff]  ;;  %v22_v6 = vld [vmem:[%s228_s1 + $0x50] sm:$0xff] }
   0x3   :  { %122 = vmatprep.subr.mxu0 %v157_v0  ;;  %v21_v7 = vld [vmem:[%s228_s1 + $0x48] sm:$0xff]  ;;  %v20_v8 = vld [vmem:[%s228_s1 + $0x40] sm:$0xff]  ;;  %v19_v9 = vld [vmem:[%s228_s1 + $0x38] sm:$0xff] }
   0x4   :  { %123 = vmatpush3.msra.mxu0 %v26_v2  ;;  %v18_v10 = vld [vmem:[%s228_s1 + $0x30] sm:$0xff]  ;;  %v17_v11 = vld [vmem:[%s228_s1 + $0x28] sm:$0xff]  ;;  %v16_v12 = vld [vmem:[%s228_s1 + $0x20] sm:$0xff] }
   0x5   :  { %124 = vmatprep.subr.mxu0 %v157_v0  ;;  %v15_v13 = vld [vmem:[%s228_s1 + $0x18] sm:$0xff]  ;;  %v14_v14 = vld [vmem:[%s228_s1 + $0x10] sm:$0xff]  ;;  %v13_v15 = vld [vmem:[%s228_s1 + $0x8] sm:$0xff] }
   0x6   :  { %125 = vmatpush3.msra.mxu0 %v25_v3  ;;  %v12_v16 = vld [vmem:[%s228_s1] sm:$0xff] }
   0x7   :  { %126 = vmatprep.subr.mxu0 %v157_v0  ;;  %v11_v17 = vld [vmem:[%s229_s0] sm:$0xff] }
   0x8   :  { %127 = vmatpush3.msra.mxu0 %v24_v4 }
   0x9   :  { %128 = vmatprep.subr.mxu0 %v157_v0 }
   0xa   :  { %129 = vmatpush3.msra.mxu0 %v23_v5 }
   0xb   :  { %130 = vmatprep.subr.mxu0 %v157_v0 }
   0xc   :  { %131 = vmatpush3.msra.mxu0 %v22_v6 }
   0xd   :  { %132 = vmatprep.subr.mxu0 %v157_v0 }
   0xe   :  { %133 = vmatpush3.msra.mxu0 %v21_v7 }
   0xf   :  { %134 = vmatprep.subr.mxu0 %v157_v0 }
  0x10   :  { %135 = vmatpush3.msra.mxu0 %v20_v8 }
  0x11   :  { %136 = vmatprep.subr.mxu0 %v157_v0 }
  0x12   :  { %137 = vmatpush3.msra.mxu0 %v19_v9 }
  0x13   :  { %138 = vmatprep.subr.mxu0 %v157_v0 }
  0x14   :  { %139 = vmatpush3.msra.mxu0 %v18_v10 }
  0x15   :  { %140 = vmatprep.subr.mxu0 %v157_v0 }
  0x16   :  { %141 = vmatpush3.msra.mxu0 %v17_v11 }
  0x17   :  { %142 = vmatprep.subr.mxu0 %v157_v0 }
  0x18   :  { %143 = vmatpush3.msra.mxu0 %v16_v12 }
  0x19   :  { %144 = vmatprep.subr.mxu0 %v157_v0 }
  0x1a   :  { %145 = vmatpush3.msra.mxu0 %v15_v13 }
  0x1b   :  { %146 = vmatprep.subr.mxu0 %v157_v0 }
  0x1c   :  { %147 = vmatpush3.msra.mxu0 %v14_v14 }
  0x1d   :  { %148 = vmatprep.subr.mxu0 %v157_v0 }
  0x1e   :  { %149 = vmatpush3.msra.mxu0 %v13_v15 }
  0x1f   :  { %150 = vmatprep.subr.mxu0 %v157_v0 }
  0x20   :  { %151 = vmatpush3.msra.mxu0 %v12_v16 }
  0x21   :  { %153 = vmatmul.mubr.f32.vlgmr.msra.gmra.mxu0 %v11_v17 }
  0xe1   :  { %v94_v18 = vpop.f32.mrf.mxu0 }
  0xe2   :  { %98 = vst [vmem:[%s230_s2] sm:$0xff] %v94_v18 }
  0xe3   :  { %v154_v19 = vpop.f32.mrf.mxu0 }

// kernel: fcrn_ecml_forward.49
= control target key start
LH: loop header
LB: loop body
LE: loop exit
PB: predicated region body
PF: predicated region fallthrough
CT: control target
= control target key end

     0   :  { %vm19_vm0 = vcmask 261120   ;;  %vm117_vm1 = vcmask 523264   ;;  %s211_s1 = inlined_call_operand.vmem [shape: f32[32,64], index: 1, kind: input, shape index: {}]   ;;  %s212_s0 = inlined_call_operand.vmem [shape: f32[32,32], index: 0, kind: input, shape index: {}]   ;;  %s213_s2 = inlined_call_operand.vmem [shape: f32[32,64], index: 2, kind: output, shape index: {}]  }
   0x1   :  { %v18_v0 = vld [vmem:[%s211_s1 + $0x18] sm:$0xff]  ;;  %v17_v1 = vld [vmem:[%s211_s1 + $0x10] sm:$0xff]  ;;  %v16_v2 = vld [vmem:[%s211_s1 + $0x8] sm:$0xff] }
   0x2   :  { %138 = vmatprep.subr.mxu0 %v18_v0  ;;  %152 = vmatprep.subr.mxu1 %v18_v0  ;;  %v15_v3 = vld [vmem:[%s211_s1] sm:$0xff]  ;;  %v13_v5 = vld [vmem:[%s212_s0 + $0x10] sm:$0xff]  ;;  %v12_v6 = vld [vmem:[%s212_s0 + $0x8] sm:$0xff] }
   0x3   :  { %139 = vmatpush3.msra.mxu0 %v18_v0  ;;  %156 = vmatpush3.msra.mxu1 %v18_v0  ;;  %v11_v4 = vld [vmem:[%s212_s0] sm:$0xff]  ;;  %v14_v7 = vld [vmem:[%s212_s0 + $0x18] sm:$0xff] }
   0x4   :  { %140 = vmatprep.subr.mxu0 %v17_v1  ;;  %153 = vmatprep.subr.mxu1 %v17_v1 }
   0x5   :  { %141 = vmatpush3.msra.mxu0 %v17_v1  ;;  %157 = vmatpush3.msra.mxu1 %v17_v1 }
   0x6   :  { %142 = vmatprep.subr.mxu0 %v16_v2  ;;  %154 = vmatprep.subr.mxu1 %v16_v2 }
   0x7   :  { %143 = vmatpush3.msra.mxu0 %v16_v2  ;;  %158 = vmatpush3.msra.mxu1 %v16_v2 }
   0x8   :  { %144 = vmatprep.subr.mxu0 %v15_v3  ;;  %155 = vmatprep.subr.mxu1 %v15_v3 }
   0x9   :  { %145 = vmatpush3.msra.mxu0 %v15_v3  ;;  %159 = vmatpush3.msra.mxu1 %v15_v3 }
   0xa   :  { %146 = vmatprep.mubr.msk.f32.mxu0 %vm19_vm0, %v11_v4  ;;  %149 = vmatprep.mubr.msk.f32.mxu1 %vm19_vm0, %v13_v5 }
   0xb   :  { %147 = vmatmul.mubr.msk.f32.vlgmr.msra.gmra.mxu0 %vm19_vm0, %v12_v6  ;;  %150 = vmatmul.mubr.msk.f32.vlgmr.msra.gmra.mxu1 %vm19_vm0, %v14_v7 }
  0xcb   :  { %v148_v8 = vpop.f32.mrf.mxu0  ;;  %v151_v9 = vpop.f32.mrf.mxu1 }
  0xcc   :  { %119 = vst.msk [vmem:[%s213_s2 + $0x8] sm:$0xff] %vm117_vm1, %v148_v8  ;;  %121 = vst.msk [vmem:[%s213_s2 + $0x18] sm:$0xff] %vm117_vm1, %v151_v9 }
  0xcd   :  { %v98_v10 = vpop.f32.mrf.mxu0  ;;  %v108_v11 = vpop.f32.mrf.mxu1 }
  0xce   :  { %118 = vst.msk [vmem:[%s213_s2] sm:$0xff] %vm117_vm1, %v98_v10  ;;  %120 = vst.msk [vmem:[%s213_s2 + $0x10] sm:$0xff] %vm117_vm1, %v108_v11 }

// kernel: fcrn_ecml_forward.52
= control target key start
LH: loop header
LB: loop body
LE: loop exit
PB: predicated region body
PF: predicated region fallthrough
CT: control target
= control target key end

     0   :  { %v18_v0 = vlaneseq  ;;  %s110_s1 = inlined_call_operand.vmem [shape: f32[1,512], index: 1, kind: input, shape index: {}]   ;;  %s111_s2 = inlined_call_operand.vmem [shape: f32[1,512], index: 2, kind: input, shape index: {}]   ;;  %s112_s0 = inlined_call_operand.vmem [shape: f32[4,512], index: 0, kind: input, shape index: {}]   ;;  %s113_s3 = inlined_call_operand.vmem [shape: f32[4,512], index: 3, kind: output, shape index: {}]  }
   0x1   :  { %v16_v2 = vld [vmem:[%s110_s1] sm:$0xf]  ;;  %v15_v19 = vld [vmem:[%s112_s0 + $0x8] sm:$0xff] }
   0x2   :  { %v19_v1 = vshrl.u32 %v18_v0, 7  ;;  %v40_v3 = vld [vmem:[%s111_s2] sm:$0xf] }
   0x3   :  { %v14_v12 = vld [vmem:[%s112_s0] sm:$0xff] }
   0x4   :  { %v20_v4 = vsub.s32 0, %v19_v1  ;;  %v24_v5 = vsub.s32 1, %v19_v1  ;;  %v28_v6 = vsub.s32 2, %v19_v1  ;;  %v32_v7 = vsub.s32 3, %v19_v1 }
   0x6   :  { %v21_v8 = vrot.slane %v16_v2, %v20_v4  ;;  %v25_v9 = vrot.slane %v16_v2, %v24_v5  ;;  %v45_v10 = vrot.slane %v40_v3, %v20_v4  ;;  %v49_v11 = vrot.slane %v40_v3, %v24_v5 }
   0x7   :  { %v29_v13 = vrot.slane %v16_v2, %v28_v6  ;;  %v33_v14 = vrot.slane %v16_v2, %v32_v7  ;;  %v53_v15 = vrot.slane %v40_v3, %v28_v6  ;;  %v57_v16 = vrot.slane %v40_v3, %v32_v7 }
   0x8   :  { %v34_v17 = vcombine.low %v21_v8, %v25_v9  ;;  %v58_v18 = vcombine.low %v45_v10, %v49_v11 }
   0x9   :  { %v35_v20 = vcombine.low %v29_v13, %v33_v14  ;;  %v59_v21 = vcombine.low %v53_v15, %v57_v16 }
   0xa   :  { %v38_v22 = vmul.f32 %v34_v17, %v14_v12 }
   0xb   :  { %v39_v23 = vmul.f32 %v35_v20, %v15_v19 }
   0xc   :  { %v62_v24 = vadd.f32 %v58_v18, %v38_v22 }
   0xd   :  { %v63_v25 = vadd.f32 %v59_v21, %v39_v23 }
   0xe   :  { %v64_v26 = vmax.f32 %v62_v24, 0.0 }
   0xf   :  { %v65_v27 = vmax.f32 %v63_v25, 0.0 }
  0x10   :  { %66 = vst [vmem:[%s113_s3] sm:$0xff] %v64_v26 }
  0x11   :  { %67 = vst [vmem:[%s113_s3 + $0x8] sm:$0xff] %v65_v27 }

// kernel: fcrn_ecml_forward.53
= control target key start
LH: loop header
LB: loop body
LE: loop exit
PB: predicated region body
PF: predicated region fallthrough
CT: control target
= control target key end

     0   :  { %vm29_vm0 = vcmask 130048   ;;  %vm223_vm1 = vcmask 261120   ;;  %s459_s1 = inlined_call_operand.vmem [shape: f32[16,32], index: 1, kind: input, shape index: {}]   ;;  %s460_s0 = inlined_call_operand.vmem [shape: f32[128,16], index: 0, kind: input, shape index: {}]   ;;  %s461_s2 = inlined_call_operand.vmem [shape: f32[128,32], index: 2, kind: output, shape index: {}]  }
   0x1   :  { %v28_v0 = vld [vmem:[%s459_s1 + $0x8] sm:$0xff]  ;;  %v27_v1 = vld [vmem:[%s459_s1] sm:$0xff]  ;;  %v13_v6 = vld [vmem:[%s460_s0 + $0x10] sm:$0xff] }
   0x2   :  { %278 = vmatprep.subr.mxu0 %v28_v0  ;;  %306 = vmatprep.subr.mxu1 %v28_v0  ;;  %v11_v2 = vld [vmem:[%s460_s0] sm:$0xff]  ;;  %v12_v4 = vld [vmem:[%s460_s0 + $0x8] sm:$0xff]  ;;  %v21_v7 = vld [vmem:[%s460_s0 + $0x50] sm:$0xff] }
   0x3   :  { %279 = vmatpush3.msra.mxu0 %v28_v0  ;;  %308 = vmatpush3.msra.mxu1 %v28_v0  ;;  %v19_v3 = vld [vmem:[%s460_s0 + $0x40] sm:$0xff]  ;;  %v20_v5 = vld [vmem:[%s460_s0 + $0x48] sm:$0xff]  ;;  %v14_v8 = vld [vmem:[%s460_s0 + $0x18] sm:$0xff] }
   0x4   :  { %280 = vmatprep.subr.mxu0 %v27_v1  ;;  %307 = vmatprep.subr.mxu1 %v27_v1  ;;  %v22_v9 = vld [vmem:[%s460_s0 + $0x58] sm:$0xff]  ;;  %v15_v10 = vld [vmem:[%s460_s0 + $0x20] sm:$0xff]  ;;  %v16_v12 = vld [vmem:[%s460_s0 + $0x28] sm:$0xff] }
   0x5   :  { %281 = vmatpush3.msra.mxu0 %v27_v1  ;;  %309 = vmatpush3.msra.mxu1 %v27_v1  ;;  %v23_v11 = vld [vmem:[%s460_s0 + $0x60] sm:$0xff]  ;;  %v24_v13 = vld [vmem:[%s460_s0 + $0x68] sm:$0xff]  ;;  %v17_v14 = vld [vmem:[%s460_s0 + $0x30] sm:$0xff] }
   0x6   :  { %282 = vmatprep.mubr.msk.f32.mxu0 %vm29_vm0, %v11_v2  ;;  %294 = vmatprep.mubr.msk.f32.mxu1 %vm29_vm0, %v19_v3  ;;  %v25_v15 = vld [vmem:[%s460_s0 + $0x70] sm:$0xff]  ;;  %v18_v16 = vld [vmem:[%s460_s0 + $0x38] sm:$0xff] }
   0x7   :  { %283 = vmatmul.mubr.msk.f32.vlgmr.msra.gmra.mxu0 %vm29_vm0, %v12_v4  ;;  %295 = vmatmul.mubr.msk.f32.vlgmr.msra.gmra.mxu1 %vm29_vm0, %v20_v5  ;;  %v26_v17 = vld [vmem:[%s460_s0 + $0x78] sm:$0xff] }
   0x8   :  { %285 = vmatprep.mubr.msk.f32.mxu0 %vm29_vm0, %v13_v6  ;;  %297 = vmatprep.mubr.msk.f32.mxu1 %vm29_vm0, %v21_v7 }
   0xb   :  { %286 = vmatmul.mubr.msk.f32.gmra.mxu0 %vm29_vm0, %v14_v8  ;;  %298 = vmatmul.mubr.msk.f32.gmra.mxu1 %vm29_vm0, %v22_v9 }
   0xc   :  { %288 = vmatprep.mubr.msk.f32.mxu0 %vm29_vm0, %v15_v10  ;;  %300 = vmatprep.mubr.msk.f32.mxu1 %vm29_vm0, %v23_v11 }
   0xf   :  { %289 = vmatmul.mubr.msk.f32.gmra.mxu0 %vm29_vm0, %v16_v12  ;;  %301 = vmatmul.mubr.msk.f32.gmra.mxu1 %vm29_vm0, %v24_v13 }
  0x10   :  { %291 = vmatprep.mubr.msk.f32.mxu0 %vm29_vm0, %v17_v14  ;;  %303 = vmatprep.mubr.msk.f32.mxu1 %vm29_vm0, %v25_v15 }
  0x13   :  { %292 = vmatmul.mubr.msk.f32.gmra.mxu0 %vm29_vm0, %v18_v16  ;;  %304 = vmatmul.mubr.msk.f32.gmra.mxu1 %vm29_vm0, %v26_v17 }
  0xc7   :  { %v284_v18 = vpop.f32.mrf.mxu0  ;;  %v296_v19 = vpop.f32.mrf.mxu1 }
  0xc8   :  { %225 = vst.msk [vmem:[%s461_s2 + $0x8] sm:$0xff] %vm223_vm1, %v284_v18  ;;  %233 = vst.msk [vmem:[%s461_s2 + $0x48] sm:$0xff] %vm223_vm1, %v296_v19 }
  0xc9   :  { %v144_v20 = vpop.f32.mrf.mxu0  ;;  %v184_v21 = vpop.f32.mrf.mxu1 }
  0xca   :  { %224 = vst.msk [vmem:[%s461_s2] sm:$0xff] %vm223_vm1, %v144_v20  ;;  %232 = vst.msk [vmem:[%s461_s2 + $0x40] sm:$0xff] %vm223_vm1, %v184_v21 }
  0xcb   :  { %v287_v22 = vpop.f32.mrf.mxu0  ;;  %v299_v23 = vpop.f32.mrf.mxu1 }
  0xcc   :  { %227 = vst.msk [vmem:[%s461_s2 + $0x18] sm:$0xff] %vm223_vm1, %v287_v22  ;;  %235 = vst.msk [vmem:[%s461_s2 + $0x58] sm:$0xff] %vm223_vm1, %v299_v23 }
  0xcd   :  { %v154_v24 = vpop.f32.mrf.mxu0  ;;  %v194_v25 = vpop.f32.mrf.mxu1 }
  0xce   :  { %226 = vst.msk [vmem:[%s461_s2 + $0x10] sm:$0xff] %vm223_vm1, %v154_v24  ;;  %234 = vst.msk [vmem:[%s461_s2 + $0x50] sm:$0xff] %vm223_vm1, %v194_v25 }
  0xcf   :  { %v290_v26 = vpop.f32.mrf.mxu0  ;;  %v302_v27 = vpop.f32.mrf.mxu1 }
  0xd0   :  { %229 = vst.msk [vmem:[%s461_s2 + $0x28] sm:$0xff] %vm223_vm1, %v290_v26  ;;  %237 = vst.msk [vmem:[%s461_s2 + $0x68] sm:$0xff] %vm223_vm1, %v302_v27 }
  0xd1   :  { %v164_v28 = vpop.f32.mrf.mxu0  ;;  %v204_v29 = vpop.f32.mrf.mxu1 }
  0xd2   :  { %228 = vst.msk [vmem:[%s461_s2 + $0x20] sm:$0xff] %vm223_vm1, %v164_v28  ;;  %236 = vst.msk [vmem:[%s461_s2 + $0x60] sm:$0xff] %vm223_vm1, %v204_v29 }
  0xd3   :  { %v293_v30 = vpop.f32.mrf.mxu0  ;;  %v305_v31 = vpop.f32.mrf.mxu1 }
  0xd4   :  { %231 = vst.msk [vmem:[%s461_s2 + $0x38] sm:$0xff] %vm223_vm1, %v293_v30  ;;  %239 = vst.msk [vmem:[%s461_s2 + $0x78] sm:$0xff] %vm223_vm1, %v305_v31 }
  0xd5   :  { %v174_v32 = vpop.f32.mrf.mxu0  ;;  %v214_v33 = vpop.f32.mrf.mxu1 }
  0xd6   :  { %230 = vst.msk [vmem:[%s461_s2 + $0x30] sm:$0xff] %vm223_vm1, %v174_v32  ;;  %238 = vst.msk [vmem:[%s461_s2 + $0x70] sm:$0xff] %vm223_vm1, %v214_v33 }

// kernel: fcrn_ecml_forward.56
= control target key start
LH: loop header
LB: loop body
LE: loop exit
PB: predicated region body
PF: predicated region fallthrough
CT: control target
= control target key end

     0   :  { %v20_v0 = vlaneseq  ;;  %s132_s1 = inlined_call_operand.vmem [shape: f32[1,512], index: 1, kind: input, shape index: {}]   ;;  %s133_s2 = inlined_call_operand.vmem [shape: f32[1,512], index: 2, kind: input, shape index: {}]   ;;  %s134_s0 = inlined_call_operand.vmem [shape: f32[8,512], index: 0, kind: input, shape index: {}]   ;;  %s135_s3 = inlined_call_operand.vmem [shape: f32[8,512], index: 3, kind: output, shape index: {}]  }
   0x1   :  { %v18_v2 = vld [vmem:[%s132_s1] sm:$0xf]  ;;  %v15_v9 = vld [vmem:[%s134_s0 + $0x8] sm:$0xff]  ;;  %v16_v14 = vld [vmem:[%s134_s0 + $0x10] sm:$0xff] }
   0x2   :  { %v21_v1 = vshrl.u32 %v20_v0, 7  ;;  %v44_v3 = vld [vmem:[%s133_s2] sm:$0xf]  ;;  %v17_v15 = vld [vmem:[%s134_s0 + $0x18] sm:$0xff] }
   0x3   :  { %v14_v8 = vld [vmem:[%s134_s0] sm:$0xff] }
   0x4   :  { %v22_v4 = vsub.s32 0, %v21_v1  ;;  %v26_v5 = vsub.s32 1, %v21_v1  ;;  %v30_v6 = vsub.s32 2, %v21_v1  ;;  %v34_v7 = vsub.s32 3, %v21_v1 }
   0x6   :  { %v23_v10 = vrot.slane %v18_v2, %v22_v4  ;;  %v49_v11 = vrot.slane %v44_v3, %v22_v4  ;;  %v27_v12 = vrot.slane %v18_v2, %v26_v5  ;;  %v53_v13 = vrot.slane %v44_v3, %v26_v5 }
   0x7   :  { %v31_v16 = vrot.slane %v18_v2, %v30_v6  ;;  %v57_v17 = vrot.slane %v44_v3, %v30_v6  ;;  %v35_v18 = vrot.slane %v18_v2, %v34_v7  ;;  %v61_v19 = vrot.slane %v44_v3, %v34_v7 }
   0x8   :  { %v40_v20 = vmul.f32 %v23_v10, %v14_v8  ;;  %v41_v21 = vmul.f32 %v27_v12, %v15_v9 }
   0x9   :  { %v42_v22 = vmul.f32 %v31_v16, %v16_v14  ;;  %v43_v23 = vmul.f32 %v35_v18, %v17_v15 }
   0xa   :  { %v66_v24 = vadd.f32 %v49_v11, %v40_v20  ;;  %v67_v25 = vadd.f32 %v53_v13, %v41_v21 }
   0xb   :  { %v68_v26 = vadd.f32 %v57_v17, %v42_v22  ;;  %v69_v27 = vadd.f32 %v61_v19, %v43_v23 }
   0xc   :  { %v70_v28 = vmax.f32 %v66_v24, 0.0  ;;  %v71_v29 = vmax.f32 %v67_v25, 0.0 }
   0xd   :  { %v72_v30 = vmax.f32 %v68_v26, 0.0  ;;  %v73_v31 = vmax.f32 %v69_v27, 0.0 }
   0xe   :  { %74 = vst [vmem:[%s135_s3] sm:$0xff] %v70_v28  ;;  %75 = vst [vmem:[%s135_s3 + $0x8] sm:$0xff] %v71_v29 }
   0xf   :  { %76 = vst [vmem:[%s135_s3 + $0x10] sm:$0xff] %v72_v30  ;;  %77 = vst [vmem:[%s135_s3 + $0x18] sm:$0xff] %v73_v31 }

// kernel: fcrn_ecml_forward.57
= control target key start
LH: loop header
LB: loop body
LE: loop exit
PB: predicated region body
PF: predicated region fallthrough
CT: control target
= control target key end

     0   :  { %s632_s14 = smov 0   ;;  %s634_s15 = smov 0   ;;  %s732_s0 = inlined_call_operand.vmem [shape: f32[2,18,18,8], index: 0, kind: input, shape index: {}]   ;;  %s733_s1 = inlined_call_operand.vmem [shape: f32[3,3,1,8], index: 1, kind: input, shape index: {}]   ;;  %s734_s2 = inlined_call_operand.<no memory space> [shape: f32[1,1], index: 2, kind: input, shape index: {}]   ;;  %s735_s3 = inlined_call_operand.vmem [shape: f32[2,16,16,1], index: 3, kind: output, shape index: {}]  }
   0x1   :  { %v8_v0 = vstv %s734_s2  ;;  %s636_s16 = smov 0   ;;  %s638_s17 = smov 0  }
   0x2   :  { %9 = vst [vmem:[#allocation2] sm:$0x1] %v8_v0  ;;  %s640_s18 = smov 0   ;;  %s642_s19 = smov 0  }
   0x3   :  { %s644_s20 = smov 0  }
   0x4 LB: > { %s27_s2 = sadd.s32 1, %s594_s17  ;;  %s30_s21 = sadd.s32 1, %s598_s18  ;;  %s606_s20 = sphi %s644_s20, %s15_s20   ;;  %s602_s19 = sphi %s642_s19, %s741_s19   ;;  %s598_s18 = sphi %s640_s18, %s740_s18   ;;  %s594_s17 = sphi %s638_s17, %s739_s17   ;;  %s590_s16 = sphi %s636_s16, %s738_s16   ;;  %s586_s15 = sphi %s634_s15, %s737_s15   ;;  %s582_s14 = sphi %s632_s14, %s736_s14  }
   0x5   : > { %p28_p0 = scmp.ge.s32.totalorder %s27_s2, 3  ;;  %p477_p1 = scmp.ge.s32.totalorder %s606_s20, 1 }
   0x6   : > { %p179_p2 = scmp.lt.s32.totalorder %s606_s20, 97  ;;  %s34_s22 = sadd.s32 1, %s602_s19 }
   0x7   : > { %s743_s2 = smov (%p28_p0, %s27_s2), 0  ;;  %s745_s21 = smov (!%p28_p0, %s30_s21), %s598_s18 }
   0x8   : > { %p180_p3 = pnand %p477_p1, %p179_p2  ;;  %p32_p4 = scmp.ge.s32.totalorder %s745_s21, 16 }
   0x9   : > { %s216_s23 = sadd.s32 (!%p180_p3), %s582_s14, %s586_s15  ;;  %p217_p6 = scmp.lt.s32.totalorder (!%p180_p3), %s590_s16, 1 }
   0xa   : > { %s747_s21 = smov (%p32_p4, %s745_s21), 0  ;;  %s749_s22 = smov (!%p32_p4, %s34_s22), %s602_s19 }
   0xb   : > { %p36_p5 = scmp.ge.s32.totalorder %s749_s22, 2  ;;  %183 = sbr.rel (%p180_p3) target bundleno = 202 (0xca), region = 32 }
   0xc   : > { %p219_p7 = scmp.lt.s32.totalorder (!%p180_p3), %s216_s23, 17  ;;  %p227_p8 = scmp.lt.s32.totalorder (!%p180_p3), %s582_s14, 2 }
   0xd   : > { %s751_s22 = smov (%p36_p5, %s749_s22), 0  ;;  %p233_p9 = scmp.lt.s32.totalorder (!%p180_p3), %s586_s15, 15 }
   0xe   : > { %p482_p10 = scmp.ne.s32.totalorder (!%p180_p3), %s582_s14, 0 }
  0x10   : > { %s753_s16 = smov (!%p217_p6, %s590_s16), 1  ;;  %s755_s23 = smov (!%p219_p7, %s216_s23), 17 }
  0x11   : > { %s493_s24 = smul.u32 54, %s753_s16  ;;  %s480_s9 = sshll.u32 %s753_s16, 5 }
  0x12   : > { %s492_s25 = smul.u32 3, %s755_s23  ;;  %s757_s15 = smov (!%p233_p9, %s586_s15), 15 }
  0x13   : > { %s228_s26 = scalar_select %p227_p8, %s582_s14, 2 }
  0x14   : > { %s223_s27 = sadd.s32 %s493_s24, %s492_s25  ;;  %s479_s10 = sshll.u32 %s757_s15, 1 }
  0x15   : > { %s478_s28 = sshll.u32 %s223_s27, 3  ;;  %s494_s29 = smul.u32 3, %s228_s26 }
  0x16   : > { %s225_s5 = scalar_lea.vmem %s732_s0, %s478_s28  ;;  %s237_s11 = sadd.s32 %s480_s9, %s479_s10 }
  0x17   : > { %s230_s8 = scalar_lea.vmem %s733_s1, %s494_s29  ;;  %s481_s12 = sshll.u32 %s237_s11, 3 }
  0x18   : > { %s693_s24 = scalar_lea.vmem %s735_s3, %s481_s12  ;;  %243 = sbr.rel (%p482_p10) target bundleno = 31 (0x1f), region = 36 }
  0x1d   : > { %vm244_vm0 = vcmask 7168   ;;  %v608_v1 = vmov 0.0  }
  0x1e   : > { %245 = vst.msk [vmem:[%s693_s24] sm:$0xff] %vm244_vm0, %v608_v1  ;;  %246 = vst.msk [vmem:[%s693_s24 + $0x8] sm:$0xff] %vm244_vm0, %v608_v1 }
  0x1f PF: > { %v249_v2 = vld [vmem:[%s225_s5 + $0x10] sm:$0x3]  ;;  %v485_v3 = vld [vmem:[%s230_s8 + $0x1] ss:$0 sm:$0xff]  ;;  %vm288_vm1 = vcmask 57344   ;;  %vm281_vm2 = vcmask 64513  }
  0x20   : > { %v247_v4 = vld [vmem:[%s225_s5] sm:$0xff]  ;;  %v280_v5 = vmul.f32 %v485_v3, %v249_v2  ;;  %v248_v7 = vld [vmem:[%s225_s5 + $0x8] sm:$0xff]  ;;  %vm261_vm3 = vcmask 64512   ;;  %vm316_vm4 = vcmask 64514   ;;  %vm323_vm5 = vcmask 58368   ;;  %p488_p11 = scmp.ne.s32.totalorder %s582_s14, 2 }
  0x21   : > { %v278_v6 = vmul.f32 %v485_v3, %v247_v4  ;;  %v483_v8 = vld [vmem:[%s230_s8] ss:$0 sm:$0xff]  ;;  %v279_v9 = vmul.f32 %v485_v3, %v248_v7  ;;  %v487_v11 = vld [vmem:[%s230_s8 + $0x2] ss:$0 sm:$0xff]  ;;  %vm295_vm6 = vcmask 1046528   ;;  %vm330_vm7 = vcmask 1045504  }
  0x22   : > { %v259_v10 = vmul.f32 %v483_v8, %v247_v4  ;;  %v289_v12 = vsel %vm288_vm1, %v280_v5, 0.0  ;;  %v260_v16 = vmul.f32 %v483_v8, %v248_v7  ;;  %v313_v17 = vmul.f32 %v487_v11, %v247_v4 }
  0x23   : > { %v282_v13 = vsel %vm281_vm2, %v278_v6, 0.0  ;;  %290 = vadd.xlane.f32.xlu1 %v289_v12  ;;  %v285_v14 = vsel %vm261_vm3, %v279_v9, 0.0  ;;  %v314_v20 = vmul.f32 %v487_v11, %v248_v7  ;;  %v315_v21 = vmul.f32 %v487_v11, %v249_v2 }
  0x24   : > { %283 = vadd.xlane.f32.xlu0 %v282_v13  ;;  %v262_v15 = vsel %vm261_vm3, %v259_v10, 0.0  ;;  %v265_v18 = vsel %vm261_vm3, %v260_v16, 0.0  ;;  %v317_v19 = vsel %vm316_vm4, %v313_v17, 0.0  ;;  %vm340_vm8 = vcmask 7168  }
  0x25   : > { %v320_v22 = vsel %vm261_vm3, %v314_v20, 0.0  ;;  %v324_v23 = vsel %vm323_vm5, %v315_v21, 0.0  ;;  %v250_v29 = vld [vmem:[%s693_s24] sm:$0xff]  ;;  %v251_v30 = vld [vmem:[%s693_s24 + $0x8] sm:$0xff] }
  0x27   : > { %263 = vadd.xlane.f32.xlu1 %v262_v15 }
  0x28   : > { %286 = vadd.xlane.f32.xlu0 %v285_v14 }
  0x2b   : > { %318 = vadd.xlane.f32.xlu1 %v317_v19 }
  0x2c   : > { %266 = vadd.xlane.f32.xlu0 %v265_v18 }
  0x2f   : > { %325 = vadd.xlane.f32.xlu1 %v324_v23 }
  0x30   : > { %321 = vadd.xlane.f32.xlu0 %v320_v22 }
  0xac   : > { %v291_v24 = vpop.xlane.xlu1 %290 }
  0xad   : > { %v284_v25 = vpop.xlane.xlu0 %283  ;;  %v299_v36 = vrot.slane %v291_v24, 1 }
  0xae   : > { %v296_v33 = vrot.slane %v284_v25, 1 }
  0xb0   : > { %v264_v27 = vpop.xlane.xlu1 %263 }
  0xb1   : > { %v287_v26 = vpop.xlane.xlu0 %286  ;;  %v268_v34 = vadd.f32 %v264_v27, %v250_v29 }
  0xb2   : > { %v297_v28 = vrot.slane %v287_v26, 1 }
  0xb4   : > { %v319_v32 = vpop.xlane.xlu1 %318  ;;  %v298_v37 = vsel %vm295_vm6, %v296_v33, %v297_v28  ;;  %v300_v40 = vsel %vm295_vm6, %v297_v28, %v299_v36 }
  0xb5   : > { %v267_v31 = vpop.xlane.xlu0 %266  ;;  %v331_v41 = vrot.slane %v319_v32, 2  ;;  %v303_v44 = vadd.f32 %v298_v37, %v268_v34 }
  0xb6   : > { %v269_v35 = vadd.f32 %v267_v31, %v251_v30 }
  0xb8   : > { %v326_v39 = vpop.xlane.xlu1 %325  ;;  %v304_v45 = vadd.f32 %v300_v40, %v269_v35 }
  0xb9   : > { %v322_v38 = vpop.xlane.xlu0 %321  ;;  %v334_v43 = vrot.slane %v326_v39, 2 }
  0xba   : > { %v332_v42 = vrot.slane %v322_v38, 2 }
  0xbb   : > { %346 = sbr.rel (%p488_p11) target bundleno = 202 (0xca), region = 40 }
  0xbc   : > { %v333_v46 = vsel %vm330_vm7, %v331_v41, %v332_v42  ;;  %v335_v47 = vsel %vm330_vm7, %v332_v42, %v334_v43 }
  0xbd   : > { %v338_v48 = vadd.f32 %v333_v46, %v303_v44  ;;  %v339_v49 = vadd.f32 %v335_v47, %v304_v45 }
  0xbf   : > { %341 = vst.msk [vmem:[%s693_s24] sm:$0xff] %vm340_vm8, %v338_v48  ;;  %342 = vst.msk [vmem:[%s693_s24 + $0x8] sm:$0xff] %vm340_vm8, %v339_v49 }
  0xc0   : > { %v489_v51 = vld [vmem:[#allocation2] ss:$0 sm:$0xff] }
  0xc6   : > { %v347_v50 = vld [vmem:[%s693_s24] sm:$0xff]  ;;  %v348_v52 = vld [vmem:[%s693_s24 + $0x8] sm:$0xff] }
  0xc7   : > { %v356_v53 = vadd.f32 %v489_v51, %v347_v50  ;;  %v357_v54 = vadd.f32 %v489_v51, %v348_v52 }
  0xc9   : > { %358 = vst.msk [vmem:[%s693_s24] sm:$0xff] %vm340_vm8, %v356_v53  ;;  %359 = vst.msk [vmem:[%s693_s24 + $0x8] sm:$0xff] %vm340_vm8, %v357_v54 }
  0xca PF: > { %s15_s20 = sadd.s32 1, %s606_s20   ;;  %s736_s14 = smov %s594_s17 }
  0xcb   : > { %p12_p12 = scmp.ge.s32.totalorder %s15_s20, 98   ;;  %s737_s15 = smov %s598_s18 }
  0xcc   : > { %s738_s16 = smov %s602_s19  ;;  %s739_s17 = smov %s743_s2 }
  0xcd   : > { %s740_s18 = smov %s747_s21  ;;  %s741_s19 = smov %s751_s22 }
  0xce   :  { %14 = sbr.rel (!%p12_p12) target bundleno = 4 (0x4), region = 75 }

</bundles_post_ra>
